<compile_context>
chip_gen: v5e
topology: v5e:2x2
jax: 0.10.0
libtpu: 0.0.40
codegen_flags: <defaults>
</compile_context>

<pallas_src>
import functools

import jax
import jax.numpy as jnp
import numpy as np
from jax import lax
from jax.experimental import pallas as pl
from jax.experimental.pallas import tpu as pltpu

EPS = 1e-5  # nn.BatchNorm2d default eps


def residual_block_kernel(x_ref, w1_ref, gamma_ref, beta_ref, w2_ref, b2_ref,
                          out_ref, pad_ref, *, N, C, H, W):
    HW = H * W
    PAD = W + 1                      # flat halo: covers dy = +/-1 rows and dx = +/-1
    inv_m = 1.0 / float(N * HW)

    x = x_ref[...]                   # [N, C, HW] f32, lane-dense

    # Column masks for the 'same' zero padding in the w direction (row wrap).
    ww = lax.broadcasted_iota(jnp.int32, (N, C, HW), 2) % W
    col_mask = (ww >= 1, None, ww < (W - 1))     # for dx offsets -1, 0, +1

    # Zero only the halo strips of the shared flat-padded scratch (once; the
    # interior is rewritten for each conv, the halo stays zero).
    pad_ref[:, :, 0:PAD] = jnp.zeros((N, C, PAD), jnp.float32)
    pad_ref[:, :, PAD + HW:HW + 2 * PAD] = jnp.zeros((N, C, PAD), jnp.float32)

    def conv3x3(src, w_ref):
        # src: [N, C, HW]; w_ref: [9*Cin, Cout, 1], rows ordered (dy, dx, ci).
        pad_ref[:, :, PAD:PAD + HW] = src
        acc = jnp.zeros((N, C, HW), jnp.float32)
        for dy in range(3):
            for dx in range(3):
                t = dy * 3 + dx
                off = (dy - 1) * W + (dx - 1)
                # tap[p] = src[p + off] with zero padding outside the image:
                # the flat halo handles the h direction, the mask the w direction.
                tap = pad_ref[:, :, PAD + off:PAD + off + HW]
                m = col_mask[dx]
                if m is not None:
                    tap = jnp.where(m, tap, 0.0)
                for ci in range(C):
                    w_vec = w_ref[t * C + ci][None]            # [1, Cout, 1]
                    acc = acc + tap[:, ci:ci + 1, :] * w_vec   # lane-dense VPU FMA
        return acc

    # ---- conv1 (bias omitted: exactly cancelled by the BN mean subtraction) ----
    a1 = conv3x3(x, w1_ref)

    # ---- BatchNorm2d, training-mode batch statistics, single pass over a1 ----
    s1 = jnp.sum(jnp.sum(a1, axis=2, keepdims=True), axis=0, keepdims=True)
    s2 = jnp.sum(jnp.sum(a1 * a1, axis=2, keepdims=True), axis=0, keepdims=True)
    mean = s1 * inv_m                                    # [1, C, 1]
    var = s2 * inv_m - mean * mean                       # biased variance
    scale = gamma_ref[...] * lax.rsqrt(var + EPS)
    resid = jnp.maximum((a1 - mean) * scale + beta_ref[...], 0.0)

    # ---- conv2 + bias + residual add + ReLU ----
    a2 = conv3x3(resid, w2_ref)
    out_ref[...] = jnp.maximum(a2 + b2_ref[...] + x, 0.0)


def residual_block(x_nchw, params):
    """x_nchw: [N, C, H, W] float32 (PyTorch layout). Returns [N, C, H, W]."""
    w1, b1, gamma, beta, w2, b2 = params   # b1 unused: cancelled by training-mode BN
    N, C, H, W = x_nchw.shape
    HW = H * W
    PAD = W + 1

    x = x_nchw.reshape(N, C, HW).astype(jnp.float32)
    # HWIO [3,3,Cin,Cout] -> [9*Cin, Cout, 1], rows ordered (dy, dx, ci): the
    # Cout axis lands on sublanes, matching the kernel's channel axis.
    w1_k = w1.astype(jnp.float32).reshape(9 * C, C)[:, :, None]
    w2_k = w2.astype(jnp.float32).reshape(9 * C, C)[:, :, None]
    gamma_k = gamma.astype(jnp.float32).reshape(1, C, 1)
    beta_k = beta.astype(jnp.float32).reshape(1, C, 1)
    b2_k = b2.astype(jnp.float32).reshape(1, C, 1)

    kernel = functools.partial(residual_block_kernel, N=N, C=C, H=H, W=W)

    out = pl.pallas_call(
        kernel,
        out_shape=jax.ShapeDtypeStruct((N, C, HW), jnp.float32),
        in_specs=[pl.BlockSpec(memory_space=pltpu.MemorySpace.VMEM)] * 6,
        out_specs=pl.BlockSpec(memory_space=pltpu.MemorySpace.VMEM),
        scratch_shapes=[pltpu.VMEM((N, C, HW + 2 * PAD), jnp.float32)],
        compiler_params=pltpu.CompilerParams(vmem_limit_bytes=32 * 1024 * 1024),
    )(x, w1_k, gamma_k, beta_k, w2_k, b2_k)

    return out.reshape(N, C, H, W)


def ref_forward(x_nchw, params):
    """Pure-JAX reference matching the PyTorch module (training-mode BN)."""
    w1, b1, gamma, beta, w2, b2 = params
    x = jnp.transpose(x_nchw, (0, 2, 3, 1)).astype(jnp.float32)
    dn = ('NHWC', 'HWIO', 'NHWC')
    c1 = lax.conv_general_dilated(x, w1, (1, 1), 'SAME', dimension_numbers=dn,
                                  precision=lax.Precision.HIGHEST) + b1
    mean = jnp.mean(c1, axis=(0, 1, 2), keepdims=True)
    var = jnp.mean((c1 - mean) ** 2, axis=(0, 1, 2), keepdims=True)
    r = jnp.maximum((c1 - mean) * gamma / jnp.sqrt(var + EPS) + beta, 0.0)
    c2 = lax.conv_general_dilated(r, w2, (1, 1), 'SAME', dimension_numbers=dn,
                                  precision=lax.Precision.HIGHEST) + b2
    out = jnp.maximum(c2 + x, 0.0)
    return jnp.transpose(out, (0, 3, 1, 2))


if __name__ == "__main__":
    N, C, H, W = 2, 4, 16, 16

    key = jax.random.PRNGKey(0)
    kx, k1, kb1, kg, kbt, k2, kb2 = jax.random.split(key, 7)

    x = jax.random.normal(kx, (N, C, H, W), dtype=jnp.float32)

    # Deterministic synthetic parameters (HWIO conv weights).
    w1 = 0.1 * jax.random.normal(k1, (3, 3, C, C), dtype=jnp.float32)
    b1 = 0.05 * jax.random.normal(kb1, (C,), dtype=jnp.float32)
    gamma = 1.0 + 0.1 * jax.random.normal(kg, (C,), dtype=jnp.float32)
    beta = 0.05 * jax.random.normal(kbt, (C,), dtype=jnp.float32)
    w2 = 0.1 * jax.random.normal(k2, (3, 3, C, C), dtype=jnp.float32)
    b2 = 0.05 * jax.random.normal(kb2, (C,), dtype=jnp.float32)
    params = (w1, b1, gamma, beta, w2, b2)

    out = residual_block(x, params)
    out = jax.block_until_ready(out)

    ref = jax.block_until_ready(ref_forward(x, params))
    np.testing.assert_allclose(np.asarray(out), np.asarray(ref),
                               rtol=1e-4, atol=1e-4)

    print("KERNEL_OK")
</pallas_src>

<mosaic_0001>
module attributes {stable_mosaic.version = 11 : i64} {
  func.func @residual_block_kernel(%arg0: memref<2x4x256xf32, #tpu.memory_space<vmem>>, %arg1: memref<36x4x1xf32, #tpu.memory_space<vmem>>, %arg2: memref<1x4x1xf32, #tpu.memory_space<vmem>>, %arg3: memref<1x4x1xf32, #tpu.memory_space<vmem>>, %arg4: memref<36x4x1xf32, #tpu.memory_space<vmem>>, %arg5: memref<1x4x1xf32, #tpu.memory_space<vmem>>, %arg6: memref<2x4x256xf32, #tpu.memory_space<vmem>>, %arg7: memref<2x4x290xf32, #tpu.memory_space<vmem>>) attributes {dimension_semantics = [], scalar_prefetch = 0 : i64, scratch_operands = 1 : i64, tpu.core_type = #tpu.core_type<tc>} {
    %c0 = arith.constant 0 : index
    %c0_0 = arith.constant 0 : index
    %c0_1 = arith.constant 0 : index
    %0 = vector.load %arg0[%c0, %c0_0, %c0_1] : memref<2x4x256xf32, #tpu.memory_space<vmem>>, vector<2x4x256xf32>
    %1 = tpu.iota {dimensions = array<i32: 2>} : vector<2x4x256xi32>
    %c16_i32 = arith.constant 16 : i32
    %c0_i32 = arith.constant 0 : i32
    %2 = arith.cmpi eq, %c16_i32, %c0_i32 : i32
    %c1_i32 = arith.constant 1 : i32
    %3 = arith.select %2, %c1_i32, %c16_i32 : i32
    %4 = vector.broadcast %3 : i32 to vector<2x4x256xi32>
    %5 = arith.remsi %1, %4 : vector<2x4x256xi32>
    %c0_i32_2 = arith.constant 0 : i32
    %6 = vector.broadcast %c0_i32_2 : i32 to vector<2x4x256xi32>
    %7 = arith.cmpi ne, %5, %6 : vector<2x4x256xi32>
    %c0_i32_3 = arith.constant 0 : i32
    %8 = vector.broadcast %c0_i32_3 : i32 to vector<2x4x256xi32>
    %9 = arith.cmpi slt, %5, %8 : vector<2x4x256xi32>
    %c0_i32_4 = arith.constant 0 : i32
    %10 = arith.cmpi slt, %3, %c0_i32_4 : i32
    %11 = vector.broadcast %10 : i1 to vector<2x4x256xi1>
    %12 = vector.broadcast %11 : vector<2x4x256xi1> to vector<2x4x256xi1>
    %13 = arith.xori %9, %12 : vector<2x4x256xi1>
    %14 = arith.andi %13, %7 : vector<2x4x256xi1>
    %15 = vector.broadcast %3 : i32 to vector<2x4x256xi32>
    %16 = arith.addi %5, %15 : vector<2x4x256xi32>
    %17 = arith.select %14, %16, %5 : vector<2x4x256xi1>, vector<2x4x256xi32>
    %c1_i32_5 = arith.constant 1 : i32
    %18 = vector.broadcast %c1_i32_5 : i32 to vector<2x4x256xi32>
    %19 = arith.cmpi sge, %17, %18 : vector<2x4x256xi32>
    %c15_i32 = arith.constant 15 : i32
    %20 = vector.broadcast %c15_i32 : i32 to vector<2x4x256xi32>
    %21 = arith.cmpi slt, %17, %20 : vector<2x4x256xi32>
    %cst = arith.constant 0.000000e+00 : f32
    %22 = vector.broadcast %cst : f32 to vector<2x4x17xf32>
    %c0_6 = arith.constant 0 : index
    %c0_7 = arith.constant 0 : index
    %c0_8 = arith.constant 0 : index
    %23 = vector.load %arg7[%c0_6, %c0_7, %c0_8] : memref<2x4x290xf32, #tpu.memory_space<vmem>>, vector<2x4x17xf32>
    tpu.vector_store %arg7[%c0_6, %c0_7, %c0_8], %22 {strides = array<i32>} : memref<2x4x290xf32, #tpu.memory_space<vmem>>, vector<2x4x17xf32>,
    %cst_9 = arith.constant 0.000000e+00 : f32
    %24 = vector.broadcast %cst_9 : f32 to vector<2x4x17xf32>
    %c0_10 = arith.constant 0 : index
    %c0_11 = arith.constant 0 : index
    %c273 = arith.constant 273 : index
    %25 = vector.load %arg7[%c0_10, %c0_11, %c273] : memref<2x4x290xf32, #tpu.memory_space<vmem>>, vector<2x4x17xf32>
    tpu.vector_store %arg7[%c0_10, %c0_11, %c273], %24 {strides = array<i32>} : memref<2x4x290xf32, #tpu.memory_space<vmem>>, vector<2x4x17xf32>,
    %c0_12 = arith.constant 0 : index
    %c0_13 = arith.constant 0 : index
    %c17 = arith.constant 17 : index
    %26 = vector.load %arg7[%c0_12, %c0_13, %c17] : memref<2x4x290xf32, #tpu.memory_space<vmem>>, vector<2x4x256xf32>
    tpu.vector_store %arg7[%c0_12, %c0_13, %c17], %0 {strides = array<i32>} : memref<2x4x290xf32, #tpu.memory_space<vmem>>, vector<2x4x256xf32>,
    %cst_14 = arith.constant 0.000000e+00 : f32
    %27 = vector.broadcast %cst_14 : f32 to vector<2x4x256xf32>
    %c0_15 = arith.constant 0 : index
    %c0_16 = arith.constant 0 : index
    %c0_17 = arith.constant 0 : index
    %28 = vector.load %arg7[%c0_15, %c0_16, %c0_17] : memref<2x4x290xf32, #tpu.memory_space<vmem>>, vector<2x4x256xf32>
    %cst_18 = arith.constant 0.000000e+00 : f32
    %29 = vector.broadcast %cst_18 : f32 to vector<2x4x256xf32>
    %30 = arith.select %19, %28, %29 : vector<2x4x256xi1>, vector<2x4x256xf32>
    %c0_19 = arith.constant 0 : index
    %c0_20 = arith.constant 0 : index
    %c0_21 = arith.constant 0 : index
    %31 = vector.load %arg1[%c0_19, %c0_20, %c0_21] : memref<36x4x1xf32, #tpu.memory_space<vmem>>, vector<1x4x1xf32>
    %32 = vector.shape_cast %31 : vector<1x4x1xf32> to vector<4x1xf32>
    %33 = vector.shape_cast %32 : vector<4x1xf32> to vector<1x4x1xf32>
    %34 = vector.extract_strided_slice %30 {offsets = [0, 0, 0], sizes = [2, 1, 256], strides = [1, 1, 1]} : vector<2x4x256xf32> to vector<2x1x256xf32>
    %35 = vector.broadcast %34 : vector<2x1x256xf32> to vector<2x4x256xf32>
    %36 = vector.broadcast %33 : vector<1x4x1xf32> to vector<2x4x256xf32>
    %37 = arith.mulf %35, %36 : vector<2x4x256xf32>
    %38 = arith.addf %27, %37 : vector<2x4x256xf32>
    %c1 = arith.constant 1 : index
    %c0_22 = arith.constant 0 : index
    %c0_23 = arith.constant 0 : index
    %39 = vector.load %arg1[%c1, %c0_22, %c0_23] : memref<36x4x1xf32, #tpu.memory_space<vmem>>, vector<1x4x1xf32>
    %40 = vector.shape_cast %39 : vector<1x4x1xf32> to vector<4x1xf32>
    %41 = vector.shape_cast %40 : vector<4x1xf32> to vector<1x4x1xf32>
    %42 = vector.extract_strided_slice %30 {offsets = [0, 1, 0], sizes = [2, 1, 256], strides = [1, 1, 1]} : vector<2x4x256xf32> to vector<2x1x256xf32>
    %43 = vector.broadcast %42 : vector<2x1x256xf32> to vector<2x4x256xf32>
    %44 = vector.broadcast %41 : vector<1x4x1xf32> to vector<2x4x256xf32>
    %45 = arith.mulf %43, %44 : vector<2x4x256xf32>
    %46 = arith.addf %38, %45 : vector<2x4x256xf32>
    %c2 = arith.constant 2 : index
    %c0_24 = arith.constant 0 : index
    %c0_25 = arith.constant 0 : index
    %47 = vector.load %arg1[%c2, %c0_24, %c0_25] : memref<36x4x1xf32, #tpu.memory_space<vmem>>, vector<1x4x1xf32>
    %48 = vector.shape_cast %47 : vector<1x4x1xf32> to vector<4x1xf32>
    %49 = vector.shape_cast %48 : vector<4x1xf32> to vector<1x4x1xf32>
    %50 = vector.extract_strided_slice %30 {offsets = [0, 2, 0], sizes = [2, 1, 256], strides = [1, 1, 1]} : vector<2x4x256xf32> to vector<2x1x256xf32>
    %51 = vector.broadcast %50 : vector<2x1x256xf32> to vector<2x4x256xf32>
    %52 = vector.broadcast %49 : vector<1x4x1xf32> to vector<2x4x256xf32>
    %53 = arith.mulf %51, %52 : vector<2x4x256xf32>
    %54 = arith.addf %46, %53 : vector<2x4x256xf32>
    %c3 = arith.constant 3 : index
    %c0_26 = arith.constant 0 : index
    %c0_27 = arith.constant 0 : index
    %55 = vector.load %arg1[%c3, %c0_26, %c0_27] : memref<36x4x1xf32, #tpu.memory_space<vmem>>, vector<1x4x1xf32>
    %56 = vector.shape_cast %55 : vector<1x4x1xf32> to vector<4x1xf32>
    %57 = vector.shape_cast %56 : vector<4x1xf32> to vector<1x4x1xf32>
    %58 = vector.extract_strided_slice %30 {offsets = [0, 3, 0], sizes = [2, 1, 256], strides = [1, 1, 1]} : vector<2x4x256xf32> to vector<2x1x256xf32>
    %59 = vector.broadcast %58 : vector<2x1x256xf32> to vector<2x4x256xf32>
    %60 = vector.broadcast %57 : vector<1x4x1xf32> to vector<2x4x256xf32>
    %61 = arith.mulf %59, %60 : vector<2x4x256xf32>
    %62 = arith.addf %54, %61 : vector<2x4x256xf32>
    %c0_28 = arith.constant 0 : index
    %c0_29 = arith.constant 0 : index
    %c1_30 = arith.constant 1 : index
    %63 = vector.load %arg7[%c0_28, %c0_29, %c1_30] : memref<2x4x290xf32, #tpu.memory_space<vmem>>, vector<2x4x256xf32>
    %c4 = arith.constant 4 : index
    %c0_31 = arith.constant 0 : index
    %c0_32 = arith.constant 0 : index
    %64 = vector.load %arg1[%c4, %c0_31, %c0_32] : memref<36x4x1xf32, #tpu.memory_space<vmem>>, vector<1x4x1xf32>
    %65 = vector.shape_cast %64 : vector<1x4x1xf32> to vector<4x1xf32>
    %66 = vector.shape_cast %65 : vector<4x1xf32> to vector<1x4x1xf32>
    %67 = vector.extract_strided_slice %63 {offsets = [0, 0, 0], sizes = [2, 1, 256], strides = [1, 1, 1]} : vector<2x4x256xf32> to vector<2x1x256xf32>
    %68 = vector.broadcast %67 : vector<2x1x256xf32> to vector<2x4x256xf32>
    %69 = vector.broadcast %66 : vector<1x4x1xf32> to vector<2x4x256xf32>
    %70 = arith.mulf %68, %69 : vector<2x4x256xf32>
    %71 = arith.addf %62, %70 : vector<2x4x256xf32>
    %c5 = arith.constant 5 : index
    %c0_33 = arith.constant 0 : index
    %c0_34 = arith.constant 0 : index
    %72 = vector.load %arg1[%c5, %c0_33, %c0_34] : memref<36x4x1xf32, #tpu.memory_space<vmem>>, vector<1x4x1xf32>
    %73 = vector.shape_cast %72 : vector<1x4x1xf32> to vector<4x1xf32>
    %74 = vector.shape_cast %73 : vector<4x1xf32> to vector<1x4x1xf32>
    %75 = vector.extract_strided_slice %63 {offsets = [0, 1, 0], sizes = [2, 1, 256], strides = [1, 1, 1]} : vector<2x4x256xf32> to vector<2x1x256xf32>
    %76 = vector.broadcast %75 : vector<2x1x256xf32> to vector<2x4x256xf32>
    %77 = vector.broadcast %74 : vector<1x4x1xf32> to vector<2x4x256xf32>
    %78 = arith.mulf %76, %77 : vector<2x4x256xf32>
    %79 = arith.addf %71, %78 : vector<2x4x256xf32>
    %c6 = arith.constant 6 : index
    %c0_35 = arith.constant 0 : index
    %c0_36 = arith.constant 0 : index
    %80 = vector.load %arg1[%c6, %c0_35, %c0_36] : memref<36x4x1xf32, #tpu.memory_space<vmem>>, vector<1x4x1xf32>
    %81 = vector.shape_cast %80 : vector<1x4x1xf32> to vector<4x1xf32>
    %82 = vector.shape_cast %81 : vector<4x1xf32> to vector<1x4x1xf32>
    %83 = vector.extract_strided_slice %63 {offsets = [0, 2, 0], sizes = [2, 1, 256], strides = [1, 1, 1]} : vector<2x4x256xf32> to vector<2x1x256xf32>
    %84 = vector.broadcast %83 : vector<2x1x256xf32> to vector<2x4x256xf32>
    %85 = vector.broadcast %82 : vector<1x4x1xf32> to vector<2x4x256xf32>
    %86 = arith.mulf %84, %85 : vector<2x4x256xf32>
    %87 = arith.addf %79, %86 : vector<2x4x256xf32>
    %c7 = arith.constant 7 : index
    %c0_37 = arith.constant 0 : index
    %c0_38 = arith.constant 0 : index
    %88 = vector.load %arg1[%c7, %c0_37, %c0_38] : memref<36x4x1xf32, #tpu.memory_space<vmem>>, vector<1x4x1xf32>
    %89 = vector.shape_cast %88 : vector<1x4x1xf32> to vector<4x1xf32>
    %90 = vector.shape_cast %89 : vector<4x1xf32> to vector<1x4x1xf32>
    %91 = vector.extract_strided_slice %63 {offsets = [0, 3, 0], sizes = [2, 1, 256], strides = [1, 1, 1]} : vector<2x4x256xf32> to vector<2x1x256xf32>
    %92 = vector.broadcast %91 : vector<2x1x256xf32> to vector<2x4x256xf32>
    %93 = vector.broadcast %90 : vector<1x4x1xf32> to vector<2x4x256xf32>
    %94 = arith.mulf %92, %93 : vector<2x4x256xf32>
    %95 = arith.addf %87, %94 : vector<2x4x256xf32>
    %c0_39 = arith.constant 0 : index
    %c0_40 = arith.constant 0 : index
    %c2_41 = arith.constant 2 : index
    %96 = vector.load %arg7[%c0_39, %c0_40, %c2_41] : memref<2x4x290xf32, #tpu.memory_space<vmem>>, vector<2x4x256xf32>
    %cst_42 = arith.constant 0.000000e+00 : f32
    %97 = vector.broadcast %cst_42 : f32 to vector<2x4x256xf32>
    %98 = arith.select %21, %96, %97 : vector<2x4x256xi1>, vector<2x4x256xf32>
    %c8 = arith.constant 8 : index
    %c0_43 = arith.constant 0 : index
    %c0_44 = arith.constant 0 : index
    %99 = vector.load %arg1[%c8, %c0_43, %c0_44] : memref<36x4x1xf32, #tpu.memory_space<vmem>>, vector<1x4x1xf32>
    %100 = vector.shape_cast %99 : vector<1x4x1xf32> to vector<4x1xf32>
    %101 = vector.shape_cast %100 : vector<4x1xf32> to vector<1x4x1xf32>
    %102 = vector.extract_strided_slice %98 {offsets = [0, 0, 0], sizes = [2, 1, 256], strides = [1, 1, 1]} : vector<2x4x256xf32> to vector<2x1x256xf32>
    %103 = vector.broadcast %102 : vector<2x1x256xf32> to vector<2x4x256xf32>
    %104 = vector.broadcast %101 : vector<1x4x1xf32> to vector<2x4x256xf32>
    %105 = arith.mulf %103, %104 : vector<2x4x256xf32>
    %106 = arith.addf %95, %105 : vector<2x4x256xf32>
    %c9 = arith.constant 9 : index
    %c0_45 = arith.constant 0 : index
    %c0_46 = arith.constant 0 : index
    %107 = vector.load %arg1[%c9, %c0_45, %c0_46] : memref<36x4x1xf32, #tpu.memory_space<vmem>>, vector<1x4x1xf32>
    %108 = vector.shape_cast %107 : vector<1x4x1xf32> to vector<4x1xf32>
    %109 = vector.shape_cast %108 : vector<4x1xf32> to vector<1x4x1xf32>
    %110 = vector.extract_strided_slice %98 {offsets = [0, 1, 0], sizes = [2, 1, 256], strides = [1, 1, 1]} : vector<2x4x256xf32> to vector<2x1x256xf32>
    %111 = vector.broadcast %110 : vector<2x1x256xf32> to vector<2x4x256xf32>
    %112 = vector.broadcast %109 : vector<1x4x1xf32> to vector<2x4x256xf32>
    %113 = arith.mulf %111, %112 : vector<2x4x256xf32>
    %114 = arith.addf %106, %113 : vector<2x4x256xf32>
    %c10 = arith.constant 10 : index
    %c0_47 = arith.constant 0 : index
    %c0_48 = arith.constant 0 : index
    %115 = vector.load %arg1[%c10, %c0_47, %c0_48] : memref<36x4x1xf32, #tpu.memory_space<vmem>>, vector<1x4x1xf32>
    %116 = vector.shape_cast %115 : vector<1x4x1xf32> to vector<4x1xf32>
    %117 = vector.shape_cast %116 : vector<4x1xf32> to vector<1x4x1xf32>
    %118 = vector.extract_strided_slice %98 {offsets = [0, 2, 0], sizes = [2, 1, 256], strides = [1, 1, 1]} : vector<2x4x256xf32> to vector<2x1x256xf32>
    %119 = vector.broadcast %118 : vector<2x1x256xf32> to vector<2x4x256xf32>
    %120 = vector.broadcast %117 : vector<1x4x1xf32> to vector<2x4x256xf32>
    %121 = arith.mulf %119, %120 : vector<2x4x256xf32>
    %122 = arith.addf %114, %121 : vector<2x4x256xf32>
    %c11 = arith.constant 11 : index
    %c0_49 = arith.constant 0 : index
    %c0_50 = arith.constant 0 : index
    %123 = vector.load %arg1[%c11, %c0_49, %c0_50] : memref<36x4x1xf32, #tpu.memory_space<vmem>>, vector<1x4x1xf32>
    %124 = vector.shape_cast %123 : vector<1x4x1xf32> to vector<4x1xf32>
    %125 = vector.shape_cast %124 : vector<4x1xf32> to vector<1x4x1xf32>
    %126 = vector.extract_strided_slice %98 {offsets = [0, 3, 0], sizes = [2, 1, 256], strides = [1, 1, 1]} : vector<2x4x256xf32> to vector<2x1x256xf32>
    %127 = vector.broadcast %126 : vector<2x1x256xf32> to vector<2x4x256xf32>
    %128 = vector.broadcast %125 : vector<1x4x1xf32> to vector<2x4x256xf32>
    %129 = arith.mulf %127, %128 : vector<2x4x256xf32>
    %130 = arith.addf %122, %129 : vector<2x4x256xf32>
    %c0_51 = arith.constant 0 : index
    %c0_52 = arith.constant 0 : index
    %c16 = arith.constant 16 : index
    %131 = vector.load %arg7[%c0_51, %c0_52, %c16] : memref<2x4x290xf32, #tpu.memory_space<vmem>>, vector<2x4x256xf32>
    %cst_53 = arith.constant 0.000000e+00 : f32
    %132 = vector.broadcast %cst_53 : f32 to vector<2x4x256xf32>
    %133 = arith.select %19, %131, %132 : vector<2x4x256xi1>, vector<2x4x256xf32>
    %c12 = arith.constant 12 : index
    %c0_54 = arith.constant 0 : index
    %c0_55 = arith.constant 0 : index
    %134 = vector.load %arg1[%c12, %c0_54, %c0_55] : memref<36x4x1xf32, #tpu.memory_space<vmem>>, vector<1x4x1xf32>
    %135 = vector.shape_cast %134 : vector<1x4x1xf32> to vector<4x1xf32>
    %136 = vector.shape_cast %135 : vector<4x1xf32> to vector<1x4x1xf32>
    %137 = vector.extract_strided_slice %133 {offsets = [0, 0, 0], sizes = [2, 1, 256], strides = [1, 1, 1]} : vector<2x4x256xf32> to vector<2x1x256xf32>
    %138 = vector.broadcast %137 : vector<2x1x256xf32> to vector<2x4x256xf32>
    %139 = vector.broadcast %136 : vector<1x4x1xf32> to vector<2x4x256xf32>
    %140 = arith.mulf %138, %139 : vector<2x4x256xf32>
    %141 = arith.addf %130, %140 : vector<2x4x256xf32>
    %c13 = arith.constant 13 : index
    %c0_56 = arith.constant 0 : index
    %c0_57 = arith.constant 0 : index
    %142 = vector.load %arg1[%c13, %c0_56, %c0_57] : memref<36x4x1xf32, #tpu.memory_space<vmem>>, vector<1x4x1xf32>
    %143 = vector.shape_cast %142 : vector<1x4x1xf32> to vector<4x1xf32>
    %144 = vector.shape_cast %143 : vector<4x1xf32> to vector<1x4x1xf32>
    %145 = vector.extract_strided_slice %133 {offsets = [0, 1, 0], sizes = [2, 1, 256], strides = [1, 1, 1]} : vector<2x4x256xf32> to vector<2x1x256xf32>
    %146 = vector.broadcast %145 : vector<2x1x256xf32> to vector<2x4x256xf32>
    %147 = vector.broadcast %144 : vector<1x4x1xf32> to vector<2x4x256xf32>
    %148 = arith.mulf %146, %147 : vector<2x4x256xf32>
    %149 = arith.addf %141, %148 : vector<2x4x256xf32>
    %c14 = arith.constant 14 : index
    %c0_58 = arith.constant 0 : index
    %c0_59 = arith.constant 0 : index
    %150 = vector.load %arg1[%c14, %c0_58, %c0_59] : memref<36x4x1xf32, #tpu.memory_space<vmem>>, vector<1x4x1xf32>
    %151 = vector.shape_cast %150 : vector<1x4x1xf32> to vector<4x1xf32>
    %152 = vector.shape_cast %151 : vector<4x1xf32> to vector<1x4x1xf32>
    %153 = vector.extract_strided_slice %133 {offsets = [0, 2, 0], sizes = [2, 1, 256], strides = [1, 1, 1]} : vector<2x4x256xf32> to vector<2x1x256xf32>
    %154 = vector.broadcast %153 : vector<2x1x256xf32> to vector<2x4x256xf32>
    %155 = vector.broadcast %152 : vector<1x4x1xf32> to vector<2x4x256xf32>
    %156 = arith.mulf %154, %155 : vector<2x4x256xf32>
    %157 = arith.addf %149, %156 : vector<2x4x256xf32>
    %c15 = arith.constant 15 : index
    %c0_60 = arith.constant 0 : index
    %c0_61 = arith.constant 0 : index
    %158 = vector.load %arg1[%c15, %c0_60, %c0_61] : memref<36x4x1xf32, #tpu.memory_space<vmem>>, vector<1x4x1xf32>
    %159 = vector.shape_cast %158 : vector<1x4x1xf32> to vector<4x1xf32>
    %160 = vector.shape_cast %159 : vector<4x1xf32> to vector<1x4x1xf32>
    %161 = vector.extract_strided_slice %133 {offsets = [0, 3, 0], sizes = [2, 1, 256], strides = [1, 1, 1]} : vector<2x4x256xf32> to vector<2x1x256xf32>
    %162 = vector.broadcast %161 : vector<2x1x256xf32> to vector<2x4x256xf32>
    %163 = vector.broadcast %160 : vector<1x4x1xf32> to vector<2x4x256xf32>
    %164 = arith.mulf %162, %163 : vector<2x4x256xf32>
    %165 = arith.addf %157, %164 : vector<2x4x256xf32>
    %c0_62 = arith.constant 0 : index
    %c0_63 = arith.constant 0 : index
    %c17_64 = arith.constant 17 : index
    %166 = vector.load %arg7[%c0_62, %c0_63, %c17_64] : memref<2x4x290xf32, #tpu.memory_space<vmem>>, vector<2x4x256xf32>
    %c16_65 = arith.constant 16 : index
    %c0_66 = arith.constant 0 : index
    %c0_67 = arith.constant 0 : index
    %167 = vector.load %arg1[%c16_65, %c0_66, %c0_67] : memref<36x4x1xf32, #tpu.memory_space<vmem>>, vector<1x4x1xf32>
    %168 = vector.shape_cast %167 : vector<1x4x1xf32> to vector<4x1xf32>
    %169 = vector.shape_cast %168 : vector<4x1xf32> to vector<1x4x1xf32>
    %170 = vector.extract_strided_slice %166 {offsets = [0, 0, 0], sizes = [2, 1, 256], strides = [1, 1, 1]} : vector<2x4x256xf32> to vector<2x1x256xf32>
    %171 = vector.broadcast %170 : vector<2x1x256xf32> to vector<2x4x256xf32>
    %172 = vector.broadcast %169 : vector<1x4x1xf32> to vector<2x4x256xf32>
    %173 = arith.mulf %171, %172 : vector<2x4x256xf32>
    %174 = arith.addf %165, %173 : vector<2x4x256xf32>
    %c17_68 = arith.constant 17 : index
    %c0_69 = arith.constant 0 : index
    %c0_70 = arith.constant 0 : index
    %175 = vector.load %arg1[%c17_68, %c0_69, %c0_70] : memref<36x4x1xf32, #tpu.memory_space<vmem>>, vector<1x4x1xf32>
    %176 = vector.shape_cast %175 : vector<1x4x1xf32> to vector<4x1xf32>
    %177 = vector.shape_cast %176 : vector<4x1xf32> to vector<1x4x1xf32>
    %178 = vector.extract_strided_slice %166 {offsets = [0, 1, 0], sizes = [2, 1, 256], strides = [1, 1, 1]} : vector<2x4x256xf32> to vector<2x1x256xf32>
    %179 = vector.broadcast %178 : vector<2x1x256xf32> to vector<2x4x256xf32>
    %180 = vector.broadcast %177 : vector<1x4x1xf32> to vector<2x4x256xf32>
    %181 = arith.mulf %179, %180 : vector<2x4x256xf32>
    %182 = arith.addf %174, %181 : vector<2x4x256xf32>
    %c18 = arith.constant 18 : index
    %c0_71 = arith.constant 0 : index
    %c0_72 = arith.constant 0 : index
    %183 = vector.load %arg1[%c18, %c0_71, %c0_72] : memref<36x4x1xf32, #tpu.memory_space<vmem>>, vector<1x4x1xf32>
    %184 = vector.shape_cast %183 : vector<1x4x1xf32> to vector<4x1xf32>
    %185 = vector.shape_cast %184 : vector<4x1xf32> to vector<1x4x1xf32>
    %186 = vector.extract_strided_slice %166 {offsets = [0, 2, 0], sizes = [2, 1, 256], strides = [1, 1, 1]} : vector<2x4x256xf32> to vector<2x1x256xf32>
    %187 = vector.broadcast %186 : vector<2x1x256xf32> to vector<2x4x256xf32>
    %188 = vector.broadcast %185 : vector<1x4x1xf32> to vector<2x4x256xf32>
    %189 = arith.mulf %187, %188 : vector<2x4x256xf32>
    %190 = arith.addf %182, %189 : vector<2x4x256xf32>
    %c19 = arith.constant 19 : index
    %c0_73 = arith.constant 0 : index
    %c0_74 = arith.constant 0 : index
    %191 = vector.load %arg1[%c19, %c0_73, %c0_74] : memref<36x4x1xf32, #tpu.memory_space<vmem>>, vector<1x4x1xf32>
    %192 = vector.shape_cast %191 : vector<1x4x1xf32> to vector<4x1xf32>
    %193 = vector.shape_cast %192 : vector<4x1xf32> to vector<1x4x1xf32>
    %194 = vector.extract_strided_slice %166 {offsets = [0, 3, 0], sizes = [2, 1, 256], strides = [1, 1, 1]} : vector<2x4x256xf32> to vector<2x1x256xf32>
    %195 = vector.broadcast %194 : vector<2x1x256xf32> to vector<2x4x256xf32>
    %196 = vector.broadcast %193 : vector<1x4x1xf32> to vector<2x4x256xf32>
    %197 = arith.mulf %195, %196 : vector<2x4x256xf32>
    %198 = arith.addf %190, %197 : vector<2x4x256xf32>
    %c0_75 = arith.constant 0 : index
    %c0_76 = arith.constant 0 : index
    %c18_77 = arith.constant 18 : index
    %199 = vector.load %arg7[%c0_75, %c0_76, %c18_77] : memref<2x4x290xf32, #tpu.memory_space<vmem>>, vector<2x4x256xf32>
    %cst_78 = arith.constant 0.000000e+00 : f32
    %200 = vector.broadcast %cst_78 : f32 to vector<2x4x256xf32>
    %201 = arith.select %21, %199, %200 : vector<2x4x256xi1>, vector<2x4x256xf32>
    %c20 = arith.constant 20 : index
    %c0_79 = arith.constant 0 : index
    %c0_80 = arith.constant 0 : index
    %202 = vector.load %arg1[%c20, %c0_79, %c0_80] : memref<36x4x1xf32, #tpu.memory_space<vmem>>, vector<1x4x1xf32>
    %203 = vector.shape_cast %202 : vector<1x4x1xf32> to vector<4x1xf32>
    %204 = vector.shape_cast %203 : vector<4x1xf32> to vector<1x4x1xf32>
    %205 = vector.extract_strided_slice %201 {offsets = [0, 0, 0], sizes = [2, 1, 256], strides = [1, 1, 1]} : vector<2x4x256xf32> to vector<2x1x256xf32>
    %206 = vector.broadcast %205 : vector<2x1x256xf32> to vector<2x4x256xf32>
    %207 = vector.broadcast %204 : vector<1x4x1xf32> to vector<2x4x256xf32>
    %208 = arith.mulf %206, %207 : vector<2x4x256xf32>
    %209 = arith.addf %198, %208 : vector<2x4x256xf32>
    %c21 = arith.constant 21 : index
    %c0_81 = arith.constant 0 : index
    %c0_82 = arith.constant 0 : index
    %210 = vector.load %arg1[%c21, %c0_81, %c0_82] : memref<36x4x1xf32, #tpu.memory_space<vmem>>, vector<1x4x1xf32>
    %211 = vector.shape_cast %210 : vector<1x4x1xf32> to vector<4x1xf32>
    %212 = vector.shape_cast %211 : vector<4x1xf32> to vector<1x4x1xf32>
    %213 = vector.extract_strided_slice %201 {offsets = [0, 1, 0], sizes = [2, 1, 256], strides = [1, 1, 1]} : vector<2x4x256xf32> to vector<2x1x256xf32>
    %214 = vector.broadcast %213 : vector<2x1x256xf32> to vector<2x4x256xf32>
    %215 = vector.broadcast %212 : vector<1x4x1xf32> to vector<2x4x256xf32>
    %216 = arith.mulf %214, %215 : vector<2x4x256xf32>
    %217 = arith.addf %209, %216 : vector<2x4x256xf32>
    %c22 = arith.constant 22 : index
    %c0_83 = arith.constant 0 : index
    %c0_84 = arith.constant 0 : index
    %218 = vector.load %arg1[%c22, %c0_83, %c0_84] : memref<36x4x1xf32, #tpu.memory_space<vmem>>, vector<1x4x1xf32>
    %219 = vector.shape_cast %218 : vector<1x4x1xf32> to vector<4x1xf32>
    %220 = vector.shape_cast %219 : vector<4x1xf32> to vector<1x4x1xf32>
    %221 = vector.extract_strided_slice %201 {offsets = [0, 2, 0], sizes = [2, 1, 256], strides = [1, 1, 1]} : vector<2x4x256xf32> to vector<2x1x256xf32>
    %222 = vector.broadcast %221 : vector<2x1x256xf32> to vector<2x4x256xf32>
    %223 = vector.broadcast %220 : vector<1x4x1xf32> to vector<2x4x256xf32>
    %224 = arith.mulf %222, %223 : vector<2x4x256xf32>
    %225 = arith.addf %217, %224 : vector<2x4x256xf32>
    %c23 = arith.constant 23 : index
    %c0_85 = arith.constant 0 : index
    %c0_86 = arith.constant 0 : index
    %226 = vector.load %arg1[%c23, %c0_85, %c0_86] : memref<36x4x1xf32, #tpu.memory_space<vmem>>, vector<1x4x1xf32>
    %227 = vector.shape_cast %226 : vector<1x4x1xf32> to vector<4x1xf32>
    %228 = vector.shape_cast %227 : vector<4x1xf32> to vector<1x4x1xf32>
    %229 = vector.extract_strided_slice %201 {offsets = [0, 3, 0], sizes = [2, 1, 256], strides = [1, 1, 1]} : vector<2x4x256xf32> to vector<2x1x256xf32>
    %230 = vector.broadcast %229 : vector<2x1x256xf32> to vector<2x4x256xf32>
    %231 = vector.broadcast %228 : vector<1x4x1xf32> to vector<2x4x256xf32>
    %232 = arith.mulf %230, %231 : vector<2x4x256xf32>
    %233 = arith.addf %225, %232 : vector<2x4x256xf32>
    %c0_87 = arith.constant 0 : index
    %c0_88 = arith.constant 0 : index
    %c32 = arith.constant 32 : index
    %234 = vector.load %arg7[%c0_87, %c0_88, %c32] : memref<2x4x290xf32, #tpu.memory_space<vmem>>, vector<2x4x256xf32>
    %cst_89 = arith.constant 0.000000e+00 : f32
    %235 = vector.broadcast %cst_89 : f32 to vector<2x4x256xf32>
    %236 = arith.select %19, %234, %235 : vector<2x4x256xi1>, vector<2x4x256xf32>
    %c24 = arith.constant 24 : index
    %c0_90 = arith.constant 0 : index
    %c0_91 = arith.constant 0 : index
    %237 = vector.load %arg1[%c24, %c0_90, %c0_91] : memref<36x4x1xf32, #tpu.memory_space<vmem>>, vector<1x4x1xf32>
    %238 = vector.shape_cast %237 : vector<1x4x1xf32> to vector<4x1xf32>
    %239 = vector.shape_cast %238 : vector<4x1xf32> to vector<1x4x1xf32>
    %240 = vector.extract_strided_slice %236 {offsets = [0, 0, 0], sizes = [2, 1, 256], strides = [1, 1, 1]} : vector<2x4x256xf32> to vector<2x1x256xf32>
    %241 = vector.broadcast %240 : vector<2x1x256xf32> to vector<2x4x256xf32>
    %242 = vector.broadcast %239 : vector<1x4x1xf32> to vector<2x4x256xf32>
    %243 = arith.mulf %241, %242 : vector<2x4x256xf32>
    %244 = arith.addf %233, %243 : vector<2x4x256xf32>
    %c25 = arith.constant 25 : index
    %c0_92 = arith.constant 0 : index
    %c0_93 = arith.constant 0 : index
    %245 = vector.load %arg1[%c25, %c0_92, %c0_93] : memref<36x4x1xf32, #tpu.memory_space<vmem>>, vector<1x4x1xf32>
    %246 = vector.shape_cast %245 : vector<1x4x1xf32> to vector<4x1xf32>
    %247 = vector.shape_cast %246 : vector<4x1xf32> to vector<1x4x1xf32>
    %248 = vector.extract_strided_slice %236 {offsets = [0, 1, 0], sizes = [2, 1, 256], strides = [1, 1, 1]} : vector<2x4x256xf32> to vector<2x1x256xf32>
    %249 = vector.broadcast %248 : vector<2x1x256xf32> to vector<2x4x256xf32>
    %250 = vector.broadcast %247 : vector<1x4x1xf32> to vector<2x4x256xf32>
    %251 = arith.mulf %249, %250 : vector<2x4x256xf32>
    %252 = arith.addf %244, %251 : vector<2x4x256xf32>
    %c26 = arith.constant 26 : index
    %c0_94 = arith.constant 0 : index
    %c0_95 = arith.constant 0 : index
    %253 = vector.load %arg1[%c26, %c0_94, %c0_95] : memref<36x4x1xf32, #tpu.memory_space<vmem>>, vector<1x4x1xf32>
    %254 = vector.shape_cast %253 : vector<1x4x1xf32> to vector<4x1xf32>
    %255 = vector.shape_cast %254 : vector<4x1xf32> to vector<1x4x1xf32>
    %256 = vector.extract_strided_slice %236 {offsets = [0, 2, 0], sizes = [2, 1, 256], strides = [1, 1, 1]} : vector<2x4x256xf32> to vector<2x1x256xf32>
    %257 = vector.broadcast %256 : vector<2x1x256xf32> to vector<2x4x256xf32>
    %258 = vector.broadcast %255 : vector<1x4x1xf32> to vector<2x4x256xf32>
    %259 = arith.mulf %257, %258 : vector<2x4x256xf32>
    %260 = arith.addf %252, %259 : vector<2x4x256xf32>
    %c27 = arith.constant 27 : index
    %c0_96 = arith.constant 0 : index
    %c0_97 = arith.constant 0 : index
    %261 = vector.load %arg1[%c27, %c0_96, %c0_97] : memref<36x4x1xf32, #tpu.memory_space<vmem>>, vector<1x4x1xf32>
    %262 = vector.shape_cast %261 : vector<1x4x1xf32> to vector<4x1xf32>
    %263 = vector.shape_cast %262 : vector<4x1xf32> to vector<1x4x1xf32>
    %264 = vector.extract_strided_slice %236 {offsets = [0, 3, 0], sizes = [2, 1, 256], strides = [1, 1, 1]} : vector<2x4x256xf32> to vector<2x1x256xf32>
    %265 = vector.broadcast %264 : vector<2x1x256xf32> to vector<2x4x256xf32>
    %266 = vector.broadcast %263 : vector<1x4x1xf32> to vector<2x4x256xf32>
    %267 = arith.mulf %265, %266 : vector<2x4x256xf32>
    %268 = arith.addf %260, %267 : vector<2x4x256xf32>
    %c0_98 = arith.constant 0 : index
    %c0_99 = arith.constant 0 : index
    %c33 = arith.constant 33 : index
    %269 = vector.load %arg7[%c0_98, %c0_99, %c33] : memref<2x4x290xf32, #tpu.memory_space<vmem>>, vector<2x4x256xf32>
    %c28 = arith.constant 28 : index
    %c0_100 = arith.constant 0 : index
    %c0_101 = arith.constant 0 : index
    %270 = vector.load %arg1[%c28, %c0_100, %c0_101] : memref<36x4x1xf32, #tpu.memory_space<vmem>>, vector<1x4x1xf32>
    %271 = vector.shape_cast %270 : vector<1x4x1xf32> to vector<4x1xf32>
    %272 = vector.shape_cast %271 : vector<4x1xf32> to vector<1x4x1xf32>
    %273 = vector.extract_strided_slice %269 {offsets = [0, 0, 0], sizes = [2, 1, 256], strides = [1, 1, 1]} : vector<2x4x256xf32> to vector<2x1x256xf32>
    %274 = vector.broadcast %273 : vector<2x1x256xf32> to vector<2x4x256xf32>
    %275 = vector.broadcast %272 : vector<1x4x1xf32> to vector<2x4x256xf32>
    %276 = arith.mulf %274, %275 : vector<2x4x256xf32>
    %277 = arith.addf %268, %276 : vector<2x4x256xf32>
    %c29 = arith.constant 29 : index
    %c0_102 = arith.constant 0 : index
    %c0_103 = arith.constant 0 : index
    %278 = vector.load %arg1[%c29, %c0_102, %c0_103] : memref<36x4x1xf32, #tpu.memory_space<vmem>>, vector<1x4x1xf32>
    %279 = vector.shape_cast %278 : vector<1x4x1xf32> to vector<4x1xf32>
    %280 = vector.shape_cast %279 : vector<4x1xf32> to vector<1x4x1xf32>
    %281 = vector.extract_strided_slice %269 {offsets = [0, 1, 0], sizes = [2, 1, 256], strides = [1, 1, 1]} : vector<2x4x256xf32> to vector<2x1x256xf32>
    %282 = vector.broadcast %281 : vector<2x1x256xf32> to vector<2x4x256xf32>
    %283 = vector.broadcast %280 : vector<1x4x1xf32> to vector<2x4x256xf32>
    %284 = arith.mulf %282, %283 : vector<2x4x256xf32>
    %285 = arith.addf %277, %284 : vector<2x4x256xf32>
    %c30 = arith.constant 30 : index
    %c0_104 = arith.constant 0 : index
    %c0_105 = arith.constant 0 : index
    %286 = vector.load %arg1[%c30, %c0_104, %c0_105] : memref<36x4x1xf32, #tpu.memory_space<vmem>>, vector<1x4x1xf32>
    %287 = vector.shape_cast %286 : vector<1x4x1xf32> to vector<4x1xf32>
    %288 = vector.shape_cast %287 : vector<4x1xf32> to vector<1x4x1xf32>
    %289 = vector.extract_strided_slice %269 {offsets = [0, 2, 0], sizes = [2, 1, 256], strides = [1, 1, 1]} : vector<2x4x256xf32> to vector<2x1x256xf32>
    %290 = vector.broadcast %289 : vector<2x1x256xf32> to vector<2x4x256xf32>
    %291 = vector.broadcast %288 : vector<1x4x1xf32> to vector<2x4x256xf32>
    %292 = arith.mulf %290, %291 : vector<2x4x256xf32>
    %293 = arith.addf %285, %292 : vector<2x4x256xf32>
    %c31 = arith.constant 31 : index
    %c0_106 = arith.constant 0 : index
    %c0_107 = arith.constant 0 : index
    %294 = vector.load %arg1[%c31, %c0_106, %c0_107] : memref<36x4x1xf32, #tpu.memory_space<vmem>>, vector<1x4x1xf32>
    %295 = vector.shape_cast %294 : vector<1x4x1xf32> to vector<4x1xf32>
    %296 = vector.shape_cast %295 : vector<4x1xf32> to vector<1x4x1xf32>
    %297 = vector.extract_strided_slice %269 {offsets = [0, 3, 0], sizes = [2, 1, 256], strides = [1, 1, 1]} : vector<2x4x256xf32> to vector<2x1x256xf32>
    %298 = vector.broadcast %297 : vector<2x1x256xf32> to vector<2x4x256xf32>
    %299 = vector.broadcast %296 : vector<1x4x1xf32> to vector<2x4x256xf32>
    %300 = arith.mulf %298, %299 : vector<2x4x256xf32>
    %301 = arith.addf %293, %300 : vector<2x4x256xf32>
    %c0_108 = arith.constant 0 : index
    %c0_109 = arith.constant 0 : index
    %c34 = arith.constant 34 : index
    %302 = vector.load %arg7[%c0_108, %c0_109, %c34] : memref<2x4x290xf32, #tpu.memory_space<vmem>>, vector<2x4x256xf32>
    %cst_110 = arith.constant 0.000000e+00 : f32
    %303 = vector.broadcast %cst_110 : f32 to vector<2x4x256xf32>
    %304 = arith.select %21, %302, %303 : vector<2x4x256xi1>, vector<2x4x256xf32>
    %c32_111 = arith.constant 32 : index
    %c0_112 = arith.constant 0 : index
    %c0_113 = arith.constant 0 : index
    %305 = vector.load %arg1[%c32_111, %c0_112, %c0_113] : memref<36x4x1xf32, #tpu.memory_space<vmem>>, vector<1x4x1xf32>
    %306 = vector.shape_cast %305 : vector<1x4x1xf32> to vector<4x1xf32>
    %307 = vector.shape_cast %306 : vector<4x1xf32> to vector<1x4x1xf32>
    %308 = vector.extract_strided_slice %304 {offsets = [0, 0, 0], sizes = [2, 1, 256], strides = [1, 1, 1]} : vector<2x4x256xf32> to vector<2x1x256xf32>
    %309 = vector.broadcast %308 : vector<2x1x256xf32> to vector<2x4x256xf32>
    %310 = vector.broadcast %307 : vector<1x4x1xf32> to vector<2x4x256xf32>
    %311 = arith.mulf %309, %310 : vector<2x4x256xf32>
    %312 = arith.addf %301, %311 : vector<2x4x256xf32>
    %c33_114 = arith.constant 33 : index
    %c0_115 = arith.constant 0 : index
    %c0_116 = arith.constant 0 : index
    %313 = vector.load %arg1[%c33_114, %c0_115, %c0_116] : memref<36x4x1xf32, #tpu.memory_space<vmem>>, vector<1x4x1xf32>
    %314 = vector.shape_cast %313 : vector<1x4x1xf32> to vector<4x1xf32>
    %315 = vector.shape_cast %314 : vector<4x1xf32> to vector<1x4x1xf32>
    %316 = vector.extract_strided_slice %304 {offsets = [0, 1, 0], sizes = [2, 1, 256], strides = [1, 1, 1]} : vector<2x4x256xf32> to vector<2x1x256xf32>
    %317 = vector.broadcast %316 : vector<2x1x256xf32> to vector<2x4x256xf32>
    %318 = vector.broadcast %315 : vector<1x4x1xf32> to vector<2x4x256xf32>
    %319 = arith.mulf %317, %318 : vector<2x4x256xf32>
    %320 = arith.addf %312, %319 : vector<2x4x256xf32>
    %c34_117 = arith.constant 34 : index
    %c0_118 = arith.constant 0 : index
    %c0_119 = arith.constant 0 : index
    %321 = vector.load %arg1[%c34_117, %c0_118, %c0_119] : memref<36x4x1xf32, #tpu.memory_space<vmem>>, vector<1x4x1xf32>
    %322 = vector.shape_cast %321 : vector<1x4x1xf32> to vector<4x1xf32>
    %323 = vector.shape_cast %322 : vector<4x1xf32> to vector<1x4x1xf32>
    %324 = vector.extract_strided_slice %304 {offsets = [0, 2, 0], sizes = [2, 1, 256], strides = [1, 1, 1]} : vector<2x4x256xf32> to vector<2x1x256xf32>
    %325 = vector.broadcast %324 : vector<2x1x256xf32> to vector<2x4x256xf32>
    %326 = vector.broadcast %323 : vector<1x4x1xf32> to vector<2x4x256xf32>
    %327 = arith.mulf %325, %326 : vector<2x4x256xf32>
    %328 = arith.addf %320, %327 : vector<2x4x256xf32>
    %c35 = arith.constant 35 : index
    %c0_120 = arith.constant 0 : index
    %c0_121 = arith.constant 0 : index
    %329 = vector.load %arg1[%c35, %c0_120, %c0_121] : memref<36x4x1xf32, #tpu.memory_space<vmem>>, vector<1x4x1xf32>
    %330 = vector.shape_cast %329 : vector<1x4x1xf32> to vector<4x1xf32>
    %331 = vector.shape_cast %330 : vector<4x1xf32> to vector<1x4x1xf32>
    %332 = vector.extract_strided_slice %304 {offsets = [0, 3, 0], sizes = [2, 1, 256], strides = [1, 1, 1]} : vector<2x4x256xf32> to vector<2x1x256xf32>
    %333 = vector.broadcast %332 : vector<2x1x256xf32> to vector<2x4x256xf32>
    %334 = vector.broadcast %331 : vector<1x4x1xf32> to vector<2x4x256xf32>
    %335 = arith.mulf %333, %334 : vector<2x4x256xf32>
    %336 = arith.addf %328, %335 : vector<2x4x256xf32>
    %cst_122 = arith.constant dense<0.000000e+00> : vector<2x4xf32>
    %337 = vector.multi_reduction <add>, %336, %cst_122 [2] : vector<2x4x256xf32> to vector<2x4xf32>
    %338 = vector.shape_cast %337 : vector<2x4xf32> to vector<2x4x1xf32>
    %cst_123 = arith.constant dense<0.000000e+00> : vector<4x1xf32>
    %339 = vector.multi_reduction <add>, %338, %cst_123 [0] : vector<2x4x1xf32> to vector<4x1xf32>
    %340 = vector.shape_cast %339 : vector<4x1xf32> to vector<1x4x1xf32>
    %341 = arith.mulf %336, %336 : vector<2x4x256xf32>
    %cst_124 = arith.constant dense<0.000000e+00> : vector<2x4xf32>
    %342 = vector.multi_reduction <add>, %341, %cst_124 [2] : vector<2x4x256xf32> to vector<2x4xf32>
    %343 = vector.shape_cast %342 : vector<2x4xf32> to vector<2x4x1xf32>
    %cst_125 = arith.constant dense<0.000000e+00> : vector<4x1xf32>
    %344 = vector.multi_reduction <add>, %343, %cst_125 [0] : vector<2x4x1xf32> to vector<4x1xf32>
    %345 = vector.shape_cast %344 : vector<4x1xf32> to vector<1x4x1xf32>
    %cst_126 = arith.constant 0.001953125 : f32
    %346 = vector.broadcast %cst_126 : f32 to vector<1x4x1xf32>
    %347 = arith.mulf %340, %346 : vector<1x4x1xf32>
    %cst_127 = arith.constant 0.001953125 : f32
    %348 = vector.broadcast %cst_127 : f32 to vector<1x4x1xf32>
    %349 = arith.mulf %345, %348 : vector<1x4x1xf32>
    %350 = arith.mulf %347, %347 : vector<1x4x1xf32>
    %351 = arith.subf %349, %350 : vector<1x4x1xf32>
    %c0_128 = arith.constant 0 : index
    %c0_129 = arith.constant 0 : index
    %c0_130 = arith.constant 0 : index
    %352 = vector.load %arg2[%c0_128, %c0_129, %c0_130] : memref<1x4x1xf32, #tpu.memory_space<vmem>>, vector<1x4x1xf32>
    %cst_131 = arith.constant 9.99999974E-6 : f32
    %353 = vector.broadcast %cst_131 : f32 to vector<1x4x1xf32>
    %354 = arith.addf %351, %353 : vector<1x4x1xf32>
    %355 = math.rsqrt %354 : vector<1x4x1xf32>
    %356 = arith.mulf %352, %355 : vector<1x4x1xf32>
    %357 = vector.broadcast %347 : vector<1x4x1xf32> to vector<2x4x256xf32>
    %358 = arith.subf %336, %357 : vector<2x4x256xf32>
    %359 = vector.broadcast %356 : vector<1x4x1xf32> to vector<2x4x256xf32>
    %360 = arith.mulf %358, %359 : vector<2x4x256xf32>
    %c0_132 = arith.constant 0 : index
    %c0_133 = arith.constant 0 : index
    %c0_134 = arith.constant 0 : index
    %361 = vector.load %arg3[%c0_132, %c0_133, %c0_134] : memref<1x4x1xf32, #tpu.memory_space<vmem>>, vector<1x4x1xf32>
    %362 = vector.broadcast %361 : vector<1x4x1xf32> to vector<2x4x256xf32>
    %363 = arith.addf %360, %362 : vector<2x4x256xf32>
    %cst_135 = arith.constant 0.000000e+00 : f32
    %364 = vector.broadcast %cst_135 : f32 to vector<2x4x256xf32>
    %365 = arith.maximumf %363, %364 : vector<2x4x256xf32>
    %c0_136 = arith.constant 0 : index
    %c0_137 = arith.constant 0 : index
    %c17_138 = arith.constant 17 : index
    %366 = vector.load %arg7[%c0_136, %c0_137, %c17_138] : memref<2x4x290xf32, #tpu.memory_space<vmem>>, vector<2x4x256xf32>
    tpu.vector_store %arg7[%c0_136, %c0_137, %c17_138], %365 {strides = array<i32>} : memref<2x4x290xf32, #tpu.memory_space<vmem>>, vector<2x4x256xf32>,
    %cst_139 = arith.constant 0.000000e+00 : f32
    %367 = vector.broadcast %cst_139 : f32 to vector<2x4x256xf32>
    %c0_140 = arith.constant 0 : index
    %c0_141 = arith.constant 0 : index
    %c0_142 = arith.constant 0 : index
    %368 = vector.load %arg7[%c0_140, %c0_141, %c0_142] : memref<2x4x290xf32, #tpu.memory_space<vmem>>, vector<2x4x256xf32>
    %cst_143 = arith.constant 0.000000e+00 : f32
    %369 = vector.broadcast %cst_143 : f32 to vector<2x4x256xf32>
    %370 = arith.select %19, %368, %369 : vector<2x4x256xi1>, vector<2x4x256xf32>
    %c0_144 = arith.constant 0 : index
    %c0_145 = arith.constant 0 : index
    %c0_146 = arith.constant 0 : index
    %371 = vector.load %arg4[%c0_144, %c0_145, %c0_146] : memref<36x4x1xf32, #tpu.memory_space<vmem>>, vector<1x4x1xf32>
    %372 = vector.shape_cast %371 : vector<1x4x1xf32> to vector<4x1xf32>
    %373 = vector.shape_cast %372 : vector<4x1xf32> to vector<1x4x1xf32>
    %374 = vector.extract_strided_slice %370 {offsets = [0, 0, 0], sizes = [2, 1, 256], strides = [1, 1, 1]} : vector<2x4x256xf32> to vector<2x1x256xf32>
    %375 = vector.broadcast %374 : vector<2x1x256xf32> to vector<2x4x256xf32>
    %376 = vector.broadcast %373 : vector<1x4x1xf32> to vector<2x4x256xf32>
    %377 = arith.mulf %375, %376 : vector<2x4x256xf32>
    %378 = arith.addf %367, %377 : vector<2x4x256xf32>
    %c1_147 = arith.constant 1 : index
    %c0_148 = arith.constant 0 : index
    %c0_149 = arith.constant 0 : index
    %379 = vector.load %arg4[%c1_147, %c0_148, %c0_149] : memref<36x4x1xf32, #tpu.memory_space<vmem>>, vector<1x4x1xf32>
    %380 = vector.shape_cast %379 : vector<1x4x1xf32> to vector<4x1xf32>
    %381 = vector.shape_cast %380 : vector<4x1xf32> to vector<1x4x1xf32>
    %382 = vector.extract_strided_slice %370 {offsets = [0, 1, 0], sizes = [2, 1, 256], strides = [1, 1, 1]} : vector<2x4x256xf32> to vector<2x1x256xf32>
    %383 = vector.broadcast %382 : vector<2x1x256xf32> to vector<2x4x256xf32>
    %384 = vector.broadcast %381 : vector<1x4x1xf32> to vector<2x4x256xf32>
    %385 = arith.mulf %383, %384 : vector<2x4x256xf32>
    %386 = arith.addf %378, %385 : vector<2x4x256xf32>
    %c2_150 = arith.constant 2 : index
    %c0_151 = arith.constant 0 : index
    %c0_152 = arith.constant 0 : index
    %387 = vector.load %arg4[%c2_150, %c0_151, %c0_152] : memref<36x4x1xf32, #tpu.memory_space<vmem>>, vector<1x4x1xf32>
    %388 = vector.shape_cast %387 : vector<1x4x1xf32> to vector<4x1xf32>
    %389 = vector.shape_cast %388 : vector<4x1xf32> to vector<1x4x1xf32>
    %390 = vector.extract_strided_slice %370 {offsets = [0, 2, 0], sizes = [2, 1, 256], strides = [1, 1, 1]} : vector<2x4x256xf32> to vector<2x1x256xf32>
    %391 = vector.broadcast %390 : vector<2x1x256xf32> to vector<2x4x256xf32>
    %392 = vector.broadcast %389 : vector<1x4x1xf32> to vector<2x4x256xf32>
    %393 = arith.mulf %391, %392 : vector<2x4x256xf32>
    %394 = arith.addf %386, %393 : vector<2x4x256xf32>
    %c3_153 = arith.constant 3 : index
    %c0_154 = arith.constant 0 : index
    %c0_155 = arith.constant 0 : index
    %395 = vector.load %arg4[%c3_153, %c0_154, %c0_155] : memref<36x4x1xf32, #tpu.memory_space<vmem>>, vector<1x4x1xf32>
    %396 = vector.shape_cast %395 : vector<1x4x1xf32> to vector<4x1xf32>
    %397 = vector.shape_cast %396 : vector<4x1xf32> to vector<1x4x1xf32>
    %398 = vector.extract_strided_slice %370 {offsets = [0, 3, 0], sizes = [2, 1, 256], strides = [1, 1, 1]} : vector<2x4x256xf32> to vector<2x1x256xf32>
    %399 = vector.broadcast %398 : vector<2x1x256xf32> to vector<2x4x256xf32>
    %400 = vector.broadcast %397 : vector<1x4x1xf32> to vector<2x4x256xf32>
    %401 = arith.mulf %399, %400 : vector<2x4x256xf32>
    %402 = arith.addf %394, %401 : vector<2x4x256xf32>
    %c0_156 = arith.constant 0 : index
    %c0_157 = arith.constant 0 : index
    %c1_158 = arith.constant 1 : index
    %403 = vector.load %arg7[%c0_156, %c0_157, %c1_158] : memref<2x4x290xf32, #tpu.memory_space<vmem>>, vector<2x4x256xf32>
    %c4_159 = arith.constant 4 : index
    %c0_160 = arith.constant 0 : index
    %c0_161 = arith.constant 0 : index
    %404 = vector.load %arg4[%c4_159, %c0_160, %c0_161] : memref<36x4x1xf32, #tpu.memory_space<vmem>>, vector<1x4x1xf32>
    %405 = vector.shape_cast %404 : vector<1x4x1xf32> to vector<4x1xf32>
    %406 = vector.shape_cast %405 : vector<4x1xf32> to vector<1x4x1xf32>
    %407 = vector.extract_strided_slice %403 {offsets = [0, 0, 0], sizes = [2, 1, 256], strides = [1, 1, 1]} : vector<2x4x256xf32> to vector<2x1x256xf32>
    %408 = vector.broadcast %407 : vector<2x1x256xf32> to vector<2x4x256xf32>
    %409 = vector.broadcast %406 : vector<1x4x1xf32> to vector<2x4x256xf32>
    %410 = arith.mulf %408, %409 : vector<2x4x256xf32>
    %411 = arith.addf %402, %410 : vector<2x4x256xf32>
    %c5_162 = arith.constant 5 : index
    %c0_163 = arith.constant 0 : index
    %c0_164 = arith.constant 0 : index
    %412 = vector.load %arg4[%c5_162, %c0_163, %c0_164] : memref<36x4x1xf32, #tpu.memory_space<vmem>>, vector<1x4x1xf32>
    %413 = vector.shape_cast %412 : vector<1x4x1xf32> to vector<4x1xf32>
    %414 = vector.shape_cast %413 : vector<4x1xf32> to vector<1x4x1xf32>
    %415 = vector.extract_strided_slice %403 {offsets = [0, 1, 0], sizes = [2, 1, 256], strides = [1, 1, 1]} : vector<2x4x256xf32> to vector<2x1x256xf32>
    %416 = vector.broadcast %415 : vector<2x1x256xf32> to vector<2x4x256xf32>
    %417 = vector.broadcast %414 : vector<1x4x1xf32> to vector<2x4x256xf32>
    %418 = arith.mulf %416, %417 : vector<2x4x256xf32>
    %419 = arith.addf %411, %418 : vector<2x4x256xf32>
    %c6_165 = arith.constant 6 : index
    %c0_166 = arith.constant 0 : index
    %c0_167 = arith.constant 0 : index
    %420 = vector.load %arg4[%c6_165, %c0_166, %c0_167] : memref<36x4x1xf32, #tpu.memory_space<vmem>>, vector<1x4x1xf32>
    %421 = vector.shape_cast %420 : vector<1x4x1xf32> to vector<4x1xf32>
    %422 = vector.shape_cast %421 : vector<4x1xf32> to vector<1x4x1xf32>
    %423 = vector.extract_strided_slice %403 {offsets = [0, 2, 0], sizes = [2, 1, 256], strides = [1, 1, 1]} : vector<2x4x256xf32> to vector<2x1x256xf32>
    %424 = vector.broadcast %423 : vector<2x1x256xf32> to vector<2x4x256xf32>
    %425 = vector.broadcast %422 : vector<1x4x1xf32> to vector<2x4x256xf32>
    %426 = arith.mulf %424, %425 : vector<2x4x256xf32>
    %427 = arith.addf %419, %426 : vector<2x4x256xf32>
    %c7_168 = arith.constant 7 : index
    %c0_169 = arith.constant 0 : index
    %c0_170 = arith.constant 0 : index
    %428 = vector.load %arg4[%c7_168, %c0_169, %c0_170] : memref<36x4x1xf32, #tpu.memory_space<vmem>>, vector<1x4x1xf32>
    %429 = vector.shape_cast %428 : vector<1x4x1xf32> to vector<4x1xf32>
    %430 = vector.shape_cast %429 : vector<4x1xf32> to vector<1x4x1xf32>
    %431 = vector.extract_strided_slice %403 {offsets = [0, 3, 0], sizes = [2, 1, 256], strides = [1, 1, 1]} : vector<2x4x256xf32> to vector<2x1x256xf32>
    %432 = vector.broadcast %431 : vector<2x1x256xf32> to vector<2x4x256xf32>
    %433 = vector.broadcast %430 : vector<1x4x1xf32> to vector<2x4x256xf32>
    %434 = arith.mulf %432, %433 : vector<2x4x256xf32>
    %435 = arith.addf %427, %434 : vector<2x4x256xf32>
    %c0_171 = arith.constant 0 : index
    %c0_172 = arith.constant 0 : index
    %c2_173 = arith.constant 2 : index
    %436 = vector.load %arg7[%c0_171, %c0_172, %c2_173] : memref<2x4x290xf32, #tpu.memory_space<vmem>>, vector<2x4x256xf32>
    %cst_174 = arith.constant 0.000000e+00 : f32
    %437 = vector.broadcast %cst_174 : f32 to vector<2x4x256xf32>
    %438 = arith.select %21, %436, %437 : vector<2x4x256xi1>, vector<2x4x256xf32>
    %c8_175 = arith.constant 8 : index
    %c0_176 = arith.constant 0 : index
    %c0_177 = arith.constant 0 : index
    %439 = vector.load %arg4[%c8_175, %c0_176, %c0_177] : memref<36x4x1xf32, #tpu.memory_space<vmem>>, vector<1x4x1xf32>
    %440 = vector.shape_cast %439 : vector<1x4x1xf32> to vector<4x1xf32>
    %441 = vector.shape_cast %440 : vector<4x1xf32> to vector<1x4x1xf32>
    %442 = vector.extract_strided_slice %438 {offsets = [0, 0, 0], sizes = [2, 1, 256], strides = [1, 1, 1]} : vector<2x4x256xf32> to vector<2x1x256xf32>
    %443 = vector.broadcast %442 : vector<2x1x256xf32> to vector<2x4x256xf32>
    %444 = vector.broadcast %441 : vector<1x4x1xf32> to vector<2x4x256xf32>
    %445 = arith.mulf %443, %444 : vector<2x4x256xf32>
    %446 = arith.addf %435, %445 : vector<2x4x256xf32>
    %c9_178 = arith.constant 9 : index
    %c0_179 = arith.constant 0 : index
    %c0_180 = arith.constant 0 : index
    %447 = vector.load %arg4[%c9_178, %c0_179, %c0_180] : memref<36x4x1xf32, #tpu.memory_space<vmem>>, vector<1x4x1xf32>
    %448 = vector.shape_cast %447 : vector<1x4x1xf32> to vector<4x1xf32>
    %449 = vector.shape_cast %448 : vector<4x1xf32> to vector<1x4x1xf32>
    %450 = vector.extract_strided_slice %438 {offsets = [0, 1, 0], sizes = [2, 1, 256], strides = [1, 1, 1]} : vector<2x4x256xf32> to vector<2x1x256xf32>
    %451 = vector.broadcast %450 : vector<2x1x256xf32> to vector<2x4x256xf32>
    %452 = vector.broadcast %449 : vector<1x4x1xf32> to vector<2x4x256xf32>
    %453 = arith.mulf %451, %452 : vector<2x4x256xf32>
    %454 = arith.addf %446, %453 : vector<2x4x256xf32>
    %c10_181 = arith.constant 10 : index
    %c0_182 = arith.constant 0 : index
    %c0_183 = arith.constant 0 : index
    %455 = vector.load %arg4[%c10_181, %c0_182, %c0_183] : memref<36x4x1xf32, #tpu.memory_space<vmem>>, vector<1x4x1xf32>
    %456 = vector.shape_cast %455 : vector<1x4x1xf32> to vector<4x1xf32>
    %457 = vector.shape_cast %456 : vector<4x1xf32> to vector<1x4x1xf32>
    %458 = vector.extract_strided_slice %438 {offsets = [0, 2, 0], sizes = [2, 1, 256], strides = [1, 1, 1]} : vector<2x4x256xf32> to vector<2x1x256xf32>
    %459 = vector.broadcast %458 : vector<2x1x256xf32> to vector<2x4x256xf32>
    %460 = vector.broadcast %457 : vector<1x4x1xf32> to vector<2x4x256xf32>
    %461 = arith.mulf %459, %460 : vector<2x4x256xf32>
    %462 = arith.addf %454, %461 : vector<2x4x256xf32>
    %c11_184 = arith.constant 11 : index
    %c0_185 = arith.constant 0 : index
    %c0_186 = arith.constant 0 : index
    %463 = vector.load %arg4[%c11_184, %c0_185, %c0_186] : memref<36x4x1xf32, #tpu.memory_space<vmem>>, vector<1x4x1xf32>
    %464 = vector.shape_cast %463 : vector<1x4x1xf32> to vector<4x1xf32>
    %465 = vector.shape_cast %464 : vector<4x1xf32> to vector<1x4x1xf32>
    %466 = vector.extract_strided_slice %438 {offsets = [0, 3, 0], sizes = [2, 1, 256], strides = [1, 1, 1]} : vector<2x4x256xf32> to vector<2x1x256xf32>
    %467 = vector.broadcast %466 : vector<2x1x256xf32> to vector<2x4x256xf32>
    %468 = vector.broadcast %465 : vector<1x4x1xf32> to vector<2x4x256xf32>
    %469 = arith.mulf %467, %468 : vector<2x4x256xf32>
    %470 = arith.addf %462, %469 : vector<2x4x256xf32>
    %c0_187 = arith.constant 0 : index
    %c0_188 = arith.constant 0 : index
    %c16_189 = arith.constant 16 : index
    %471 = vector.load %arg7[%c0_187, %c0_188, %c16_189] : memref<2x4x290xf32, #tpu.memory_space<vmem>>, vector<2x4x256xf32>
    %cst_190 = arith.constant 0.000000e+00 : f32
    %472 = vector.broadcast %cst_190 : f32 to vector<2x4x256xf32>
    %473 = arith.select %19, %471, %472 : vector<2x4x256xi1>, vector<2x4x256xf32>
    %c12_191 = arith.constant 12 : index
    %c0_192 = arith.constant 0 : index
    %c0_193 = arith.constant 0 : index
    %474 = vector.load %arg4[%c12_191, %c0_192, %c0_193] : memref<36x4x1xf32, #tpu.memory_space<vmem>>, vector<1x4x1xf32>
    %475 = vector.shape_cast %474 : vector<1x4x1xf32> to vector<4x1xf32>
    %476 = vector.shape_cast %475 : vector<4x1xf32> to vector<1x4x1xf32>
    %477 = vector.extract_strided_slice %473 {offsets = [0, 0, 0], sizes = [2, 1, 256], strides = [1, 1, 1]} : vector<2x4x256xf32> to vector<2x1x256xf32>
    %478 = vector.broadcast %477 : vector<2x1x256xf32> to vector<2x4x256xf32>
    %479 = vector.broadcast %476 : vector<1x4x1xf32> to vector<2x4x256xf32>
    %480 = arith.mulf %478, %479 : vector<2x4x256xf32>
    %481 = arith.addf %470, %480 : vector<2x4x256xf32>
    %c13_194 = arith.constant 13 : index
    %c0_195 = arith.constant 0 : index
    %c0_196 = arith.constant 0 : index
    %482 = vector.load %arg4[%c13_194, %c0_195, %c0_196] : memref<36x4x1xf32, #tpu.memory_space<vmem>>, vector<1x4x1xf32>
    %483 = vector.shape_cast %482 : vector<1x4x1xf32> to vector<4x1xf32>
    %484 = vector.shape_cast %483 : vector<4x1xf32> to vector<1x4x1xf32>
    %485 = vector.extract_strided_slice %473 {offsets = [0, 1, 0], sizes = [2, 1, 256], strides = [1, 1, 1]} : vector<2x4x256xf32> to vector<2x1x256xf32>
    %486 = vector.broadcast %485 : vector<2x1x256xf32> to vector<2x4x256xf32>
    %487 = vector.broadcast %484 : vector<1x4x1xf32> to vector<2x4x256xf32>
    %488 = arith.mulf %486, %487 : vector<2x4x256xf32>
    %489 = arith.addf %481, %488 : vector<2x4x256xf32>
    %c14_197 = arith.constant 14 : index
    %c0_198 = arith.constant 0 : index
    %c0_199 = arith.constant 0 : index
    %490 = vector.load %arg4[%c14_197, %c0_198, %c0_199] : memref<36x4x1xf32, #tpu.memory_space<vmem>>, vector<1x4x1xf32>
    %491 = vector.shape_cast %490 : vector<1x4x1xf32> to vector<4x1xf32>
    %492 = vector.shape_cast %491 : vector<4x1xf32> to vector<1x4x1xf32>
    %493 = vector.extract_strided_slice %473 {offsets = [0, 2, 0], sizes = [2, 1, 256], strides = [1, 1, 1]} : vector<2x4x256xf32> to vector<2x1x256xf32>
    %494 = vector.broadcast %493 : vector<2x1x256xf32> to vector<2x4x256xf32>
    %495 = vector.broadcast %492 : vector<1x4x1xf32> to vector<2x4x256xf32>
    %496 = arith.mulf %494, %495 : vector<2x4x256xf32>
    %497 = arith.addf %489, %496 : vector<2x4x256xf32>
    %c15_200 = arith.constant 15 : index
    %c0_201 = arith.constant 0 : index
    %c0_202 = arith.constant 0 : index
    %498 = vector.load %arg4[%c15_200, %c0_201, %c0_202] : memref<36x4x1xf32, #tpu.memory_space<vmem>>, vector<1x4x1xf32>
    %499 = vector.shape_cast %498 : vector<1x4x1xf32> to vector<4x1xf32>
    %500 = vector.shape_cast %499 : vector<4x1xf32> to vector<1x4x1xf32>
    %501 = vector.extract_strided_slice %473 {offsets = [0, 3, 0], sizes = [2, 1, 256], strides = [1, 1, 1]} : vector<2x4x256xf32> to vector<2x1x256xf32>
    %502 = vector.broadcast %501 : vector<2x1x256xf32> to vector<2x4x256xf32>
    %503 = vector.broadcast %500 : vector<1x4x1xf32> to vector<2x4x256xf32>
    %504 = arith.mulf %502, %503 : vector<2x4x256xf32>
    %505 = arith.addf %497, %504 : vector<2x4x256xf32>
    %c0_203 = arith.constant 0 : index
    %c0_204 = arith.constant 0 : index
    %c17_205 = arith.constant 17 : index
    %506 = vector.load %arg7[%c0_203, %c0_204, %c17_205] : memref<2x4x290xf32, #tpu.memory_space<vmem>>, vector<2x4x256xf32>
    %c16_206 = arith.constant 16 : index
    %c0_207 = arith.constant 0 : index
    %c0_208 = arith.constant 0 : index
    %507 = vector.load %arg4[%c16_206, %c0_207, %c0_208] : memref<36x4x1xf32, #tpu.memory_space<vmem>>, vector<1x4x1xf32>
    %508 = vector.shape_cast %507 : vector<1x4x1xf32> to vector<4x1xf32>
    %509 = vector.shape_cast %508 : vector<4x1xf32> to vector<1x4x1xf32>
    %510 = vector.extract_strided_slice %506 {offsets = [0, 0, 0], sizes = [2, 1, 256], strides = [1, 1, 1]} : vector<2x4x256xf32> to vector<2x1x256xf32>
    %511 = vector.broadcast %510 : vector<2x1x256xf32> to vector<2x4x256xf32>
    %512 = vector.broadcast %509 : vector<1x4x1xf32> to vector<2x4x256xf32>
    %513 = arith.mulf %511, %512 : vector<2x4x256xf32>
    %514 = arith.addf %505, %513 : vector<2x4x256xf32>
    %c17_209 = arith.constant 17 : index
    %c0_210 = arith.constant 0 : index
    %c0_211 = arith.constant 0 : index
    %515 = vector.load %arg4[%c17_209, %c0_210, %c0_211] : memref<36x4x1xf32, #tpu.memory_space<vmem>>, vector<1x4x1xf32>
    %516 = vector.shape_cast %515 : vector<1x4x1xf32> to vector<4x1xf32>
    %517 = vector.shape_cast %516 : vector<4x1xf32> to vector<1x4x1xf32>
    %518 = vector.extract_strided_slice %506 {offsets = [0, 1, 0], sizes = [2, 1, 256], strides = [1, 1, 1]} : vector<2x4x256xf32> to vector<2x1x256xf32>
    %519 = vector.broadcast %518 : vector<2x1x256xf32> to vector<2x4x256xf32>
    %520 = vector.broadcast %517 : vector<1x4x1xf32> to vector<2x4x256xf32>
    %521 = arith.mulf %519, %520 : vector<2x4x256xf32>
    %522 = arith.addf %514, %521 : vector<2x4x256xf32>
    %c18_212 = arith.constant 18 : index
    %c0_213 = arith.constant 0 : index
    %c0_214 = arith.constant 0 : index
    %523 = vector.load %arg4[%c18_212, %c0_213, %c0_214] : memref<36x4x1xf32, #tpu.memory_space<vmem>>, vector<1x4x1xf32>
    %524 = vector.shape_cast %523 : vector<1x4x1xf32> to vector<4x1xf32>
    %525 = vector.shape_cast %524 : vector<4x1xf32> to vector<1x4x1xf32>
    %526 = vector.extract_strided_slice %506 {offsets = [0, 2, 0], sizes = [2, 1, 256], strides = [1, 1, 1]} : vector<2x4x256xf32> to vector<2x1x256xf32>
    %527 = vector.broadcast %526 : vector<2x1x256xf32> to vector<2x4x256xf32>
    %528 = vector.broadcast %525 : vector<1x4x1xf32> to vector<2x4x256xf32>
    %529 = arith.mulf %527, %528 : vector<2x4x256xf32>
    %530 = arith.addf %522, %529 : vector<2x4x256xf32>
    %c19_215 = arith.constant 19 : index
    %c0_216 = arith.constant 0 : index
    %c0_217 = arith.constant 0 : index
    %531 = vector.load %arg4[%c19_215, %c0_216, %c0_217] : memref<36x4x1xf32, #tpu.memory_space<vmem>>, vector<1x4x1xf32>
    %532 = vector.shape_cast %531 : vector<1x4x1xf32> to vector<4x1xf32>
    %533 = vector.shape_cast %532 : vector<4x1xf32> to vector<1x4x1xf32>
    %534 = vector.extract_strided_slice %506 {offsets = [0, 3, 0], sizes = [2, 1, 256], strides = [1, 1, 1]} : vector<2x4x256xf32> to vector<2x1x256xf32>
    %535 = vector.broadcast %534 : vector<2x1x256xf32> to vector<2x4x256xf32>
    %536 = vector.broadcast %533 : vector<1x4x1xf32> to vector<2x4x256xf32>
    %537 = arith.mulf %535, %536 : vector<2x4x256xf32>
    %538 = arith.addf %530, %537 : vector<2x4x256xf32>
    %c0_218 = arith.constant 0 : index
    %c0_219 = arith.constant 0 : index
    %c18_220 = arith.constant 18 : index
    %539 = vector.load %arg7[%c0_218, %c0_219, %c18_220] : memref<2x4x290xf32, #tpu.memory_space<vmem>>, vector<2x4x256xf32>
    %cst_221 = arith.constant 0.000000e+00 : f32
    %540 = vector.broadcast %cst_221 : f32 to vector<2x4x256xf32>
    %541 = arith.select %21, %539, %540 : vector<2x4x256xi1>, vector<2x4x256xf32>
    %c20_222 = arith.constant 20 : index
    %c0_223 = arith.constant 0 : index
    %c0_224 = arith.constant 0 : index
    %542 = vector.load %arg4[%c20_222, %c0_223, %c0_224] : memref<36x4x1xf32, #tpu.memory_space<vmem>>, vector<1x4x1xf32>
    %543 = vector.shape_cast %542 : vector<1x4x1xf32> to vector<4x1xf32>
    %544 = vector.shape_cast %543 : vector<4x1xf32> to vector<1x4x1xf32>
    %545 = vector.extract_strided_slice %541 {offsets = [0, 0, 0], sizes = [2, 1, 256], strides = [1, 1, 1]} : vector<2x4x256xf32> to vector<2x1x256xf32>
    %546 = vector.broadcast %545 : vector<2x1x256xf32> to vector<2x4x256xf32>
    %547 = vector.broadcast %544 : vector<1x4x1xf32> to vector<2x4x256xf32>
    %548 = arith.mulf %546, %547 : vector<2x4x256xf32>
    %549 = arith.addf %538, %548 : vector<2x4x256xf32>
    %c21_225 = arith.constant 21 : index
    %c0_226 = arith.constant 0 : index
    %c0_227 = arith.constant 0 : index
    %550 = vector.load %arg4[%c21_225, %c0_226, %c0_227] : memref<36x4x1xf32, #tpu.memory_space<vmem>>, vector<1x4x1xf32>
    %551 = vector.shape_cast %550 : vector<1x4x1xf32> to vector<4x1xf32>
    %552 = vector.shape_cast %551 : vector<4x1xf32> to vector<1x4x1xf32>
    %553 = vector.extract_strided_slice %541 {offsets = [0, 1, 0], sizes = [2, 1, 256], strides = [1, 1, 1]} : vector<2x4x256xf32> to vector<2x1x256xf32>
    %554 = vector.broadcast %553 : vector<2x1x256xf32> to vector<2x4x256xf32>
    %555 = vector.broadcast %552 : vector<1x4x1xf32> to vector<2x4x256xf32>
    %556 = arith.mulf %554, %555 : vector<2x4x256xf32>
    %557 = arith.addf %549, %556 : vector<2x4x256xf32>
    %c22_228 = arith.constant 22 : index
    %c0_229 = arith.constant 0 : index
    %c0_230 = arith.constant 0 : index
    %558 = vector.load %arg4[%c22_228, %c0_229, %c0_230] : memref<36x4x1xf32, #tpu.memory_space<vmem>>, vector<1x4x1xf32>
    %559 = vector.shape_cast %558 : vector<1x4x1xf32> to vector<4x1xf32>
    %560 = vector.shape_cast %559 : vector<4x1xf32> to vector<1x4x1xf32>
    %561 = vector.extract_strided_slice %541 {offsets = [0, 2, 0], sizes = [2, 1, 256], strides = [1, 1, 1]} : vector<2x4x256xf32> to vector<2x1x256xf32>
    %562 = vector.broadcast %561 : vector<2x1x256xf32> to vector<2x4x256xf32>
    %563 = vector.broadcast %560 : vector<1x4x1xf32> to vector<2x4x256xf32>
    %564 = arith.mulf %562, %563 : vector<2x4x256xf32>
    %565 = arith.addf %557, %564 : vector<2x4x256xf32>
    %c23_231 = arith.constant 23 : index
    %c0_232 = arith.constant 0 : index
    %c0_233 = arith.constant 0 : index
    %566 = vector.load %arg4[%c23_231, %c0_232, %c0_233] : memref<36x4x1xf32, #tpu.memory_space<vmem>>, vector<1x4x1xf32>
    %567 = vector.shape_cast %566 : vector<1x4x1xf32> to vector<4x1xf32>
    %568 = vector.shape_cast %567 : vector<4x1xf32> to vector<1x4x1xf32>
    %569 = vector.extract_strided_slice %541 {offsets = [0, 3, 0], sizes = [2, 1, 256], strides = [1, 1, 1]} : vector<2x4x256xf32> to vector<2x1x256xf32>
    %570 = vector.broadcast %569 : vector<2x1x256xf32> to vector<2x4x256xf32>
    %571 = vector.broadcast %568 : vector<1x4x1xf32> to vector<2x4x256xf32>
    %572 = arith.mulf %570, %571 : vector<2x4x256xf32>
    %573 = arith.addf %565, %572 : vector<2x4x256xf32>
    %c0_234 = arith.constant 0 : index
    %c0_235 = arith.constant 0 : index
    %c32_236 = arith.constant 32 : index
    %574 = vector.load %arg7[%c0_234, %c0_235, %c32_236] : memref<2x4x290xf32, #tpu.memory_space<vmem>>, vector<2x4x256xf32>
    %cst_237 = arith.constant 0.000000e+00 : f32
    %575 = vector.broadcast %cst_237 : f32 to vector<2x4x256xf32>
    %576 = arith.select %19, %574, %575 : vector<2x4x256xi1>, vector<2x4x256xf32>
    %c24_238 = arith.constant 24 : index
    %c0_239 = arith.constant 0 : index
    %c0_240 = arith.constant 0 : index
    %577 = vector.load %arg4[%c24_238, %c0_239, %c0_240] : memref<36x4x1xf32, #tpu.memory_space<vmem>>, vector<1x4x1xf32>
    %578 = vector.shape_cast %577 : vector<1x4x1xf32> to vector<4x1xf32>
    %579 = vector.shape_cast %578 : vector<4x1xf32> to vector<1x4x1xf32>
    %580 = vector.extract_strided_slice %576 {offsets = [0, 0, 0], sizes = [2, 1, 256], strides = [1, 1, 1]} : vector<2x4x256xf32> to vector<2x1x256xf32>
    %581 = vector.broadcast %580 : vector<2x1x256xf32> to vector<2x4x256xf32>
    %582 = vector.broadcast %579 : vector<1x4x1xf32> to vector<2x4x256xf32>
    %583 = arith.mulf %581, %582 : vector<2x4x256xf32>
    %584 = arith.addf %573, %583 : vector<2x4x256xf32>
    %c25_241 = arith.constant 25 : index
    %c0_242 = arith.constant 0 : index
    %c0_243 = arith.constant 0 : index
    %585 = vector.load %arg4[%c25_241, %c0_242, %c0_243] : memref<36x4x1xf32, #tpu.memory_space<vmem>>, vector<1x4x1xf32>
    %586 = vector.shape_cast %585 : vector<1x4x1xf32> to vector<4x1xf32>
    %587 = vector.shape_cast %586 : vector<4x1xf32> to vector<1x4x1xf32>
    %588 = vector.extract_strided_slice %576 {offsets = [0, 1, 0], sizes = [2, 1, 256], strides = [1, 1, 1]} : vector<2x4x256xf32> to vector<2x1x256xf32>
    %589 = vector.broadcast %588 : vector<2x1x256xf32> to vector<2x4x256xf32>
    %590 = vector.broadcast %587 : vector<1x4x1xf32> to vector<2x4x256xf32>
    %591 = arith.mulf %589, %590 : vector<2x4x256xf32>
    %592 = arith.addf %584, %591 : vector<2x4x256xf32>
    %c26_244 = arith.constant 26 : index
    %c0_245 = arith.constant 0 : index
    %c0_246 = arith.constant 0 : index
    %593 = vector.load %arg4[%c26_244, %c0_245, %c0_246] : memref<36x4x1xf32, #tpu.memory_space<vmem>>, vector<1x4x1xf32>
    %594 = vector.shape_cast %593 : vector<1x4x1xf32> to vector<4x1xf32>
    %595 = vector.shape_cast %594 : vector<4x1xf32> to vector<1x4x1xf32>
    %596 = vector.extract_strided_slice %576 {offsets = [0, 2, 0], sizes = [2, 1, 256], strides = [1, 1, 1]} : vector<2x4x256xf32> to vector<2x1x256xf32>
    %597 = vector.broadcast %596 : vector<2x1x256xf32> to vector<2x4x256xf32>
    %598 = vector.broadcast %595 : vector<1x4x1xf32> to vector<2x4x256xf32>
    %599 = arith.mulf %597, %598 : vector<2x4x256xf32>
    %600 = arith.addf %592, %599 : vector<2x4x256xf32>
    %c27_247 = arith.constant 27 : index
    %c0_248 = arith.constant 0 : index
    %c0_249 = arith.constant 0 : index
    %601 = vector.load %arg4[%c27_247, %c0_248, %c0_249] : memref<36x4x1xf32, #tpu.memory_space<vmem>>, vector<1x4x1xf32>
    %602 = vector.shape_cast %601 : vector<1x4x1xf32> to vector<4x1xf32>
    %603 = vector.shape_cast %602 : vector<4x1xf32> to vector<1x4x1xf32>
    %604 = vector.extract_strided_slice %576 {offsets = [0, 3, 0], sizes = [2, 1, 256], strides = [1, 1, 1]} : vector<2x4x256xf32> to vector<2x1x256xf32>
    %605 = vector.broadcast %604 : vector<2x1x256xf32> to vector<2x4x256xf32>
    %606 = vector.broadcast %603 : vector<1x4x1xf32> to vector<2x4x256xf32>
    %607 = arith.mulf %605, %606 : vector<2x4x256xf32>
    %608 = arith.addf %600, %607 : vector<2x4x256xf32>
    %c0_250 = arith.constant 0 : index
    %c0_251 = arith.constant 0 : index
    %c33_252 = arith.constant 33 : index
    %609 = vector.load %arg7[%c0_250, %c0_251, %c33_252] : memref<2x4x290xf32, #tpu.memory_space<vmem>>, vector<2x4x256xf32>
    %c28_253 = arith.constant 28 : index
    %c0_254 = arith.constant 0 : index
    %c0_255 = arith.constant 0 : index
    %610 = vector.load %arg4[%c28_253, %c0_254, %c0_255] : memref<36x4x1xf32, #tpu.memory_space<vmem>>, vector<1x4x1xf32>
    %611 = vector.shape_cast %610 : vector<1x4x1xf32> to vector<4x1xf32>
    %612 = vector.shape_cast %611 : vector<4x1xf32> to vector<1x4x1xf32>
    %613 = vector.extract_strided_slice %609 {offsets = [0, 0, 0], sizes = [2, 1, 256], strides = [1, 1, 1]} : vector<2x4x256xf32> to vector<2x1x256xf32>
    %614 = vector.broadcast %613 : vector<2x1x256xf32> to vector<2x4x256xf32>
    %615 = vector.broadcast %612 : vector<1x4x1xf32> to vector<2x4x256xf32>
    %616 = arith.mulf %614, %615 : vector<2x4x256xf32>
    %617 = arith.addf %608, %616 : vector<2x4x256xf32>
    %c29_256 = arith.constant 29 : index
    %c0_257 = arith.constant 0 : index
    %c0_258 = arith.constant 0 : index
    %618 = vector.load %arg4[%c29_256, %c0_257, %c0_258] : memref<36x4x1xf32, #tpu.memory_space<vmem>>, vector<1x4x1xf32>
    %619 = vector.shape_cast %618 : vector<1x4x1xf32> to vector<4x1xf32>
    %620 = vector.shape_cast %619 : vector<4x1xf32> to vector<1x4x1xf32>
    %621 = vector.extract_strided_slice %609 {offsets = [0, 1, 0], sizes = [2, 1, 256], strides = [1, 1, 1]} : vector<2x4x256xf32> to vector<2x1x256xf32>
    %622 = vector.broadcast %621 : vector<2x1x256xf32> to vector<2x4x256xf32>
    %623 = vector.broadcast %620 : vector<1x4x1xf32> to vector<2x4x256xf32>
    %624 = arith.mulf %622, %623 : vector<2x4x256xf32>
    %625 = arith.addf %617, %624 : vector<2x4x256xf32>
    %c30_259 = arith.constant 30 : index
    %c0_260 = arith.constant 0 : index
    %c0_261 = arith.constant 0 : index
    %626 = vector.load %arg4[%c30_259, %c0_260, %c0_261] : memref<36x4x1xf32, #tpu.memory_space<vmem>>, vector<1x4x1xf32>
    %627 = vector.shape_cast %626 : vector<1x4x1xf32> to vector<4x1xf32>
    %628 = vector.shape_cast %627 : vector<4x1xf32> to vector<1x4x1xf32>
    %629 = vector.extract_strided_slice %609 {offsets = [0, 2, 0], sizes = [2, 1, 256], strides = [1, 1, 1]} : vector<2x4x256xf32> to vector<2x1x256xf32>
    %630 = vector.broadcast %629 : vector<2x1x256xf32> to vector<2x4x256xf32>
    %631 = vector.broadcast %628 : vector<1x4x1xf32> to vector<2x4x256xf32>
    %632 = arith.mulf %630, %631 : vector<2x4x256xf32>
    %633 = arith.addf %625, %632 : vector<2x4x256xf32>
    %c31_262 = arith.constant 31 : index
    %c0_263 = arith.constant 0 : index
    %c0_264 = arith.constant 0 : index
    %634 = vector.load %arg4[%c31_262, %c0_263, %c0_264] : memref<36x4x1xf32, #tpu.memory_space<vmem>>, vector<1x4x1xf32>
    %635 = vector.shape_cast %634 : vector<1x4x1xf32> to vector<4x1xf32>
    %636 = vector.shape_cast %635 : vector<4x1xf32> to vector<1x4x1xf32>
    %637 = vector.extract_strided_slice %609 {offsets = [0, 3, 0], sizes = [2, 1, 256], strides = [1, 1, 1]} : vector<2x4x256xf32> to vector<2x1x256xf32>
    %638 = vector.broadcast %637 : vector<2x1x256xf32> to vector<2x4x256xf32>
    %639 = vector.broadcast %636 : vector<1x4x1xf32> to vector<2x4x256xf32>
    %640 = arith.mulf %638, %639 : vector<2x4x256xf32>
    %641 = arith.addf %633, %640 : vector<2x4x256xf32>
    %c0_265 = arith.constant 0 : index
    %c0_266 = arith.constant 0 : index
    %c34_267 = arith.constant 34 : index
    %642 = vector.load %arg7[%c0_265, %c0_266, %c34_267] : memref<2x4x290xf32, #tpu.memory_space<vmem>>, vector<2x4x256xf32>
    %cst_268 = arith.constant 0.000000e+00 : f32
    %643 = vector.broadcast %cst_268 : f32 to vector<2x4x256xf32>
    %644 = arith.select %21, %642, %643 : vector<2x4x256xi1>, vector<2x4x256xf32>
    %c32_269 = arith.constant 32 : index
    %c0_270 = arith.constant 0 : index
    %c0_271 = arith.constant 0 : index
    %645 = vector.load %arg4[%c32_269, %c0_270, %c0_271] : memref<36x4x1xf32, #tpu.memory_space<vmem>>, vector<1x4x1xf32>
    %646 = vector.shape_cast %645 : vector<1x4x1xf32> to vector<4x1xf32>
    %647 = vector.shape_cast %646 : vector<4x1xf32> to vector<1x4x1xf32>
    %648 = vector.extract_strided_slice %644 {offsets = [0, 0, 0], sizes = [2, 1, 256], strides = [1, 1, 1]} : vector<2x4x256xf32> to vector<2x1x256xf32>
    %649 = vector.broadcast %648 : vector<2x1x256xf32> to vector<2x4x256xf32>
    %650 = vector.broadcast %647 : vector<1x4x1xf32> to vector<2x4x256xf32>
    %651 = arith.mulf %649, %650 : vector<2x4x256xf32>
    %652 = arith.addf %641, %651 : vector<2x4x256xf32>
    %c33_272 = arith.constant 33 : index
    %c0_273 = arith.constant 0 : index
    %c0_274 = arith.constant 0 : index
    %653 = vector.load %arg4[%c33_272, %c0_273, %c0_274] : memref<36x4x1xf32, #tpu.memory_space<vmem>>, vector<1x4x1xf32>
    %654 = vector.shape_cast %653 : vector<1x4x1xf32> to vector<4x1xf32>
    %655 = vector.shape_cast %654 : vector<4x1xf32> to vector<1x4x1xf32>
    %656 = vector.extract_strided_slice %644 {offsets = [0, 1, 0], sizes = [2, 1, 256], strides = [1, 1, 1]} : vector<2x4x256xf32> to vector<2x1x256xf32>
    %657 = vector.broadcast %656 : vector<2x1x256xf32> to vector<2x4x256xf32>
    %658 = vector.broadcast %655 : vector<1x4x1xf32> to vector<2x4x256xf32>
    %659 = arith.mulf %657, %658 : vector<2x4x256xf32>
    %660 = arith.addf %652, %659 : vector<2x4x256xf32>
    %c34_275 = arith.constant 34 : index
    %c0_276 = arith.constant 0 : index
    %c0_277 = arith.constant 0 : index
    %661 = vector.load %arg4[%c34_275, %c0_276, %c0_277] : memref<36x4x1xf32, #tpu.memory_space<vmem>>, vector<1x4x1xf32>
    %662 = vector.shape_cast %661 : vector<1x4x1xf32> to vector<4x1xf32>
    %663 = vector.shape_cast %662 : vector<4x1xf32> to vector<1x4x1xf32>
    %664 = vector.extract_strided_slice %644 {offsets = [0, 2, 0], sizes = [2, 1, 256], strides = [1, 1, 1]} : vector<2x4x256xf32> to vector<2x1x256xf32>
    %665 = vector.broadcast %664 : vector<2x1x256xf32> to vector<2x4x256xf32>
    %666 = vector.broadcast %663 : vector<1x4x1xf32> to vector<2x4x256xf32>
    %667 = arith.mulf %665, %666 : vector<2x4x256xf32>
    %668 = arith.addf %660, %667 : vector<2x4x256xf32>
    %c35_278 = arith.constant 35 : index
    %c0_279 = arith.constant 0 : index
    %c0_280 = arith.constant 0 : index
    %669 = vector.load %arg4[%c35_278, %c0_279, %c0_280] : memref<36x4x1xf32, #tpu.memory_space<vmem>>, vector<1x4x1xf32>
    %670 = vector.shape_cast %669 : vector<1x4x1xf32> to vector<4x1xf32>
    %671 = vector.shape_cast %670 : vector<4x1xf32> to vector<1x4x1xf32>
    %672 = vector.extract_strided_slice %644 {offsets = [0, 3, 0], sizes = [2, 1, 256], strides = [1, 1, 1]} : vector<2x4x256xf32> to vector<2x1x256xf32>
    %673 = vector.broadcast %672 : vector<2x1x256xf32> to vector<2x4x256xf32>
    %674 = vector.broadcast %671 : vector<1x4x1xf32> to vector<2x4x256xf32>
    %675 = arith.mulf %673, %674 : vector<2x4x256xf32>
    %676 = arith.addf %668, %675 : vector<2x4x256xf32>
    %c0_281 = arith.constant 0 : index
    %c0_282 = arith.constant 0 : index
    %c0_283 = arith.constant 0 : index
    %677 = vector.load %arg5[%c0_281, %c0_282, %c0_283] : memref<1x4x1xf32, #tpu.memory_space<vmem>>, vector<1x4x1xf32>
    %678 = vector.broadcast %677 : vector<1x4x1xf32> to vector<2x4x256xf32>
    %679 = arith.addf %676, %678 : vector<2x4x256xf32>
    %680 = arith.addf %679, %0 : vector<2x4x256xf32>
    %cst_284 = arith.constant 0.000000e+00 : f32
    %681 = vector.broadcast %cst_284 : f32 to vector<2x4x256xf32>
    %682 = arith.maximumf %680, %681 : vector<2x4x256xf32>
    %c0_285 = arith.constant 0 : index
    %c0_286 = arith.constant 0 : index
    %c0_287 = arith.constant 0 : index
    %683 = vector.load %arg6[%c0_285, %c0_286, %c0_287] : memref<2x4x256xf32, #tpu.memory_space<vmem>>, vector<2x4x256xf32>
    tpu.vector_store %arg6[%c0_285, %c0_286, %c0_287], %682 {strides = array<i32>} : memref<2x4x256xf32, #tpu.memory_space<vmem>>, vector<2x4x256xf32>,
    return
  }
}

</mosaic_0001>

<bundles_post_ra>
// kernel: tpu_custom_call.1
= control target key start
LH: loop header
LB: loop body
LE: loop exit
PB: predicated region body
PF: predicated region fallthrough
CT: control target
= control target key end

     0   :  { %v3228_v2 = vmov 0   ;;  %s3229_s27 = smov 17   ;;  %s5538_s0 = inlined_call_operand.vmem [shape: f32[2,4,256], index: 0, kind: input, shape index: {}]   ;;  %s5539_s1 = inlined_call_operand.vmem [shape: f32[36,4,1], index: 1, kind: input, shape index: {}]   ;;  %s5540_s2 = inlined_call_operand.vmem [shape: f32[1,4,1], index: 2, kind: input, shape index: {}]   ;;  %s5541_s3 = inlined_call_operand.vmem [shape: f32[1,4,1], index: 3, kind: input, shape index: {}]   ;;  %s5542_s4 = inlined_call_operand.vmem [shape: f32[36,4,1], index: 4, kind: input, shape index: {}]   ;;  %s5543_s5 = inlined_call_operand.vmem [shape: f32[1,4,1], index: 5, kind: input, shape index: {}]   ;;  %s5544_s6 = inlined_call_operand.hbm [shape: f32[2,4,256], index: 6, kind: output, shape index: {}]  }
   0x1   :  { %v3280_v0 = vld [vmem:[%s5538_s0] sm:$0xff]  ;;  %v3114_v1 = vld [vmem:[%s5539_s1 + $0x8] sm:$0xf]  ;;  %3198 = vset.pattern.permute.xlu2 %v3228_v2  ;;  %3197 = vset.pattern.permute.xlu1 %v3228_v2 }
   0x2   :  { %5623 = vst [vmem:[#allocation6_spill] sm:$0xff] %v3280_v0  ;;  %v104_v3 = vld [vmem:[%s5539_s1] sm:$0xf]  ;;  %65 = vrot.lane.b32.xlu0 %v3280_v0, %s3229_s27  ;;  %149 = vperm.xlu2 %3198, %v3114_v1  }
   0x3   :  { %111 = vperm.xlu1 %3197, %v104_v3   ;;  %3199 = vset.pattern.permute.xlu0 %v3228_v2 }
   0x4   :  { %11 = vsyncpa [#allocation4], 0  ;;  %v3293_v4 = vld [vmem:[%s5538_s0 + $0x8] sm:$0xff]  ;;  %v3113_v6 = vld [vmem:[%s5539_s1 + $0x4] sm:$0xf]  ;;  %vm57_vm0 = vcmask 134144  }
   0x5   :  { %5624 = vst [vmem:[#allocation7_spill] sm:$0xff] %v3293_v4  ;;  %v3115_v5 = vld [vmem:[%s5539_s1 + $0xc] sm:$0xf]  ;;  %v3116_v7 = vld [vmem:[%s5539_s1 + $0x10] sm:$0xf]  ;;  %vm60_vm1 = vcmask 273544  }
   0x6   :  { %v3117_v8 = vld [vmem:[%s5539_s1 + $0x14] sm:$0xf]  ;;  %v3119_v9 = vld [vmem:[%s5539_s1 + $0x1c] sm:$0xf]  ;;  %v3118_v10 = vld [vmem:[%s5539_s1 + $0x18] sm:$0xf] }
   0x7   :  { %v3120_v11 = vld [vmem:[%s5539_s1 + $0x20] sm:$0xf]  ;;  %v3122_v12 = vld [vmem:[%s5539_s1 + $0x28] sm:$0xf]  ;;  %v3121_v13 = vld [vmem:[%s5539_s1 + $0x24] sm:$0xf] }
   0x8   :  { %v3123_v14 = vld [vmem:[%s5539_s1 + $0x2c] sm:$0xf]  ;;  %v3125_v15 = vld [vmem:[%s5539_s1 + $0x34] sm:$0xf]  ;;  %v3124_v16 = vld [vmem:[%s5539_s1 + $0x30] sm:$0xf] }
   0x9   :  { %v3126_v17 = vld [vmem:[%s5539_s1 + $0x38] sm:$0xf]  ;;  %v3128_v18 = vld [vmem:[%s5539_s1 + $0x40] sm:$0xf]  ;;  %v3127_v19 = vld [vmem:[%s5539_s1 + $0x3c] sm:$0xf] }
   0xa   :  { %67 = vrot.lane.b32.xlu0 %v3293_v4, %s3229_s27  ;;  %168 = vperm.xlu2 %3198, %v3115_v5   ;;  %v3230_v20 = vmov 0.0   ;;  %vm78_vm2 = vcmask 1043592   ;;  %vm79_vm3 = vcmask 1047556   ;;  %vm71_vm4 = vcmask 138240   ;;  %s3231_s12 = smov 127   ;;  %s3232_s0 = smov 111  }
   0xb   :  { %130 = vperm.xlu1 %3197, %v3113_v6   ;;  %58 = vst.msk [vmem:[#allocation2] sm:$0xf] %vm57_vm0, %v3230_v20  ;;  %vm3346_vm5 = vmor %vm79_vm3, %vm78_vm2  ;;  %v5626_v23 = vmov 0  ;;  %s3233_s13 = smov 126   ;;  %s3234_s14 = smov 112   ;;  %vm236_vm8 = vcmask 1039360  }
   0xc   :  { %61 = vst.msk [vmem:[#allocation2 + $0x8] sm:$0xf] %vm60_vm1, %v3230_v20  ;;  %v5627_v23 = vsel %vm3346_vm5, 4294967295, %v5626_v23  ;;  %s3235_s21 = smov 110   ;;  %s3236_s7 = smov 96   ;;  %vm457_vm9 = vcmask 1031168  }
   0xd   :  { %59 = vst.msk [vmem:[#allocation2 + $0xc] sm:$0xf] %vm57_vm0, %v3230_v20  ;;  %s3237_s22 = smov 95   ;;  %s3238_s30 = smov 94   ;;  %vm579_vm12 = vcmask 916480   ;;  %vm725_vm13 = vcmask 908288  }
   0xe   :  { %62 = vst.msk [vmem:[#allocation2 + $0x14] sm:$0xf] %vm60_vm1, %v3230_v20  ;;  %vm5590_vm14 = vcmask 900096   ;;  %vm5589_vm15 = vcmask 785408   ;;  %vm1214_vm1 = vcmask 777216   ;;  %vm5588_vm2 = vcmask 769024  }
   0xf   :  { %5628 = vst [vmem:[#allocation9_spill] sm:$0xff] %v5627_v23  ;;  %vm1524_vm3 = vcmask 1043456   ;;  %s3101_s17 = sshll.u32 %s5544_s6, 4  ;;  %s3240_s18 = smov 128   ;;  %s3102_s17 = int_to_ptr.hbm [resolvable:$true] %s3101_s17 }
  0x12   :  { %209 = vperm.xlu0 %3199, %v3116_v7   ;;  %271 = vperm.xlu2 %3198, %v3117_v8  }
  0x13   :  { %393 = vperm.xlu1 %3197, %v3119_v9  }
  0x1a   :  { %332 = vperm.xlu0 %3199, %v3118_v10   ;;  %478 = vperm.xlu2 %3198, %v3120_v11  }
  0x1b   :  { %516 = vperm.xlu1 %3197, %v3122_v12  }
  0x22   :  { %497 = vperm.xlu0 %3199, %v3121_v13   ;;  %535 = vperm.xlu2 %3198, %v3123_v14  }
  0x23   :  { %619 = vperm.xlu1 %3197, %v3125_v15  }
  0x2a   :  { %600 = vperm.xlu0 %3199, %v3124_v16   ;;  %638 = vperm.xlu2 %3198, %v3126_v17  }
  0x2b   :  { %698 = vperm.xlu1 %3197, %v3128_v18  }
  0x32   :  { %657 = vperm.xlu0 %3199, %v3127_v19  }
  0x5c   :  { %v3344_v21 = vpop.permute.xlu2 %149 }
  0x5d   :  { %5625 = vst [vmem:[#allocation8_spill] sm:$0xff] %v3344_v21 }
  0x64   :  { %v3352_v26 = vpop.permute.xlu2 %168 }
  0x65   :  { %5629 = vst [vmem:[#allocation10_spill] sm:$0xff] %v3352_v26 }
  0x6c   :  { %v3365_v36 = vpop.permute.xlu2 %271 }
  0x74   :  { %v66_v22 = vpop.permute.xlu0 %65 }
  0x75   :  { %v69_v24 = vrot.slane %v66_v22, 4  ;;  %v3358_v31 = vpop.permute.xlu1 %111 }
  0x77   :  { %v72_v25 = vsel %vm71_vm4, %v69_v24, %v66_v22  ;;  %82 = vst.msk [vmem:[#allocation2 + $0x8] sm:$0xf] %vm57_vm0, %v69_v24 }
  0x78   :  { %81 = vst.msk [vmem:[#allocation2] sm:$0xff] %vm3346_vm5, %v72_v25 }
  0x7c   :  { %v68_v27 = vpop.permute.xlu0 %67 }
  0x7d   :  { %v70_v28 = vrot.slane %v68_v27, 4  ;;  %v3380_v47 = vpop.permute.xlu1 %130 }
  0x7e   :  { %v180_v29 = vld [vmem:[#allocation2 + $0x8] sm:$0xf] }
  0x7f   :  { %v3356_v30 = vld [vmem:[#allocation2] sm:$0xff]  ;;  %v73_v32 = vsel %vm71_vm4, %v70_v28, %v68_v27  ;;  %84 = vst.msk [vmem:[#allocation2 + $0x14] sm:$0xf] %vm57_vm0, %v70_v28  ;;  %v253_v33 = vperm.slane %v180_v29, 1  ;;  %v191_v34 = vperm.slane %v180_v29, 0  ;;  %v314_v42 = vperm.slane %v180_v29, 2 }
  0x80   :  { %89 = vst [vmem:[#allocation1] ss:$2 sm:$0xff] %v3356_v30  ;;  %v190_v51 = vperm.slane %v3356_v30, 4  ;;  %v375_v58 = vperm.slane %v180_v29, 3  ;;  %v547_v11 = vld [vmem:[#allocation2 + $0x8] sm:$0xf] }
  0x81   :  { %83 = vst.msk [vmem:[#allocation2 + $0xc] sm:$0xff] %vm3346_vm5, %v73_v32  ;;  %v265_v35 = vperm.slane %v253_v33, 1  ;;  %v203_v38 = vperm.slane %v191_v34, 0  ;;  %v326_v50 = vperm.slane %v314_v42, 2  ;;  %v251_v32 = vperm.slane %v3356_v30, 1 }
  0x82   :  { %v3392_v57 = vperm.slane %v190_v51, 0  ;;  %v387_v2 = vperm.slane %v375_v58, 3  ;;  %v189_v34 = vperm.slane %v3356_v30, 0  ;;  %v312_v23 = vperm.slane %v3356_v30, 2 }
  0x83   :  { %v276_v37 = vmul.f32 %v3365_v36, %v265_v35  ;;  %v3447_v35 = vld [vmem:[#allocation2 + $0x8] sm:$0xf]  ;;  %v3460_v42 = vperm.slane %v251_v32, 1 }
  0x84   :  { %v3368_v39 = vpop.permute.xlu0 %209  ;;  %v3561_v21 = vperm.slane %v312_v23, 2 }
  0x85   :  { %290 = vrot.lane.b32.xlu2 %v276_v37, %s3231_s12  ;;  %v214_v40 = vmul.f32 %v3368_v39, %v203_v38  ;;  %v3401_v1 = vpop.permute.xlu1 %393  ;;  %v213_v6 = vmul.f32 %v3368_v39, %v3392_v57 }
  0x86   :  { %v182_v41 = vld [vmem:[#allocation2 + $0x14] sm:$0xf]  ;;  %v398_v12 = vmul.f32 %v3401_v1, %v387_v2 }
  0x87   :  { %v3372_v43 = vld.sshfl [vmem:[#allocation1] sm:$0xff pattern:$0x75316420]  ;;  %v3374_v44 = vld.sshfl [vmem:[#allocation1 + $0x8] sm:$0xff pattern:$0x75316420]  ;;  %228 = vrot.lane.b32.xlu1 %v214_v40, %s3231_s12 }
  0x88   :  { %v3377_v45 = vld [vmem:[#allocation2 + $0xc] sm:$0xff]  ;;  %v256_v46 = vperm.slane %v182_v41, 1  ;;  %441 = vst [vmem:[#allocation1 + $0x30] ss:$2 sm:$0xff] %v182_v41  ;;  %v194_v49 = vperm.slane %v182_v41, 0  ;;  %v317_v59 = vperm.slane %v182_v41, 2 }
  0x89   :  { %93 = vst [vmem:[#allocation1 + $0x10] ss:$2 sm:$0xff] %v3377_v45  ;;  %v549_v63 = vld [vmem:[#allocation2 + $0x14] sm:$0xf]  ;;  %v192_v5 = vperm.slane %v3377_v45, 0  ;;  %v193_v10 = vperm.slane %v3377_v45, 4 }
  0x8a   :  { %v268_v48 = vperm.slane %v256_v46, 1  ;;  %432 = vst [vmem:[#allocation1] ss:$2 sm:$0xff] %v3356_v30  ;;  %v206_v54 = vperm.slane %v194_v49, 0  ;;  %v329_v3 = vperm.slane %v317_v59, 2  ;;  %v378_v13 = vperm.slane %v182_v41, 3 }
  0x8b   :  { %439 = vst [vmem:[#allocation1 + $0x20] ss:$2 sm:$0xff] %v3377_v45  ;;  %v3420_v16 = vld [vmem:[#allocation2 + $0x14] sm:$0xf]  ;;  %v3425_v18 = vperm.slane %v192_v5, 0  ;;  %v3428_v19 = vperm.slane %v193_v10, 0 }
  0x8c   :  { %v3385_v52 = vpop.permute.xlu0 %332  ;;  %v279_v53 = vmul.f32 %v3365_v36, %v268_v48  ;;  %v217_v56 = vmul.f32 %v3368_v39, %v206_v54  ;;  %v390_v22 = vperm.slane %v378_v13, 3  ;;  %v3463_v46 = vperm.slane %v189_v34, 0  ;;  %v1038_v49 = vld [vmem:[#allocation2 + $0x14] sm:$0xf]  ;;  %v1036_v5 = vld [vmem:[#allocation2 + $0x8] sm:$0xf] }
  0x8d   :  { %v337_v55 = vmul.f32 %v3385_v52, %v326_v50  ;;  %v340_v9 = vmul.f32 %v3385_v52, %v329_v3  ;;  %v215_v24 = vmul.f32 %v3368_v39, %v3425_v18  ;;  %v216_v28 = vmul.f32 %v3368_v39, %v3428_v19  ;;  %v3497_v10 = vld [vmem:[#allocation2 + $0x14] sm:$0xf]  ;;  %v3504_v13 = vld [vmem:[#allocation2 + $0xc] sm:$0xff] }
  0x8e   :  { %296 = vrot.lane.b32.xlu2 %v279_v53, %s3231_s12  ;;  %v401_v33 = vmul.f32 %v3401_v1, %v390_v22  ;;  %v316_v51 = vperm.slane %v3377_v45, 6  ;;  %v274_v54 = vmul.f32 %v3365_v36, %v3460_v42  ;;  %v212_v58 = vmul.f32 %v3368_v39, %v3463_v46  ;;  %v3506_v22 = vpop.permute.xlu1 %516 }
  0x8f   :  { %351 = vrot.lane.b32.xlu0 %v337_v55, %s3231_s12  ;;  %v3394_v60 = vld.sshfl [vmem:[#allocation1 + $0x30] sm:$0xff pattern:$0x75316420]  ;;  %234 = vrot.lane.b32.xlu1 %v217_v56, %s3231_s12  ;;  %v254_v55 = vperm.slane %v3377_v45, 1  ;;  %v252_v59 = vperm.slane %v3356_v30, 5  ;;  %5630 = vst [vmem:[#allocation11_spill] sm:$0xff] %v3506_v22 }
  0x90   :  { %v3396_v61 = vld.sshfl [vmem:[#allocation1 + $0x10] sm:$0xff pattern:$0x75316420]  ;;  %v3398_v62 = vld.sshfl [vmem:[#allocation1 + $0x18] sm:$0xff pattern:$0x75316420] }
  0x91   :  { %434 = vst [vmem:[#allocation1 + $0x10] ss:$2 sm:$0xff] %v180_v29  ;;  %v3415_v14 = vld.sshfl [vmem:[#allocation1 + $0x8] sm:$0xff pattern:$0x75316420]  ;;  %v313_v29 = vperm.slane %v3356_v30, 6 }
  0x92   :  { %563 = vst [vmem:[#allocation1 + $0x30] ss:$2 sm:$0xff] %v549_v63  ;;  %v3406_v7 = vld.sshfl [vmem:[#allocation1 + $0x28] sm:$0xff pattern:$0x75316420]  ;;  %v3486_v2 = vperm.slane %v316_v51, 2 }
  0x93   :  { %v3408_v8 = vld.sshfl [vmem:[#allocation1 + $0x20] sm:$0xff pattern:$0x75316420]  ;;  %v3458_v41 = vperm.slane %v313_v29, 2  ;;  %v3493_v39 = vperm.slane %v252_v59, 1  ;;  %v255_v34 = vperm.slane %v3377_v45, 5 }
  0x94   :  { %561 = vst [vmem:[#allocation1 + $0x20] ss:$2 sm:$0xff] %v3377_v45  ;;  %v3418_v15 = vld.sshfl [vmem:[#allocation1] sm:$0xff pattern:$0x75316420] }
  0x95   :  { %554 = vst [vmem:[#allocation1] ss:$2 sm:$0xff] %v3356_v30  ;;  %v336_v50 = vmul.f32 %v3385_v52, %v3458_v41  ;;  %v275_v32 = vmul.f32 %v3365_v36, %v3493_v39 }
  0x96   :  { %226 = vrot.lane.b32.xlu2 %v213_v6, %s3231_s12  ;;  %v3490_v6 = vperm.slane %v254_v55, 1 }
  0x97   :  { %357 = vrot.lane.b32.xlu0 %v340_v9, %s3231_s12  ;;  %412 = vrot.lane.b32.xlu1 %v398_v12, %s3231_s12  ;;  %v339_v12 = vmul.f32 %v3385_v52, %v3486_v2 }
  0x98   :  { %v3422_v17 = vld.sshfl [vmem:[#allocation1 + $0x10] sm:$0xff pattern:$0x75316420] }
  0x99   :  { %556 = vst [vmem:[#allocation1 + $0x10] ss:$2 sm:$0xff] %v547_v11  ;;  %v3430_v20 = vld.sshfl [vmem:[#allocation1 + $0x30] sm:$0xff pattern:$0x75316420] }
  0x9a   :  { %930 = vst [vmem:[#allocation1 + $0x30] ss:$2 sm:$0xff] %v3420_v16 }
  0x9b   :  { %v3435_v25 = vld.sshfl [vmem:[#allocation1 + $0x20] sm:$0xff pattern:$0x75316420]  ;;  %v3437_v27 = vld.sshfl [vmem:[#allocation1 + $0x28] sm:$0xff pattern:$0x75316420] }
  0x9c   :  { %928 = vst [vmem:[#allocation1 + $0x20] ss:$2 sm:$0xff] %v3377_v45  ;;  %v3450_v37 = vld.sshfl [vmem:[#allocation1] sm:$0xff pattern:$0x75316420] }
  0x9d   :  { %v3452_v38 = vld.sshfl [vmem:[#allocation1 + $0x8] sm:$0xff pattern:$0x75316420] }
  0x9e   :  { %230 = vrot.lane.b32.xlu2 %v215_v24, %s3231_s12  ;;  %921 = vst [vmem:[#allocation1] ss:$2 sm:$0xff] %v3356_v30  ;;  %v277_v24 = vmul.f32 %v3365_v36, %v3490_v6 }
  0x9f   :  { %232 = vrot.lane.b32.xlu0 %v216_v28, %s3231_s12  ;;  %418 = vrot.lane.b32.xlu1 %v401_v33, %s3231_s12  ;;  %v373_v33 = vperm.slane %v3356_v30, 3 }
  0xa0   :  { %v3455_v40 = vld.sshfl [vmem:[#allocation1 + $0x10] sm:$0xff pattern:$0x75316420] }
  0xa1   :  { %923 = vst [vmem:[#allocation1 + $0x10] ss:$2 sm:$0xff] %v3447_v35  ;;  %v3465_v48 = vld.sshfl [vmem:[#allocation1 + $0x30] sm:$0xff pattern:$0x75316420]  ;;  %v3530_v55 = vperm.slane %v373_v33, 3 }
  0xa2   :  { %1052 = vst [vmem:[#allocation1 + $0x30] ss:$2 sm:$0xff] %v1038_v49  ;;  %v374_v49 = vperm.slane %v3356_v30, 7  ;;  %v377_v33 = vperm.slane %v3377_v45, 7 }
  0xa3   :  { %v3470_v53 = vld.sshfl [vmem:[#allocation1 + $0x28] sm:$0xff pattern:$0x75316420]  ;;  %v3475_v56 = vld.sshfl [vmem:[#allocation1 + $0x20] sm:$0xff pattern:$0x75316420] }
  0xa4   :  { %1050 = vst [vmem:[#allocation1 + $0x20] ss:$2 sm:$0xff] %v3377_v45  ;;  %v3534_v59 = vperm.slane %v374_v49, 3  ;;  %v3550_v49 = vpop.permute.xlu1 %619  ;;  %v3557_v22 = vperm.slane %v377_v33, 3  ;;  %v3573_v33 = vpop.permute.xlu2 %478 }
  0xa5   :  { %v3483_v63 = vld.sshfl [vmem:[#allocation1 + $0x8] sm:$0xff pattern:$0x75316420]  ;;  %v3488_v3 = vld.sshfl [vmem:[#allocation1] sm:$0xff pattern:$0x75316420] }
  0xa6   :  { %349 = vrot.lane.b32.xlu2 %v336_v50, %s3231_s12  ;;  %1043 = vst [vmem:[#allocation1] ss:$2 sm:$0xff] %v3356_v30  ;;  %v3522_v50 = vld [vmem:[#allocation2] sm:$0xff]  ;;  %v397_v4 = vmul.f32 %v3401_v1, %v3534_v59 }
  0xa7   :  { %286 = vrot.lane.b32.xlu0 %v274_v54, %s3231_s12  ;;  %224 = vrot.lane.b32.xlu1 %v212_v58, %s3231_s12  ;;  %v3532_v58 = vperm.slane %v255_v34, 1  ;;  %5631 = vst [vmem:[#allocation12_spill] sm:$0xff] %v3550_v49 }
  0xa8   :  { %v3499_v11 = vld.sshfl [vmem:[#allocation1 + $0x10] sm:$0xff pattern:$0x75316420]  ;;  %5632 = vst [vmem:[#allocation13_spill] sm:$0xff] %v3573_v33 }
  0xa9   :  { %v3495_v9 = vld.sshfl [vmem:[#allocation1 + $0x30] sm:$0xff pattern:$0x75316420]  ;;  %1045 = vst [vmem:[#allocation1 + $0x10] ss:$2 sm:$0xff] %v1036_v5  ;;  %v278_v34 = vmul.f32 %v3365_v36, %v3532_v58  ;;  %v400_v36 = vmul.f32 %v3401_v1, %v3557_v22 }
  0xaa   :  { %1419 = vst [vmem:[#allocation1 + $0x30] ss:$2 sm:$0xff] %v3497_v10 }
  0xab   :  { %v3510_v28 = vld.sshfl [vmem:[#allocation1 + $0x28] sm:$0xff pattern:$0x75316420]  ;;  %v3512_v29 = vld.sshfl [vmem:[#allocation1 + $0x20] sm:$0xff pattern:$0x75316420] }
  0xac   :  { %1417 = vst [vmem:[#allocation1 + $0x20] ss:$2 sm:$0xff] %v3504_v13  ;;  %v699_v30 = vpop.permute.xlu1 %698 }
  0xad   :  { %v3525_v51 = vld.sshfl [vmem:[#allocation1 + $0x8] sm:$0xff pattern:$0x75316420]  ;;  %v3527_v54 = vld.sshfl [vmem:[#allocation1] sm:$0xff pattern:$0x75316420]  ;;  %v701_v23 = vmul.f32 %v699_v30, %v3463_v46 }
  0xae   :  { %355 = vrot.lane.b32.xlu2 %v339_v12, %s3231_s12  ;;  %1410 = vst [vmem:[#allocation1] ss:$2 sm:$0xff] %v3522_v50  ;;  %v3538_v12 = vld [vmem:[#allocation2 + $0x8] sm:$0xf] }
  0xaf   :  { %292 = vrot.lane.b32.xlu0 %v277_v24, %s3231_s12  ;;  %288 = vrot.lane.b32.xlu1 %v275_v32, %s3231_s12  ;;  %v396_v24 = vmul.f32 %v3401_v1, %v3530_v55  ;;  %v376_v32 = vperm.slane %v3377_v45, 3 }
  0xb0   :  { %v3536_v5 = vld.sshfl [vmem:[#allocation1 + $0x10] sm:$0xff pattern:$0x75316420] }
  0xb1   :  { %1412 = vst [vmem:[#allocation1 + $0x10] ss:$2 sm:$0xff] %v3538_v12  ;;  %v3554_v0 = vperm.slane %v376_v32, 3 }
  0xb3   :  { %v399_v26 = vmul.f32 %v3401_v1, %v3554_v0 }
  0xb6   :  { %408 = vrot.lane.b32.xlu2 %v396_v24, %s3231_s12  ;;  %v315_v24 = vperm.slane %v3377_v45, 2  ;;  %v3582_v45 = vpop.permute.xlu2 %535 }
  0xb7   :  { %410 = vrot.lane.b32.xlu0 %v397_v4, %s3231_s12  ;;  %294 = vrot.lane.b32.xlu1 %v278_v34, %s3231_s12  ;;  %v335_v4 = vmul.f32 %v3385_v52, %v3561_v21  ;;  %5633 = vst [vmem:[#allocation14_spill] sm:$0xff] %v3582_v45 }
  0xb8   :  { %v3571_v32 = vperm.slane %v315_v24, 2  ;;  %v3641_v24 = vpop.permute.xlu0 %497 }
  0xb9   :  { %5638 = vst [vmem:[#allocation19_spill] sm:$0xff] %v3641_v24 }
  0xbe   :  { %414 = vrot.lane.b32.xlu2 %v399_v26, %s3231_s12  ;;  %v338_v26 = vmul.f32 %v3385_v52, %v3571_v32  ;;  %v3592_v52 = vpop.permute.xlu2 %638 }
  0xbf   :  { %416 = vrot.lane.b32.xlu0 %v400_v36, %s3231_s12  ;;  %347 = vrot.lane.b32.xlu1 %v335_v4, %s3231_s12  ;;  %5634 = vst [vmem:[#allocation15_spill] sm:$0xff] %v3592_v52 }
  0xc6   :  { %713 = vrot.lane.b32.xlu2 %v701_v23, %s3232_s0 }
  0xc7   :  { %453 = vrot.lane.b32.xlu0 %v3406_v7, %s3233_s13  ;;  %353 = vrot.lane.b32.xlu1 %v338_v26, %s3231_s12 }
  0xce   :  { %451 = vrot.lane.b32.xlu2 %v3408_v8, %s3233_s13  ;;  %v680_v8 = vperm.slane %v3447_v35, 0 }
  0xcf   :  { %447 = vrot.lane.b32.xlu0 %v3415_v14, %s3233_s13  ;;  %455 = vrot.lane.b32.xlu1 %v3394_v60, %s3233_s13  ;;  %v702_v60 = vmul.f32 %v699_v30, %v3392_v57  ;;  %v704_v14 = vmul.f32 %v699_v30, %v3425_v18 }
  0xd6   :  { %577 = vrot.lane.b32.xlu2 %v3430_v20, %s3234_s14 }
  0xd7   :  { %573 = vrot.lane.b32.xlu0 %v3435_v25, %s3234_s14  ;;  %449 = vrot.lane.b32.xlu1 %v3422_v17, %s3233_s13  ;;  %v705_v17 = vmul.f32 %v699_v30, %v3428_v19  ;;  %v683_v25 = vperm.slane %v3420_v16, 0 }
  0xde   :  { %445 = vrot.lane.b32.xlu2 %v3418_v15, %s3233_s13  ;;  %v692_v15 = vperm.slane %v680_v8, 0 }
  0xdf   :  { %v3600_v1 = vpop.permute.xlu2 %290  ;;  %567 = vrot.lane.b32.xlu0 %v3450_v37, %s3234_s14  ;;  %575 = vrot.lane.b32.xlu1 %v3437_v27, %s3234_s14  ;;  %v3129_v27 = vld [vmem:[%s5539_s1 + $0x44] sm:$0xf]  ;;  %v695_v37 = vperm.slane %v683_v25, 0 }
  0xe0   :  { %v703_v57 = vmul.f32 %v699_v30, %v692_v15 }
  0xe1   :  { %v706_v18 = vmul.f32 %v699_v30, %v695_v37  ;;  %v3645_v30 = vpop.permute.xlu0 %600 }
  0xe2   :  { %5640 = vst [vmem:[#allocation21_spill] sm:$0xff] %v3645_v30 }
  0xe6   :  { %571 = vrot.lane.b32.xlu2 %v3455_v40, %s3234_s14 }
  0xe7   :  { %715 = vrot.lane.b32.xlu0 %v702_v60, %s3232_s0  ;;  %569 = vrot.lane.b32.xlu1 %v3452_v38, %s3234_s14 }
  0xe8   :  { %v3610_v7 = vpop.permute.xlu2 %296 }
  0xe9   :  { %v3649_v60 = vpop.permute.xlu0 %657 }
  0xea   :  { %5641 = vst [vmem:[#allocation22_spill] sm:$0xff] %v3649_v60  ;;  %v745_v60 = vperm.slane %v3420_v16, 1 }
  0xee   :  { %719 = vrot.lane.b32.xlu2 %v704_v14, %s3232_s0 }
  0xef   :  { %721 = vrot.lane.b32.xlu0 %v705_v17, %s3232_s0  ;;  %717 = vrot.lane.b32.xlu1 %v703_v57, %s3232_s0  ;;  %v742_v17 = vperm.slane %v3447_v35, 1 }
  0xf0   :  { %v3619_v20 = vpop.permute.xlu2 %226 }
  0xf1   :  { %v754_v25 = vperm.slane %v742_v17, 1 }
  0xf6   :  { %760 = vperm.xlu2 %3198, %v3129_v27  }
  0xf7   :  { %723 = vrot.lane.b32.xlu1 %v706_v18, %s3232_s0 }
  0xf8   :  { %v3626_v38 = vpop.permute.xlu2 %230 }
 0x100   :  { %v3629_v19 = vpop.permute.xlu2 %349 }
 0x101   :  { %v3653_v14 = vpop.permute.xlu0 %351 }
 0x108   :  { %v3631_v40 = vpop.permute.xlu2 %355 }
 0x109   :  { %v3658_v57 = vpop.permute.xlu0 %357 }
 0x110   :  { %v3633_v46 = vpop.permute.xlu2 %408 }
 0x111   :  { %5635 = vst [vmem:[#allocation16_spill] sm:$0xff] %v3633_v46  ;;  %v3666_v52 = vpop.permute.xlu0 %232 }
 0x118   :  { %v3635_v34 = vpop.permute.xlu2 %414 }
 0x119   :  { %5636 = vst [vmem:[#allocation17_spill] sm:$0xff] %v3635_v34 }
 0x120   :  { %v3637_v36 = vpop.permute.xlu2 %713 }
 0x121   :  { %5637 = vst [vmem:[#allocation18_spill] sm:$0xff] %v3637_v36 }
 0x128   :  { %v3639_v4 = vpop.permute.xlu2 %451 }
 0x130   :  { %v3643_v23 = vpop.permute.xlu2 %577 }
 0x131   :  { %5639 = vst [vmem:[#allocation20_spill] sm:$0xff] %v3643_v23 }
 0x138   :  { %v3647_v26 = vpop.permute.xlu2 %445 }
 0x140   :  { %v3651_v8 = vpop.permute.xlu2 %571 }
 0x141   :  { %5642 = vst [vmem:[#allocation23_spill] sm:$0xff] %v3651_v8 }
 0x148   :  { %v3655_v15 = vpop.permute.xlu2 %719 }
 0x149   :  { %5643 = vst [vmem:[#allocation24_spill] sm:$0xff] %v3655_v15  ;;  %v757_v15 = vperm.slane %v745_v60, 1 }
 0x150   :  { %v761_v27 = vpop.permute.xlu2 %760 }
 0x151   :  { %v765_v37 = vmul.f32 %v761_v27, %v754_v25  ;;  %v763_v18 = vmul.f32 %v761_v27, %v3460_v42  ;;  %v764_v36 = vmul.f32 %v761_v27, %v3493_v39  ;;  %v768_v49 = vmul.f32 %v761_v27, %v757_v15  ;;  %v3130_v42 = vld [vmem:[%s5539_s1 + $0x48] sm:$0xf]  ;;  %v3676_v39 = vpop.permute.xlu0 %286 }
 0x152   :  { %v766_v17 = vmul.f32 %v761_v27, %v3490_v6  ;;  %v767_v25 = vmul.f32 %v761_v27, %v3532_v58  ;;  %v3690_v27 = vpop.permute.xlu1 %228 }
 0x153   :  { %779 = vrot.lane.b32.xlu2 %v765_v37, %s3232_s0  ;;  %775 = vrot.lane.b32.xlu0 %v763_v18, %s3232_s0 }
 0x154   :  { %777 = vrot.lane.b32.xlu1 %v764_v36, %s3232_s0 }
 0x159   :  { %v3678_v36 = vpop.permute.xlu0 %292 }
 0x15a   :  { %v3694_v18 = vpop.permute.xlu1 %234 }
 0x15b   :  { %785 = vrot.lane.b32.xlu2 %v768_v49, %s3232_s0  ;;  %781 = vrot.lane.b32.xlu0 %v766_v17, %s3232_s0 }
 0x15c   :  { %783 = vrot.lane.b32.xlu1 %v767_v25, %s3232_s0 }
 0x161   :  { %v3680_v60 = vpop.permute.xlu0 %410 }
 0x162   :  { %5644 = vst [vmem:[#allocation25_spill] sm:$0xff] %v3680_v60  ;;  %v3698_v25 = vpop.permute.xlu1 %412 }
 0x163   :  { %821 = vperm.xlu0 %3199, %v3130_v42   ;;  %5649 = vst [vmem:[#allocation30_spill] sm:$0xff] %v3698_v25 }
 0x169   :  { %v3682_v6 = vpop.permute.xlu0 %416 }
 0x16a   :  { %5645 = vst [vmem:[#allocation26_spill] sm:$0xff] %v3682_v6  ;;  %v3702_v30 = vpop.permute.xlu1 %418 }
 0x16b   :  { %5651 = vst [vmem:[#allocation32_spill] sm:$0xff] %v3702_v30  ;;  %v864_v30 = vperm.slane %v3447_v35, 3 }
 0x16d   :  { %v876_v46 = vperm.slane %v864_v30, 3 }
 0x171   :  { %v3684_v58 = vpop.permute.xlu0 %453 }
 0x172   :  { %v3706_v23 = vpop.permute.xlu1 %224 }
 0x179   :  { %v3686_v49 = vpop.permute.xlu0 %447 }
 0x17a   :  { %v3713_v6 = vpop.permute.xlu1 %288 }
 0x181   :  { %v3688_v15 = vpop.permute.xlu0 %573 }
 0x182   :  { %5646 = vst [vmem:[#allocation27_spill] sm:$0xff] %v3688_v15  ;;  %v803_v15 = vperm.slane %v3447_v35, 2 }
 0x184   :  { %v815_v8 = vperm.slane %v803_v15, 2 }
 0x189   :  { %v3692_v37 = vpop.permute.xlu0 %567 }
 0x18a   :  { %5647 = vst [vmem:[#allocation28_spill] sm:$0xff] %v3692_v37 }
 0x191   :  { %v3696_v17 = vpop.permute.xlu0 %715 }
 0x192   :  { %5648 = vst [vmem:[#allocation29_spill] sm:$0xff] %v3696_v17 }
 0x199   :  { %v3700_v42 = vpop.permute.xlu0 %721 }
 0x19a   :  { %5650 = vst [vmem:[#allocation31_spill] sm:$0xff] %v3700_v42 }
 0x1c5   :  { %v3704_v45 = vpop.permute.xlu0 %775 }
 0x1c6   :  { %5652 = vst [vmem:[#allocation33_spill] sm:$0xff] %v3704_v45  ;;  %v806_v45 = vperm.slane %v3420_v16, 2 }
 0x1cd   :  { %v3708_v24 = vpop.permute.xlu0 %781 }
 0x1ce   :  { %5653 = vst [vmem:[#allocation34_spill] sm:$0xff] %v3708_v24  ;;  %v818_v24 = vperm.slane %v806_v45, 2 }
 0x1d5   :  { %v822_v37 = vpop.permute.xlu0 %821 }
 0x1d6   :  { %v826_v33 = vmul.f32 %v822_v37, %v815_v8  ;;  %v825_v34 = vmul.f32 %v822_v37, %v3458_v41  ;;  %v824_v17 = vmul.f32 %v822_v37, %v3561_v21  ;;  %v829_v42 = vmul.f32 %v822_v37, %v818_v24  ;;  %v3723_v21 = vpop.permute.xlu1 %294  ;;  %v3131_v41 = vld [vmem:[%s5539_s1 + $0x4c] sm:$0xf] }
 0x1d7   :  { %v828_v15 = vmul.f32 %v822_v37, %v3486_v2  ;;  %v827_v8 = vmul.f32 %v822_v37, %v3571_v32 }
 0x1d8   :  { %840 = vrot.lane.b32.xlu0 %v826_v33, %s3232_s0  ;;  %838 = vrot.lane.b32.xlu2 %v825_v34, %s3232_s0 }
 0x1d9   :  { %836 = vrot.lane.b32.xlu1 %v824_v17, %s3232_s0 }
 0x1de   :  { %v3729_v33 = vpop.permute.xlu1 %347 }
 0x1e0   :  { %846 = vrot.lane.b32.xlu0 %v829_v42, %s3232_s0  ;;  %844 = vrot.lane.b32.xlu2 %v828_v15, %s3232_s0 }
 0x1e1   :  { %842 = vrot.lane.b32.xlu1 %v827_v8, %s3232_s0 }
 0x1e6   :  { %v3731_v45 = vpop.permute.xlu1 %353 }
 0x1e9   :  { %882 = vperm.xlu1 %3197, %v3131_v41  }
 0x1ee   :  { %v3733_v2 = vpop.permute.xlu1 %455 }
 0x1f6   :  { %v3735_v32 = vpop.permute.xlu1 %449 }
 0x1fe   :  { %v3737_v34 = vpop.permute.xlu1 %575 }
 0x1ff   :  { %5654 = vst [vmem:[#allocation35_spill] sm:$0xff] %v3737_v34 }
 0x206   :  { %v3739_v24 = vpop.permute.xlu1 %569 }
 0x207   :  { %5655 = vst [vmem:[#allocation36_spill] sm:$0xff] %v3739_v24 }
 0x20e   :  { %v3741_v37 = vpop.permute.xlu1 %717 }
 0x216   :  { %v3743_v17 = vpop.permute.xlu1 %723 }
 0x21e   :  { %v3745_v42 = vpop.permute.xlu1 %777 }
 0x21f   :  { %5656 = vst [vmem:[#allocation37_spill] sm:$0xff] %v3745_v42  ;;  %v867_v42 = vperm.slane %v3420_v16, 3  ;;  %v3133_v16 = vld [vmem:[%s5539_s1 + $0x54] sm:$0xf] }
 0x226   :  { %v3747_v15 = vpop.permute.xlu1 %783 }
 0x227   :  { %5657 = vst [vmem:[#allocation38_spill] sm:$0xff] %v3747_v15 }
 0x24b   :  { %v3749_v8 = vpop.permute.xlu1 %836 }
 0x24c   :  { %5658 = vst [vmem:[#allocation39_spill] sm:$0xff] %v3749_v8  ;;  %v879_v8 = vperm.slane %v867_v42, 3 }
 0x253   :  { %v3751_v41 = vpop.permute.xlu1 %842 }
 0x254   :  { %5659 = vst [vmem:[#allocation40_spill] sm:$0xff] %v3751_v41 }
 0x25b   :  { %v883_v60 = vpop.permute.xlu1 %882 }
 0x25c   :  { %v887_v25 = vmul.f32 %v883_v60, %v876_v46  ;;  %v886_v34 = vmul.f32 %v883_v60, %v3534_v59  ;;  %v885_v24 = vmul.f32 %v883_v60, %v3530_v55  ;;  %v890_v15 = vmul.f32 %v883_v60, %v879_v8  ;;  %v3826_v55 = vpop.permute.xlu2 %779 }
 0x25d   :  { %v889_v41 = vmul.f32 %v883_v60, %v3557_v22  ;;  %v888_v35 = vmul.f32 %v883_v60, %v3554_v0  ;;  %v3134_v0 = vld [vmem:[%s5539_s1 + $0x58] sm:$0xf]  ;;  %v3138_v22 = vld [vmem:[%s5539_s1 + $0x68] sm:$0xf] }
 0x25e   :  { %901 = vrot.lane.b32.xlu1 %v887_v25, %s3232_s0  ;;  %899 = vrot.lane.b32.xlu0 %v886_v34, %s3232_s0  ;;  %v1169_v25 = vperm.slane %v3538_v12, 0  ;;  %v1168_v34 = vperm.slane %v3522_v50, 4 }
 0x25f   :  { %897 = vrot.lane.b32.xlu2 %v885_v24, %s3232_s0  ;;  %v1167_v24 = vperm.slane %v3522_v50, 0 }
 0x260   :  { %v1180_v8 = vperm.slane %v1168_v34, 0 }
 0x266   :  { %907 = vrot.lane.b32.xlu1 %v890_v15, %s3232_s0  ;;  %905 = vrot.lane.b32.xlu0 %v889_v41, %s3232_s0  ;;  %v1181_v15 = vperm.slane %v1169_v25, 0  ;;  %v1179_v41 = vperm.slane %v1167_v24, 0 }
 0x267   :  { %903 = vrot.lane.b32.xlu2 %v888_v35, %s3232_s0 }
 0x26e   :  { %938 = vrot.lane.b32.xlu1 %v3499_v11, %s3235_s21  ;;  %936 = vrot.lane.b32.xlu0 %v3483_v63, %s3235_s21  ;;  %v3132_v63 = vld [vmem:[%s5539_s1 + $0x50] sm:$0xf]  ;;  %v3139_v11 = vld [vmem:[%s5539_s1 + $0x6c] sm:$0xf] }
 0x26f   :  { %934 = vrot.lane.b32.xlu2 %v3488_v3, %s3235_s21  ;;  %v3140_v3 = vld [vmem:[%s5539_s1 + $0x70] sm:$0xf] }
 0x276   :  { %944 = vrot.lane.b32.xlu1 %v3465_v48, %s3235_s21  ;;  %942 = vrot.lane.b32.xlu0 %v3470_v53, %s3235_s21  ;;  %v3135_v48 = vld [vmem:[%s5539_s1 + $0x5c] sm:$0xf]  ;;  %v3137_v53 = vld [vmem:[%s5539_s1 + $0x64] sm:$0xf] }
 0x277   :  { %940 = vrot.lane.b32.xlu2 %v3475_v56, %s3235_s21  ;;  %v3136_v56 = vld [vmem:[%s5539_s1 + $0x60] sm:$0xf] }
 0x27e   :  { %1005 = vperm.xlu1 %3197, %v3134_v0   ;;  %986 = vperm.xlu0 %3199, %v3133_v16  }
 0x27f   :  { %967 = vperm.xlu2 %3198, %v3132_v63  }
 0x286   :  { %1058 = vrot.lane.b32.xlu1 %v3525_v51, %s3236_s7  ;;  %1056 = vrot.lane.b32.xlu0 %v3527_v54, %s3236_s7 }
 0x287   :  { %1024 = vperm.xlu2 %3198, %v3135_v48   ;;  %v1172_v48 = vperm.slane %v3497_v10, 0 }
 0x28e   :  { %1064 = vrot.lane.b32.xlu1 %v3510_v28, %s3236_s7  ;;  %1062 = vrot.lane.b32.xlu0 %v3512_v29, %s3236_s7 }
 0x28f   :  { %1060 = vrot.lane.b32.xlu2 %v3536_v5, %s3236_s7  ;;  %v3830_v5 = vpop.permute.xlu2 %785 }
 0x290   :  { %5666 = vst [vmem:[#allocation47_spill] sm:$0xff] %v3830_v5 }
 0x296   :  { %1108 = vperm.xlu1 %3197, %v3137_v53   ;;  %1089 = vperm.xlu0 %3199, %v3136_v56   ;;  %v1171_v53 = vperm.slane %v3504_v13, 4  ;;  %v1170_v56 = vperm.slane %v3504_v13, 0 }
 0x297   :  { %1066 = vrot.lane.b32.xlu2 %v3495_v9, %s3236_s7  ;;  %v3834_v30 = vpop.permute.xlu2 %838 }
 0x298   :  { %5668 = vst [vmem:[#allocation49_spill] sm:$0xff] %v3834_v30  ;;  %v1182_v25 = vperm.slane %v1170_v56, 0 }
 0x29e   :  { %1187 = vperm.xlu1 %3197, %v3140_v3   ;;  %1146 = vperm.xlu0 %3199, %v3139_v11   ;;  %v1184_v11 = vperm.slane %v1172_v48, 0 }
 0x29f   :  { %1127 = vperm.xlu2 %3198, %v3138_v22   ;;  %v3841_v42 = vpop.permute.xlu2 %844  ;;  %v1183_v22 = vperm.slane %v1171_v53, 0 }
 0x2a0   :  { %5670 = vst [vmem:[#allocation51_spill] sm:$0xff] %v3841_v42 }
 0x2b9   :  { %v3849_v3 = vpop.permute.xlu2 %897 }
 0x2ba   :  { %5671 = vst [vmem:[#allocation52_spill] sm:$0xff] %v3849_v3 }
 0x2d0   :  { %v3816_v28 = vpop.permute.xlu1 %901 }
 0x2d1   :  { %5660 = vst [vmem:[#allocation41_spill] sm:$0xff] %v3816_v28 }
 0x2d8   :  { %v3818_v29 = vpop.permute.xlu1 %907 }
 0x2d9   :  { %5661 = vst [vmem:[#allocation42_spill] sm:$0xff] %v3818_v29 }
 0x2e0   :  { %v3820_v9 = vpop.permute.xlu1 %938 }
 0x2e1   :  { %5662 = vst [vmem:[#allocation43_spill] sm:$0xff] %v3820_v9 }
 0x2e8   :  { %v3822_v51 = vpop.permute.xlu1 %944 }
 0x2e9   :  { %5663 = vst [vmem:[#allocation44_spill] sm:$0xff] %v3822_v51 }
 0x2f0   :  { %v3824_v54 = vpop.permute.xlu1 %1005 }
 0x2f1   :  { %5664 = vst [vmem:[#allocation45_spill] sm:$0xff] %v3824_v54 }
 0x2f8   :  { %v3828_v59 = vpop.permute.xlu1 %1058 }
 0x2f9   :  { %5665 = vst [vmem:[#allocation46_spill] sm:$0xff] %v3828_v59 }
 0x300   :  { %v3832_v46 = vpop.permute.xlu1 %1064 }
 0x301   :  { %5667 = vst [vmem:[#allocation48_spill] sm:$0xff] %v3832_v46 }
 0x308   :  { %v3836_v60 = vpop.permute.xlu1 %1108 }
 0x309   :  { %5669 = vst [vmem:[#allocation50_spill] sm:$0xff] %v3836_v60 }
 0x310   :  { %v1188_v35 = vpop.permute.xlu1 %1187 }
 0x311   :  { %v1192_v0 = vmul.f32 %v1188_v35, %v1181_v15  ;;  %v1191_v16 = vmul.f32 %v1188_v35, %v1180_v8  ;;  %v1190_v63 = vmul.f32 %v1188_v35, %v1179_v41  ;;  %v1195_v34 = vmul.f32 %v1188_v35, %v1184_v11  ;;  %v3854_v8 = vpop.permute.xlu2 %903  ;;  %v3141_v41 = vld [vmem:[%s5539_s1 + $0x74] sm:$0xf] }
 0x312   :  { %v1194_v24 = vmul.f32 %v1188_v35, %v1183_v22  ;;  %v1193_v15 = vmul.f32 %v1188_v35, %v1182_v25  ;;  %5672 = vst [vmem:[#allocation53_spill] sm:$0xff] %v3854_v8  ;;  %v3877_v25 = vpop.permute.xlu0 %840 }
 0x313   :  { %1206 = vrot.lane.b32.xlu1 %v1192_v0, %s3237_s22  ;;  %1204 = vrot.lane.b32.xlu0 %v1191_v16, %s3237_s22  ;;  %5682 = vst [vmem:[#allocation63_spill] sm:$0xff] %v3877_v25 }
 0x314   :  { %1202 = vrot.lane.b32.xlu2 %v1190_v63, %s3237_s22 }
 0x319   :  { %v3859_v0 = vpop.permute.xlu2 %934 }
 0x31a   :  { %5673 = vst [vmem:[#allocation54_spill] sm:$0xff] %v3859_v0 }
 0x31b   :  { %1212 = vrot.lane.b32.xlu1 %v1195_v34, %s3237_s22  ;;  %1210 = vrot.lane.b32.xlu0 %v1194_v24, %s3237_s22  ;;  %v1231_v34 = vperm.slane %v3538_v12, 1  ;;  %v1230_v24 = vperm.slane %v3522_v50, 5 }
 0x31c   :  { %1208 = vrot.lane.b32.xlu2 %v1193_v15, %s3237_s22  ;;  %v1229_v15 = vperm.slane %v3522_v50, 1 }
 0x31d   :  { %v1242_v60 = vperm.slane %v1230_v24, 1 }
 0x321   :  { %v3861_v16 = vpop.permute.xlu2 %940 }
 0x322   :  { %5674 = vst [vmem:[#allocation55_spill] sm:$0xff] %v3861_v16 }
 0x324   :  { %1249 = vperm.xlu2 %3198, %v3141_v41   ;;  %v1243_v41 = vperm.slane %v1231_v34, 1  ;;  %v1232_v34 = vperm.slane %v3504_v13, 1 }
 0x326   :  { %v1244_v59 = vperm.slane %v1232_v34, 1 }
 0x329   :  { %v3863_v63 = vpop.permute.xlu2 %967 }
 0x32a   :  { %5675 = vst [vmem:[#allocation56_spill] sm:$0xff] %v3863_v63  ;;  %v1292_v63 = vperm.slane %v3538_v12, 2 }
 0x32c   :  { %v1304_v29 = vperm.slane %v1292_v63, 2 }
 0x331   :  { %v3865_v35 = vpop.permute.xlu2 %1024 }
 0x332   :  { %5676 = vst [vmem:[#allocation57_spill] sm:$0xff] %v3865_v35  ;;  %v1241_v35 = vperm.slane %v1229_v15, 1 }
 0x339   :  { %v3867_v48 = vpop.permute.xlu2 %1060 }
 0x33a   :  { %5677 = vst [vmem:[#allocation58_spill] sm:$0xff] %v3867_v48 }
 0x341   :  { %v3869_v53 = vpop.permute.xlu2 %1066 }
 0x342   :  { %5678 = vst [vmem:[#allocation59_spill] sm:$0xff] %v3869_v53 }
 0x349   :  { %v3871_v56 = vpop.permute.xlu2 %1127 }
 0x34a   :  { %5679 = vst [vmem:[#allocation60_spill] sm:$0xff] %v3871_v56  ;;  %v3886_v56 = vpop.permute.xlu0 %846 }
 0x34b   :  { %5683 = vst [vmem:[#allocation64_spill] sm:$0xff] %v3886_v56 }
 0x36e   :  { %v3873_v11 = vpop.permute.xlu2 %1202 }
 0x36f   :  { %5680 = vst [vmem:[#allocation61_spill] sm:$0xff] %v3873_v11  ;;  %v1233_v11 = vperm.slane %v3504_v13, 5 }
 0x371   :  { %v1245_v15 = vperm.slane %v1233_v11, 1 }
 0x376   :  { %v3875_v22 = vpop.permute.xlu2 %1208 }
 0x377   :  { %5681 = vst [vmem:[#allocation62_spill] sm:$0xff] %v3875_v22  ;;  %v1234_v22 = vperm.slane %v3497_v10, 1 }
 0x379   :  { %v1246_v24 = vperm.slane %v1234_v22, 1 }
 0x37e   :  { %v1250_v54 = vpop.permute.xlu2 %1249 }
 0x37f   :  { %v1254_v46 = vmul.f32 %v1250_v54, %v1243_v41  ;;  %v1253_v53 = vmul.f32 %v1250_v54, %v1242_v60  ;;  %v1252_v48 = vmul.f32 %v1250_v54, %v1241_v35  ;;  %v1257_v41 = vmul.f32 %v1250_v54, %v1246_v24 }
 0x380   :  { %v1256_v60 = vmul.f32 %v1250_v54, %v1245_v15  ;;  %v1255_v35 = vmul.f32 %v1250_v54, %v1244_v59 }
 0x381   :  { %1268 = vrot.lane.b32.xlu2 %v1254_v46, %s3237_s22  ;;  %1266 = vrot.lane.b32.xlu1 %v1253_v53, %s3237_s22  ;;  %v3892_v46 = vpop.permute.xlu0 %899 }
 0x382   :  { %1264 = vrot.lane.b32.xlu0 %v1252_v48, %s3237_s22  ;;  %5684 = vst [vmem:[#allocation65_spill] sm:$0xff] %v3892_v46  ;;  %v3142_v48 = vld [vmem:[%s5539_s1 + $0x78] sm:$0xf] }
 0x389   :  { %1274 = vrot.lane.b32.xlu2 %v1257_v41, %s3237_s22  ;;  %1272 = vrot.lane.b32.xlu1 %v1256_v60, %s3237_s22  ;;  %v3898_v53 = vpop.permute.xlu0 %905 }
 0x38a   :  { %1270 = vrot.lane.b32.xlu0 %v1255_v35, %s3237_s22  ;;  %5685 = vst [vmem:[#allocation66_spill] sm:$0xff] %v3898_v53 }
 0x391   :  { %v3900_v11 = vpop.permute.xlu0 %936 }
 0x392   :  { %1310 = vperm.xlu0 %3199, %v3142_v48  }
 0x399   :  { %v3902_v22 = vpop.permute.xlu0 %942 }
 0x39a   :  { %5686 = vst [vmem:[#allocation67_spill] sm:$0xff] %v3902_v22 }
 0x3a1   :  { %v3904_v54 = vpop.permute.xlu0 %986 }
 0x3a2   :  { %5687 = vst [vmem:[#allocation68_spill] sm:$0xff] %v3904_v54  ;;  %v1291_v54 = vperm.slane %v3522_v50, 6 }
 0x3a9   :  { %v3906_v59 = vpop.permute.xlu0 %1056 }
 0x3aa   :  { %5688 = vst [vmem:[#allocation69_spill] sm:$0xff] %v3906_v59  ;;  %v1290_v59 = vperm.slane %v3522_v50, 2 }
 0x3ac   :  { %v1302_v8 = vperm.slane %v1290_v59, 2 }
 0x3b1   :  { %v3908_v34 = vpop.permute.xlu0 %1062 }
 0x3b2   :  { %5689 = vst [vmem:[#allocation70_spill] sm:$0xff] %v3908_v34  ;;  %v1303_v34 = vperm.slane %v1291_v54, 2 }
 0x3b9   :  { %v3910_v24 = vpop.permute.xlu0 %1089 }
 0x3ba   :  { %5690 = vst [vmem:[#allocation71_spill] sm:$0xff] %v3910_v24 }
 0x3c1   :  { %v3912_v15 = vpop.permute.xlu0 %1146 }
 0x3c2   :  { %5691 = vst [vmem:[#allocation72_spill] sm:$0xff] %v3912_v15 }
 0x3c9   :  { %v3914_v41 = vpop.permute.xlu0 %1204 }
 0x3ca   :  { %5692 = vst [vmem:[#allocation73_spill] sm:$0xff] %v3914_v41 }
 0x3d1   :  { %v3916_v60 = vpop.permute.xlu0 %1210 }
 0x3d2   :  { %5693 = vst [vmem:[#allocation74_spill] sm:$0xff] %v3916_v60  ;;  %v1293_v60 = vperm.slane %v3504_v13, 2 }
 0x3d4   :  { %v1305_v54 = vperm.slane %v1293_v60, 2  ;;  %v1352_v60 = vperm.slane %v3522_v50, 7 }
 0x3f4   :  { %v3918_v35 = vpop.permute.xlu0 %1264 }
 0x3f5   :  { %5694 = vst [vmem:[#allocation75_spill] sm:$0xff] %v3918_v35  ;;  %v1295_v35 = vperm.slane %v3497_v10, 2 }
 0x3f7   :  { %v1307_v41 = vperm.slane %v1295_v35, 2  ;;  %v1351_v35 = vperm.slane %v3522_v50, 3 }
 0x3fc   :  { %v3920_v48 = vpop.permute.xlu0 %1270 }
 0x3fd   :  { %5695 = vst [vmem:[#allocation76_spill] sm:$0xff] %v3920_v48  ;;  %v1294_v48 = vperm.slane %v3504_v13, 6 }
 0x3ff   :  { %v1306_v63 = vperm.slane %v1294_v48, 2 }
 0x404   :  { %v1311_v24 = vpop.permute.xlu0 %1310 }
 0x405   :  { %v1315_v53 = vmul.f32 %v1311_v24, %v1304_v29  ;;  %v1314_v15 = vmul.f32 %v1311_v24, %v1303_v34  ;;  %v1313_v28 = vmul.f32 %v1311_v24, %v1302_v8  ;;  %v1318_v59 = vmul.f32 %v1311_v24, %v1307_v41  ;;  %v3143_v8 = vld [vmem:[%s5539_s1 + $0x7c] sm:$0xf] }
 0x406   :  { %v1317_v3 = vmul.f32 %v1311_v24, %v1306_v63  ;;  %v1316_v29 = vmul.f32 %v1311_v24, %v1305_v54  ;;  %v1364_v63 = vperm.slane %v1352_v60, 3  ;;  %v1363_v54 = vperm.slane %v1351_v35, 3 }
 0x407   :  { %1329 = vrot.lane.b32.xlu0 %v1315_v53, %s3237_s22  ;;  %1327 = vrot.lane.b32.xlu2 %v1314_v15, %s3237_s22 }
 0x408   :  { %1325 = vrot.lane.b32.xlu1 %v1313_v28, %s3237_s22  ;;  %v3937_v28 = vpop.permute.xlu1 %1206 }
 0x409   :  { %5696 = vst [vmem:[#allocation77_spill] sm:$0xff] %v3937_v28 }
 0x40f   :  { %1335 = vrot.lane.b32.xlu0 %v1318_v59, %s3237_s22  ;;  %1333 = vrot.lane.b32.xlu2 %v1317_v3, %s3237_s22  ;;  %v1353_v3 = vperm.slane %v3538_v12, 3  ;;  %v1354_v12 = vperm.slane %v3504_v13, 3 }
 0x410   :  { %1331 = vrot.lane.b32.xlu1 %v1316_v29, %s3237_s22  ;;  %v3939_v53 = vpop.permute.xlu1 %1212 }
 0x411   :  { %5697 = vst [vmem:[#allocation78_spill] sm:$0xff] %v3939_v53  ;;  %v1365_v48 = vperm.slane %v1353_v3, 3  ;;  %v1366_v60 = vperm.slane %v1354_v12, 3  ;;  %v5702_v12 = vmov 0 }
 0x418   :  { %1371 = vperm.xlu1 %3197, %v3143_v8   ;;  %v3941_v34 = vpop.permute.xlu1 %1266 }
 0x419   :  { %5698 = vst [vmem:[#allocation79_spill] sm:$0xff] %v3941_v34 }
 0x420   :  { %v3943_v15 = vpop.permute.xlu1 %1272 }
 0x421   :  { %5699 = vst [vmem:[#allocation80_spill] sm:$0xff] %v3943_v15 }
 0x47a   :  { %v3945_v24 = vpop.permute.xlu1 %1325 }
 0x47b   :  { %5700 = vst [vmem:[#allocation81_spill] sm:$0xff] %v3945_v24  ;;  %v1356_v24 = vperm.slane %v3497_v10, 3 }
 0x47d   :  { %v1368_v50 = vperm.slane %v1356_v24, 3  ;;  %v1422_v24 = vld.sshfl [vmem:[#allocation1 + $0x30] sm:$0xff pattern:$0x75316420] }
 0x482   :  { %v3947_v41 = vpop.permute.xlu1 %1331 }
 0x483   :  { %5701 = vst [vmem:[#allocation82_spill] sm:$0xff] %v3947_v41  ;;  %v1355_v41 = vperm.slane %v3504_v13, 7  ;;  %v1413_v13 = vld.sshfl [vmem:[#allocation1] sm:$0xff pattern:$0x75316420] }
 0x485   :  { %v1367_v3 = vperm.slane %v1355_v41, 3  ;;  %v1421_v41 = vld.sshfl [vmem:[#allocation1 + $0x28] sm:$0xff pattern:$0x75316420] }
 0x48a   :  { %v1372_v59 = vpop.permute.xlu1 %1371 }
 0x48b   :  { %v1376_v29 = vmul.f32 %v1372_v59, %v1365_v48  ;;  %v1375_v8 = vmul.f32 %v1372_v59, %v1364_v63  ;;  %v1374_v53 = vmul.f32 %v1372_v59, %v1363_v54  ;;  %v1379_v35 = vmul.f32 %v1372_v59, %v1368_v50  ;;  %v1415_v54 = vld.sshfl [vmem:[#allocation1 + $0x10] sm:$0xff pattern:$0x75316420] }
 0x48c   :  { %v1378_v15 = vmul.f32 %v1372_v59, %v1367_v3  ;;  %v1377_v48 = vmul.f32 %v1372_v59, %v1366_v60  ;;  %v26_v63 = vlaneseq  ;;  %v5705_v50 = vmov 0  ;;  %v3146_v60 = vld [vmem:[%s5539_s1 + $0x88] sm:$0xf] }
 0x48d   :  { %1390 = vrot.lane.b32.xlu1 %v1376_v29, %s3237_s22  ;;  %1388 = vrot.lane.b32.xlu0 %v1375_v8, %s3237_s22  ;;  %v1414_v29 = vld.sshfl [vmem:[#allocation1 + $0x8] sm:$0xff pattern:$0x75316420]  ;;  %v1420_v8 = vld.sshfl [vmem:[#allocation1 + $0x20] sm:$0xff pattern:$0x75316420] }
 0x48e   :  { %1386 = vrot.lane.b32.xlu2 %v1374_v53, %s3237_s22  ;;  %v3961_v10 = vand.u32 127, %v26_v63 }
 0x490   :  { %v3967_v53 = vadd.s32 128, %v3961_v10  ;;  %v5582_v59 = vand.u32 15, %v3961_v10 }
 0x492   :  { %vm3982_vm7 = vcmp.ge.s32.totalorder %v5582_v59, 1 }
 0x493   :  { %v5706_v50 = vsel %vm3982_vm7, 4294967295, %v5705_v50 }
 0x494   :  { %5707 = vst [vmem:[#allocation84_spill] sm:$0xff] %v5706_v50 }
 0x495   :  { %1396 = vrot.lane.b32.xlu1 %v1379_v35, %s3237_s22  ;;  %1394 = vrot.lane.b32.xlu0 %v1378_v15, %s3237_s22  ;;  %v5581_v15 = vand.u32 15, %v3967_v53  ;;  %v3145_v35 = vld [vmem:[%s5539_s1 + $0x84] sm:$0xf] }
 0x496   :  { %1392 = vrot.lane.b32.xlu2 %v1377_v48, %s3237_s22  ;;  %v102_v48 = vsel %vm3982_vm7, %v3396_v61, 0.0 }
 0x497   :  { %vm3976_vm6 = vcmp.ge.s32.totalorder %v5581_v15, 1 }
 0x498   :  { %v5703_v12 = vsel %vm3976_vm6, 4294967295, %v5702_v12  ;;  %v101_v3 = vsel %vm3976_vm6, %v3374_v44, 0.0  ;;  %v103_v63 = vsel %vm3976_vm6, %v3398_v62, 0.0  ;;  %v3144_v44 = vld [vmem:[%s5539_s1 + $0x80] sm:$0xf] }
 0x499   :  { %5704 = vst [vmem:[#allocation83_spill] sm:$0xff] %v5703_v12  ;;  %v108_v61 = vperm.slane %v103_v63, 0  ;;  %v144_v56 = vperm.slane %v101_v3, 2  ;;  %v146_v25 = vperm.slane %v103_v63, 2 }
 0x49d   :  { %1427 = vrot.lane.b32.xlu1 %v1415_v54, %s3238_s30  ;;  %1425 = vrot.lane.b32.xlu0 %v1414_v29, %s3238_s30  ;;  %v100_v54 = vsel %vm3982_vm7, %v3372_v43, 0.0  ;;  %v106_v29 = vperm.slane %v101_v3, 0 }
 0x49e   :  { %1423 = vrot.lane.b32.xlu2 %v1413_v13, %s3238_s30  ;;  %v125_v13 = vperm.slane %v101_v3, 1  ;;  %v105_v15 = vperm.slane %v100_v54, 0  ;;  %v124_v59 = vperm.slane %v100_v54, 1  ;;  %v162_v5 = vperm.slane %v100_v54, 3 }
 0x49f   :  { %v115_v62 = vmul.f32 %v3358_v31, %v106_v29  ;;  %v145_v29 = vperm.slane %v102_v48, 2 }
 0x4a0   :  { %v134_v34 = vmul.f32 %v3380_v47, %v125_v13  ;;  %v133_v42 = vmul.f32 %v3380_v47, %v124_v59  ;;  %v143_v13 = vperm.slane %v100_v54, 2  ;;  %v459_v54 = vsel %vm457_vm9, %v3686_v49, %v3735_v32 }
 0x4a1   :  { %v300_v32 = vsel %vm236_vm8, %v3678_v36, %v3723_v21 }
 0x4a2   :  { %v138_v30 = vadd.f32 %v134_v34, %v115_v62 }
 0x4a5   :  { %1433 = vrot.lane.b32.xlu1 %v1422_v24, %s3238_s30  ;;  %1431 = vrot.lane.b32.xlu0 %v1421_v41, %s3238_s30  ;;  %v126_v24 = vperm.slane %v102_v48, 1  ;;  %v127_v41 = vperm.slane %v103_v63, 1 }
 0x4a6   :  { %1429 = vrot.lane.b32.xlu2 %v1420_v8, %s3238_s30  ;;  %v107_v8 = vperm.slane %v102_v48, 0 }
 0x4a7   :  { %v135_v28 = vmul.f32 %v3380_v47, %v126_v24  ;;  %v136_v46 = vmul.f32 %v3380_v47, %v127_v41  ;;  %v163_v41 = vperm.slane %v101_v3, 3 }
 0x4a8   :  { %v116_v43 = vmul.f32 %v3358_v31, %v107_v8  ;;  %v164_v8 = vperm.slane %v102_v48, 3 }
 0x4aa   :  { %v139_v24 = vadd.f32 %v135_v28, %v116_v43 }
 0x4ad   :  { %1494 = vperm.xlu1 %3197, %v3146_v60   ;;  %1475 = vperm.xlu0 %3199, %v3145_v35   ;;  %v117_v60 = vmul.f32 %v3358_v31, %v108_v61  ;;  %v114_v35 = vmul.f32 %v3358_v31, %v105_v15  ;;  %v5708_v61 = vld [vmem:[#allocation8_spill] sm:$0xff]  ;;  %v165_v15 = vperm.slane %v103_v63, 3 }
 0x4ae   :  { %1456 = vperm.xlu2 %3198, %v3144_v44   ;;  %v3147_v44 = vld [vmem:[%s5539_s1 + $0x8c] sm:$0xf]  ;;  %v153_v22 = vmul.f32 %v5708_v61, %v144_v56  ;;  %v154_v31 = vmul.f32 %v5708_v61, %v145_v29  ;;  %v155_v47 = vmul.f32 %v5708_v61, %v146_v25  ;;  %v152_v59 = vmul.f32 %v5708_v61, %v143_v13  ;;  %s3241_s1 = smov 8  }
 0x4af   :  { %v140_v51 = vadd.f32 %v136_v46, %v117_v60  ;;  %v137_v16 = vadd.f32 %v133_v42, %v114_v35  ;;  %v5709_v46 = vld [vmem:[#allocation10_spill] sm:$0xff]  ;;  %v238_v56 = vsel %vm236_vm8, %v3619_v20, %v3690_v27  ;;  %v5719_v61 = vld [vmem:[#allocation25_spill] sm:$0xff] }
 0x4b0   :  { %v157_v9 = vadd.f32 %v153_v22, %v138_v30  ;;  %v158_v0 = vadd.f32 %v154_v31, %v139_v24  ;;  %v172_v62 = vmul.f32 %v5709_v46, %v163_v41  ;;  %v173_v3 = vmul.f32 %v5709_v46, %v164_v8  ;;  %v5718_v8 = vld [vmem:[#allocation30_spill] sm:$0xff] }
 0x4b1   :  { %v159_v34 = vadd.f32 %v155_v47, %v140_v51  ;;  %v156_v28 = vadd.f32 %v152_v59, %v137_v16  ;;  %v174_v42 = vmul.f32 %v5709_v46, %v165_v15  ;;  %v171_v25 = vmul.f32 %v5709_v46, %v162_v5  ;;  %v5720_v15 = vld [vmem:[#allocation16_spill] sm:$0xff] }
 0x4b2   :  { %v176_v48 = vadd.f32 %v172_v62, %v157_v9  ;;  %v177_v63 = vadd.f32 %v173_v3, %v158_v0  ;;  %v239_v51 = vsel %vm236_vm8, %v3626_v38, %v3666_v52  ;;  %v237_v22 = vsel %vm236_vm8, %v3706_v23, %v3619_v20  ;;  %v5724_v3 = vld [vmem:[#allocation32_spill] sm:$0xff] }
 0x4b3   :  { %v178_v30 = vadd.f32 %v174_v42, %v159_v34  ;;  %v175_v16 = vadd.f32 %v171_v25, %v156_v28  ;;  %v5710_v5 = vand.u32 15, %v3961_v10  ;;  %v5711_v9 = vmov 0  ;;  %v5721_v34 = vld [vmem:[#allocation26_spill] sm:$0xff]  ;;  %v5722_v28 = vld [vmem:[#allocation17_spill] sm:$0xff] }
 0x4b4   :  { %v246_v27 = vadd.f32 %v238_v56, %v176_v48  ;;  %v460_v38 = vsel %vm457_vm9, %v3639_v4, %v3684_v58  ;;  %v458_v0 = vsel %vm457_vm9, %v3647_v26, %v3686_v49  ;;  %v240_v20 = vsel %vm236_vm8, %v3666_v52, %v3694_v18 }
 0x4b5   :  { %vm4040_vm10 = vcmp.lt.s32.totalorder %v5710_v5, 15  ;;  %v299_v23 = vsel %vm236_vm8, %v3713_v6, %v3600_v1  ;;  %v5714_v10 = vand.u32 15, %v3967_v53  ;;  %v5715_v4 = vmov 0 }
 0x4b6   :  { %1513 = vperm.xlu2 %3198, %v3147_v44   ;;  %v5712_v9 = vsel %vm4040_vm10, 4294967295, %v5711_v9  ;;  %v247_v43 = vadd.f32 %v239_v51, %v177_v63  ;;  %v245_v26 = vadd.f32 %v237_v22, %v175_v16  ;;  %v298_v52 = vsel %vm236_vm8, %v3676_v39, %v3713_v6  ;;  %v4124_v22 = vpop.permute.xlu2 %1268 }
 0x4b7   :  { %5713 = vst [vmem:[#allocation8_spill] sm:$0xff] %v5712_v9  ;;  %vm4061_vm11 = vcmp.lt.s32.totalorder %v5714_v10, 15  ;;  %v361_v1 = vsel %vm236_vm8, %v3731_v45, %v3631_v40  ;;  %v4077_v36 = vsel %vm4040_vm10, %v460_v38, 0.0  ;;  %v461_v18 = vsel %vm457_vm9, %v3684_v58, %v3733_v2  ;;  %v5725_v38 = vld [vmem:[#allocation23_spill] sm:$0xff] }
 0x4b8   :  { %v5716_v4 = vsel %vm4061_vm11, 4294967295, %v5715_v4  ;;  %v4070_v49 = vsel %vm4061_vm11, %v459_v54, 0.0  ;;  %v4084_v53 = vsel %vm4040_vm10, %v458_v0, 0.0  ;;  %v307_v39 = vadd.f32 %v299_v23, %v246_v27  ;;  %v5726_v0 = vld [vmem:[#allocation36_spill] sm:$0xff] }
 0x4b9   :  { %5717 = vst [vmem:[#allocation10_spill] sm:$0xff] %v5716_v4  ;;  %v301_v6 = vsel %vm236_vm8, %v3723_v21, %v3610_v7  ;;  %v308_v60 = vadd.f32 %v300_v32, %v247_v43  ;;  %v248_v35 = vadd.f32 %v240_v20, %v178_v30  ;;  %v306_v45 = vadd.f32 %v298_v52, %v245_v26  ;;  %v5727_v43 = vld [vmem:[#allocation28_spill] sm:$0xff]  ;;  %v5728_v52 = vld [vmem:[#allocation19_spill] sm:$0xff] }
 0x4ba   :  { %v359_v44 = vsel %vm236_vm8, %v3729_v33, %v3629_v19  ;;  %v473_v29 = vperm.slane %v4070_v49, 0  ;;  %v474_v58 = vperm.slane %v4077_v36, 0  ;;  %v4096_v2 = vsel %vm4061_vm11, %v461_v18, 0.0 }
 0x4bb   :  { %v369_v13 = vadd.f32 %v361_v1, %v308_v60  ;;  %v472_v24 = vperm.slane %v4084_v53, 0  ;;  %v360_v7 = vsel %vm236_vm8, %v3629_v19, %v3653_v14  ;;  %v309_v21 = vadd.f32 %v301_v6, %v248_v35  ;;  %v5723_v14 = vld [vmem:[#allocation13_spill] sm:$0xff] }
 0x4bc   :  { %v362_v33 = vsel %vm236_vm8, %v3631_v40, %v3658_v57  ;;  %v368_v41 = vadd.f32 %v360_v7, %v307_v39  ;;  %v421_v31 = vsel %vm236_vm8, %v5719_v61, %v5718_v8  ;;  %v367_v47 = vadd.f32 %v359_v44, %v306_v45  ;;  %v5729_v45 = vld [vmem:[#allocation35_spill] sm:$0xff]  ;;  %v5731_v7 = vld [vmem:[#allocation20_spill] sm:$0xff] }
 0x4bd   :  { %v420_v59 = vsel %vm236_vm8, %v5720_v15, %v5719_v61  ;;  %v422_v46 = vsel %vm236_vm8, %v5722_v28, %v5721_v34  ;;  %v475_v19 = vperm.slane %v4096_v2, 0  ;;  %v482_v62 = vmul.f32 %v5723_v14, %v473_v29  ;;  %v5730_v44 = vld [vmem:[#allocation27_spill] sm:$0xff] }
 0x4be   :  { %v423_v40 = vsel %vm236_vm8, %v5721_v34, %v5724_v3  ;;  %v430_v57 = vadd.f32 %v422_v46, %v369_v13  ;;  %v483_v42 = vmul.f32 %v5723_v14, %v474_v58  ;;  %v481_v56 = vmul.f32 %v5723_v14, %v472_v24 }
 0x4bf   :  { %v429_v25 = vadd.f32 %v421_v31, %v368_v41  ;;  %v370_v48 = vadd.f32 %v362_v33, %v309_v21  ;;  %v493_v63 = vperm.slane %v4077_v36, 1  ;;  %v492_v30 = vperm.slane %v4070_v49, 1 }
 0x4c0   :  { %v428_v51 = vadd.f32 %v420_v59, %v367_v47  ;;  %v491_v16 = vperm.slane %v4084_v53, 1  ;;  %v484_v27 = vmul.f32 %v5723_v14, %v475_v19  ;;  %v581_v20 = vsel %vm579_vm12, %v5726_v0, %v5725_v38  ;;  %v5732_v47 = vld [vmem:[#allocation11_spill] sm:$0xff] }
 0x4c1   :  { %v431_v54 = vadd.f32 %v423_v40, %v370_v48  ;;  %v486_v5 = vadd.f32 %v482_v62, %v429_v25  ;;  %v487_v23 = vadd.f32 %v483_v42, %v430_v57  ;;  %v494_v32 = vperm.slane %v4096_v2, 1  ;;  %v4174_v48 = vpop.permute.xlu2 %1274 }
 0x4c2   :  { %v485_v10 = vadd.f32 %v481_v56, %v428_v51  ;;  %v580_v26 = vsel %vm579_vm12, %v5727_v43, %v5726_v0  ;;  %v502_v1 = vmul.f32 %v5728_v52, %v493_v63  ;;  %v512_v18 = vperm.slane %v4077_v36, 2  ;;  %v5733_v63 = vld [vmem:[#allocation14_spill] sm:$0xff] }
 0x4c3   :  { %v501_v39 = vmul.f32 %v5728_v52, %v492_v30  ;;  %v511_v6 = vperm.slane %v4070_v49, 2  ;;  %v500_v60 = vmul.f32 %v5728_v52, %v491_v16  ;;  %v510_v35 = vperm.slane %v4084_v53, 2  ;;  %v5734_v16 = vld [vmem:[#allocation21_spill] sm:$0xff] }
 0x4c4   :  { %v582_v29 = vsel %vm579_vm12, %v5730_v44, %v5729_v45  ;;  %v4145_v13 = vsel %vm3976_vm6, %v581_v20, 0.0  ;;  %v488_v58 = vadd.f32 %v484_v27, %v431_v54  ;;  %v583_v21 = vsel %vm579_vm12, %v5729_v45, %v5731_v7 }
 0x4c5   :  { %v505_v24 = vadd.f32 %v501_v39, %v486_v5  ;;  %v4152_v33 = vsel %vm3982_vm7, %v580_v26, 0.0  ;;  %v506_v41 = vadd.f32 %v502_v1, %v487_v23  ;;  %v503_v8 = vmul.f32 %v5728_v52, %v494_v32 }
 0x4c6   :  { %v513_v61 = vperm.slane %v4096_v2, 2  ;;  %v504_v31 = vadd.f32 %v500_v60, %v485_v10  ;;  %v520_v15 = vmul.f32 %v5732_v47, %v511_v6  ;;  %v530_v59 = vperm.slane %v4070_v49, 3 }
 0x4c7   :  { %v4160_v34 = vsel %vm3982_vm7, %v582_v29, 0.0  ;;  %v595_v28 = vperm.slane %v4145_v13, 0  ;;  %v519_v46 = vmul.f32 %v5732_v47, %v510_v35  ;;  %v529_v19 = vperm.slane %v4084_v53, 3  ;;  %v5735_v35 = vld [vmem:[#allocation12_spill] sm:$0xff] }
 0x4c8   :  { %v4167_v14 = vsel %vm3976_vm6, %v583_v21, 0.0  ;;  %v594_v62 = vperm.slane %v4152_v33, 0  ;;  %v531_v3 = vperm.slane %v4077_v36, 3  ;;  %v507_v40 = vadd.f32 %v503_v8, %v488_v58 }
 0x4c9   :  { %v524_v49 = vadd.f32 %v520_v15, %v505_v24  ;;  %v521_v57 = vmul.f32 %v5732_v47, %v512_v18  ;;  %v532_v42 = vperm.slane %v4096_v2, 3  ;;  %v523_v56 = vadd.f32 %v519_v46, %v504_v31  ;;  %v4194_v7 = vpop.permute.xlu2 %1327 }
 0x4ca   :  { %v596_v25 = vperm.slane %v4160_v34, 0  ;;  %v522_v53 = vmul.f32 %v5732_v47, %v513_v61  ;;  %v539_v30 = vmul.f32 %v5733_v63, %v530_v59  ;;  %v597_v51 = vperm.slane %v4167_v14, 0 }
 0x4cb   :  { %v604_v54 = vmul.f32 %v5734_v16, %v595_v28  ;;  %v525_v36 = vadd.f32 %v521_v57, %v506_v41  ;;  %v538_v27 = vmul.f32 %v5733_v63, %v529_v19  ;;  %v603_v5 = vmul.f32 %v5734_v16, %v594_v62  ;;  %v5736_v28 = vld [vmem:[#allocation15_spill] sm:$0xff] }
 0x4cc   :  { %v526_v38 = vadd.f32 %v522_v53, %v507_v40  ;;  %v543_v2 = vadd.f32 %v539_v30, %v524_v49  ;;  %v614_v0 = vperm.slane %v4145_v13, 1  ;;  %v540_v20 = vmul.f32 %v5733_v63, %v531_v3  ;;  %v5737_v53 = vld [vmem:[#allocation22_spill] sm:$0xff] }
 0x4cd   :  { %v542_v23 = vadd.f32 %v538_v27, %v523_v56  ;;  %v605_v32 = vmul.f32 %v5734_v16, %v596_v25  ;;  %v613_v10 = vperm.slane %v4152_v33, 1  ;;  %v541_v43 = vmul.f32 %v5733_v63, %v532_v42  ;;  %v5738_v27 = vld [vmem:[#allocation29_spill] sm:$0xff] }
 0x4ce   :  { %v606_v26 = vmul.f32 %v5734_v16, %v597_v51  ;;  %v608_v52 = vadd.f32 %v604_v54, %v543_v2  ;;  %v544_v1 = vadd.f32 %v540_v20, %v525_v36  ;;  %v615_v18 = vperm.slane %v4160_v34, 1  ;;  %v5740_v2 = vld [vmem:[#allocation31_spill] sm:$0xff] }
 0x4cf   :  { %v607_v39 = vadd.f32 %v603_v5, %v542_v23  ;;  %v545_v6 = vadd.f32 %v541_v43, %v526_v38  ;;  %v616_v60 = vperm.slane %v4167_v14, 1  ;;  %v623_v45 = vmul.f32 %v5735_v35, %v614_v0  ;;  %v5739_v5 = vld [vmem:[#allocation18_spill] sm:$0xff]  ;;  %v5741_v0 = vld [vmem:[#allocation24_spill] sm:$0xff]  ;;  %v5742_v43 = vld [vmem:[#allocation37_spill] sm:$0xff] }
 0x4d0   :  { %v633_v44 = vperm.slane %v4145_v13, 2  ;;  %v622_v29 = vmul.f32 %v5735_v35, %v613_v10  ;;  %v632_v58 = vperm.slane %v4152_v33, 2  ;;  %v609_v24 = vadd.f32 %v605_v32, %v544_v1 }
 0x4d1   :  { %v627_v21 = vadd.f32 %v623_v45, %v608_v52  ;;  %v610_v41 = vadd.f32 %v606_v26, %v545_v6  ;;  %v624_v8 = vmul.f32 %v5735_v35, %v615_v18  ;;  %v634_v61 = vperm.slane %v4160_v34, 2  ;;  %v5743_v52 = vld [vmem:[#allocation54_spill] sm:$0xff] }
 0x4d2   :  { %v626_v31 = vadd.f32 %v622_v29, %v607_v39  ;;  %v625_v47 = vmul.f32 %v5735_v35, %v616_v60  ;;  %v635_v15 = vperm.slane %v4167_v14, 2  ;;  %v652_v59 = vperm.slane %v4145_v13, 3  ;;  %v5744_v39 = vld [vmem:[#allocation33_spill] sm:$0xff]  ;;  %v5745_v60 = vld [vmem:[#allocation43_spill] sm:$0xff]  ;;  %v5747_v29 = vld [vmem:[#allocation38_spill] sm:$0xff] }
 0x4d3   :  { %v642_v46 = vmul.f32 %v5736_v28, %v633_v44  ;;  %v651_v19 = vperm.slane %v4152_v33, 3  ;;  %v641_v62 = vmul.f32 %v5736_v28, %v632_v58  ;;  %v628_v3 = vadd.f32 %v624_v8, %v609_v24  ;;  %v5746_v44 = vld [vmem:[#allocation47_spill] sm:$0xff] }
 0x4d4   :  { %v629_v49 = vadd.f32 %v625_v47, %v610_v41  ;;  %v653_v57 = vperm.slane %v4160_v34, 3  ;;  %v643_v56 = vmul.f32 %v5736_v28, %v634_v61  ;;  %v654_v25 = vperm.slane %v4167_v14, 3  ;;  %v4211_v34 = vpop.permute.xlu2 %1333  ;;  %v5748_v58 = vld [vmem:[#allocation67_spill] sm:$0xff]  ;;  %v4251_v47 = vpop.permute.xlu0 %1329 }
 0x4d5   :  { %v646_v40 = vadd.f32 %v642_v46, %v627_v21  ;;  %v645_v42 = vadd.f32 %v641_v62, %v626_v31  ;;  %v661_v63 = vmul.f32 %v5737_v53, %v652_v59  ;;  %v644_v13 = vmul.f32 %v5736_v28, %v635_v15  ;;  %v5749_v24 = vld [vmem:[#allocation55_spill] sm:$0xff]  ;;  %v5750_v31 = vld [vmem:[#allocation44_spill] sm:$0xff]  ;;  %v5751_v59 = vld [vmem:[#allocation34_spill] sm:$0xff] }
 0x4d6   :  { %v660_v30 = vmul.f32 %v5737_v53, %v651_v19  ;;  %v647_v33 = vadd.f32 %v643_v56, %v628_v3  ;;  %v662_v36 = vmul.f32 %v5737_v53, %v653_v57  ;;  %v726_v14 = vsel %vm725_vm13, %v5739_v5, %v5738_v27  ;;  %v5752_v46 = vld [vmem:[#allocation49_spill] sm:$0xff]  ;;  %v5753_v19 = vld [vmem:[#allocation39_spill] sm:$0xff] }
 0x4d7   :  { %v665_v51 = vadd.f32 %v661_v63, %v646_v40  ;;  %v648_v16 = vadd.f32 %v644_v13, %v629_v49  ;;  %v727_v38 = vsel %vm725_vm13, %v5738_v27, %v3741_v37  ;;  %v728_v20 = vsel %vm725_vm13, %v5741_v0, %v5740_v2  ;;  %v5754_v49 = vld [vmem:[#allocation63_spill] sm:$0xff]  ;;  %v5757_v63 = vld [vmem:[#allocation40_spill] sm:$0xff] }
 0x4d8   :  { %v664_v54 = vadd.f32 %v660_v30, %v645_v42  ;;  %v663_v23 = vmul.f32 %v5737_v53, %v654_v25  ;;  %v666_v32 = vadd.f32 %v662_v36, %v647_v33  ;;  %v729_v10 = vsel %vm725_vm13, %v5740_v2, %v3743_v17  ;;  %v5755_v42 = vld [vmem:[#allocation64_spill] sm:$0xff]  ;;  %v5756_v56 = vld [vmem:[#allocation51_spill] sm:$0xff]  ;;  %v5758_v30 = vld [vmem:[#allocation65_spill] sm:$0xff] }
 0x4d9   :  { %v788_v26 = vsel %vm725_vm13, %v5742_v43, %v3826_v55  ;;  %v947_v1 = vsel %vm5590_vm14, %v5743_v52, %v3900_v11  ;;  %v735_v37 = vadd.f32 %v727_v38, %v665_v51  ;;  %v787_v6 = vsel %vm725_vm13, %v5744_v39, %v5742_v43  ;;  %v5759_v33 = vld [vmem:[#allocation52_spill] sm:$0xff] }
 0x4da   :  { %v667_v18 = vadd.f32 %v663_v23, %v648_v16  ;;  %v948_v35 = vsel %vm5590_vm14, %v3900_v11, %v5745_v60  ;;  %v734_v45 = vadd.f32 %v726_v14, %v664_v54  ;;  %v736_v17 = vadd.f32 %v728_v20, %v666_v32  ;;  %v5760_v14 = vld [vmem:[#allocation41_spill] sm:$0xff]  ;;  %v5761_v20 = vld [vmem:[#allocation66_spill] sm:$0xff] }
 0x4db   :  { %v790_v55 = vsel %vm725_vm13, %v5747_v29, %v5746_v44  ;;  %v949_v21 = vsel %vm5590_vm14, %v5749_v24, %v5748_v58  ;;  %v796_v8 = vadd.f32 %v788_v26, %v735_v37  ;;  %v4246_v61 = vsel %vm4040_vm10, %v947_v1, 0.0  ;;  %v5762_v23 = vld [vmem:[#allocation53_spill] sm:$0xff] }
 0x4dc   :  { %v737_v41 = vadd.f32 %v729_v10, %v667_v18  ;;  %v950_v11 = vsel %vm5590_vm14, %v5748_v58, %v5750_v31  ;;  %v795_v15 = vadd.f32 %v787_v6, %v734_v45  ;;  %v789_v28 = vsel %vm725_vm13, %v5751_v59, %v5747_v29  ;;  %v5763_v10 = vld [vmem:[#allocation42_spill] sm:$0xff]  ;;  %v5764_v6 = vld [vmem:[#allocation56_spill] sm:$0xff]  ;;  %v4310_v59 = vpop.permute.xlu0 %1335 }
 0x4dd   :  { %v848_v62 = vsel %vm725_vm13, %v5753_v19, %v5752_v46  ;;  %v4261_v3 = vsel %vm4061_vm11, %v948_v35, 0.0  ;;  %v849_v57 = vsel %vm725_vm13, %v5752_v46, %v5754_v49  ;;  %v851_v25 = vsel %vm725_vm13, %v5756_v56, %v5755_v42 }
 0x4de   :  { %v798_v40 = vadd.f32 %v790_v55, %v737_v41  ;;  %v4271_v53 = vsel %vm4040_vm10, %v949_v21, 0.0  ;;  %v850_v13 = vsel %vm725_vm13, %v5757_v63, %v5756_v56  ;;  %v909_v51 = vsel %vm725_vm13, %v5759_v33, %v5758_v30  ;;  %v5765_v21 = vld [vmem:[#allocation68_spill] sm:$0xff] }
 0x4df   :  { %v961_v16 = vperm.slane %v4246_v61, 0  ;;  %v4282_v54 = vsel %vm4061_vm11, %v950_v11, 0.0  ;;  %v797_v27 = vadd.f32 %v789_v28, %v736_v17  ;;  %v856_v5 = vadd.f32 %v848_v62, %v795_v15  ;;  %v5766_v62 = vld [vmem:[#allocation46_spill] sm:$0xff]  ;;  %v5769_v33 = vld [vmem:[#allocation48_spill] sm:$0xff] }
 0x4e0   :  { %v910_v38 = vsel %vm725_vm13, %v5758_v30, %v5760_v14  ;;  %v962_v2 = vperm.slane %v4261_v3, 0  ;;  %v857_v0 = vadd.f32 %v849_v57, %v796_v8  ;;  %v911_v32 = vsel %vm725_vm13, %v5762_v23, %v5761_v20 }
 0x4e1   :  { %v912_v43 = vsel %vm725_vm13, %v5761_v20, %v5763_v10  ;;  %v963_v26 = vperm.slane %v4271_v53, 0  ;;  %v859_v52 = vadd.f32 %v851_v25, %v798_v40  ;;  %v858_v1 = vadd.f32 %v850_v13, %v797_v27  ;;  %v5767_v40 = vld [vmem:[#allocation69_spill] sm:$0xff]  ;;  %v5768_v25 = vld [vmem:[#allocation58_spill] sm:$0xff] }
 0x4e2   :  { %v917_v37 = vadd.f32 %v909_v51, %v856_v5  ;;  %v964_v18 = vperm.slane %v4282_v54, 0  ;;  %v918_v39 = vadd.f32 %v910_v38, %v857_v0  ;;  %v970_v60 = vmul.f32 %v5764_v6, %v961_v16  ;;  %v5770_v51 = vld [vmem:[#allocation70_spill] sm:$0xff]  ;;  %v5771_v38 = vld [vmem:[#allocation59_spill] sm:$0xff]  ;;  %v5772_v20 = vld [vmem:[#allocation45_spill] sm:$0xff] }
 0x4e3   :  { %v980_v35 = vperm.slane %v4246_v61, 1  ;;  %v919_v45 = vadd.f32 %v911_v32, %v858_v1  ;;  %v920_v17 = vadd.f32 %v912_v43, %v859_v52  ;;  %v971_v44 = vmul.f32 %v5764_v6, %v962_v2 }
 0x4e4   :  { %v981_v29 = vperm.slane %v4261_v3, 1  ;;  %v999_v55 = vperm.slane %v4246_v61, 2  ;;  %v972_v58 = vmul.f32 %v5764_v6, %v963_v26  ;;  %v982_v24 = vperm.slane %v4271_v53, 1 }
 0x4e5   :  { %v989_v41 = vmul.f32 %v5765_v21, %v980_v35  ;;  %v1000_v8 = vperm.slane %v4261_v3, 2  ;;  %v973_v31 = vmul.f32 %v5764_v6, %v964_v18  ;;  %v983_v11 = vperm.slane %v4282_v54, 1 }
 0x4e6   :  { %v990_v15 = vmul.f32 %v5765_v21, %v981_v29  ;;  %v1018_v28 = vperm.slane %v4246_v61, 3  ;;  %v974_v46 = vadd.f32 %v970_v60, %v917_v37  ;;  %v991_v19 = vmul.f32 %v5765_v21, %v982_v24  ;;  %v5773_v29 = vld [vmem:[#allocation57_spill] sm:$0xff] }
 0x4e7   :  { %v1069_v49 = vsel %vm5589_vm15, %v5767_v40, %v5766_v62  ;;  %v1019_v57 = vperm.slane %v4261_v3, 3  ;;  %v975_v42 = vadd.f32 %v971_v44, %v918_v39  ;;  %v992_v56 = vmul.f32 %v5765_v21, %v983_v11  ;;  %v5774_v21 = vld [vmem:[#allocation71_spill] sm:$0xff] }
 0x4e8   :  { %v4284_v36 = vpop.permute.xlu2 %1386  ;;  %v1070_v63 = vsel %vm5589_vm15, %v5766_v62, %v5768_v25  ;;  %v1001_v13 = vperm.slane %v4271_v53, 2  ;;  %v976_v30 = vadd.f32 %v972_v58, %v919_v45  ;;  %v993_v61 = vadd.f32 %v989_v41, %v974_v46 }
 0x4e9   :  { %v1071_v16 = vsel %vm5589_vm15, %v5770_v51, %v5769_v33  ;;  %v977_v5 = vadd.f32 %v973_v31, %v920_v17  ;;  %v994_v14 = vadd.f32 %v990_v15, %v975_v42  ;;  %v4330_v3 = vsel %vm3982_vm7, %v1069_v49, 0.0  ;;  %v5775_v51 = vld [vmem:[#allocation50_spill] sm:$0xff] }
 0x4ea   :  { %v1072_v2 = vsel %vm5589_vm15, %v5769_v33, %v5771_v38  ;;  %v1002_v0 = vperm.slane %v4282_v54, 2  ;;  %v1008_v23 = vmul.f32 %v5772_v20, %v999_v55  ;;  %v995_v32 = vadd.f32 %v991_v19, %v976_v30 }
 0x4eb   :  { %v1078_v10 = vsel %vm3976_vm6, %v1070_v63, 0.0  ;;  %v1020_v43 = vperm.slane %v4271_v53, 3  ;;  %v1009_v26 = vmul.f32 %v5772_v20, %v1000_v8  ;;  %v996_v52 = vadd.f32 %v992_v56, %v977_v5 }
 0x4ec   :  { %v4343_v1 = vsel %vm3982_vm7, %v1071_v16, 0.0  ;;  %v1010_v37 = vmul.f32 %v5772_v20, %v1001_v13  ;;  %v1012_v18 = vadd.f32 %v1008_v23, %v993_v61  ;;  %v1083_v39 = vperm.slane %v4330_v3, 0 }
 0x4ed   :  { %v1080_v6 = vsel %vm3976_vm6, %v1072_v2, 0.0  ;;  %v1021_v60 = vperm.slane %v4282_v54, 3  ;;  %v1011_v35 = vmul.f32 %v5772_v20, %v1002_v0  ;;  %v1013_v53 = vadd.f32 %v1009_v26, %v994_v14 }
 0x4ee   :  { %v1084_v45 = vperm.slane %v1078_v10, 0  ;;  %v1027_v55 = vmul.f32 %v5773_v29, %v1018_v28  ;;  %v1014_v58 = vadd.f32 %v1010_v37, %v995_v32  ;;  %v1085_v24 = vperm.slane %v4343_v1, 0 }
 0x4ef   :  { %v1092_v41 = vmul.f32 %v5774_v21, %v1083_v39  ;;  %v1028_v8 = vmul.f32 %v5773_v29, %v1019_v57  ;;  %v1015_v31 = vadd.f32 %v1011_v35, %v996_v52  ;;  %v1086_v11 = vperm.slane %v1080_v6, 0 }
 0x4f0   :  { %v4326_v27 = vpop.permute.xlu2 %1392  ;;  %v1093_v54 = vmul.f32 %v5774_v21, %v1084_v45  ;;  %v1029_v15 = vmul.f32 %v5773_v29, %v1020_v43  ;;  %v1031_v46 = vadd.f32 %v1027_v55, %v1012_v18  ;;  %v1094_v19 = vmul.f32 %v5774_v21, %v1085_v24  ;;  %v5776_v18 = vld [vmem:[#allocation60_spill] sm:$0xff] }
 0x4f1   :  { %v1030_v62 = vmul.f32 %v5773_v29, %v1021_v60  ;;  %v1032_v40 = vadd.f32 %v1028_v8, %v1013_v53  ;;  %v1095_v28 = vmul.f32 %v5774_v21, %v1086_v11  ;;  %v1102_v49 = vperm.slane %v4330_v3, 1  ;;  %v5777_v55 = vld [vmem:[#allocation72_spill] sm:$0xff] }
 0x4f2   :  { %v1033_v42 = vadd.f32 %v1029_v15, %v1014_v58  ;;  %v1096_v56 = vadd.f32 %v1092_v41, %v1031_v46  ;;  %v1103_v57 = vperm.slane %v1078_v10, 1  ;;  %v1122_v63 = vperm.slane %v1078_v10, 2  ;;  %v5780_v46 = vld [vmem:[#allocation77_spill] sm:$0xff] }
 0x4f3   :  { %v1034_v13 = vadd.f32 %v1030_v62, %v1015_v31  ;;  %v1097_v30 = vadd.f32 %v1093_v54, %v1032_v40  ;;  %v1121_v61 = vperm.slane %v4330_v3, 2  ;;  %v1104_v33 = vperm.slane %v4343_v1, 1 }
 0x4f4   :  { %v1111_v16 = vmul.f32 %v5775_v51, %v1102_v49  ;;  %v1098_v5 = vadd.f32 %v1094_v19, %v1033_v42  ;;  %v1141_v14 = vperm.slane %v1078_v10, 3  ;;  %v1105_v38 = vperm.slane %v1080_v6, 1 }
 0x4f5   :  { %v1112_v2 = vmul.f32 %v5775_v51, %v1103_v57  ;;  %v1099_v0 = vadd.f32 %v1095_v28, %v1034_v13  ;;  %v1124_v32 = vperm.slane %v1080_v6, 2  ;;  %v1123_v43 = vperm.slane %v4343_v1, 2  ;;  %v5782_v13 = vld [vmem:[#allocation62_spill] sm:$0xff] }
 0x4f6   :  { %v1113_v26 = vmul.f32 %v5775_v51, %v1104_v33  ;;  %v1115_v52 = vadd.f32 %v1111_v16, %v1096_v56  ;;  %v1140_v37 = vperm.slane %v4330_v3, 3  ;;  %v1131_v39 = vmul.f32 %v5776_v18, %v1122_v63  ;;  %v5781_v63 = vld [vmem:[#allocation74_spill] sm:$0xff] }
 0x4f7   :  { %v1114_v10 = vmul.f32 %v5775_v51, %v1105_v38  ;;  %v1116_v60 = vadd.f32 %v1112_v2, %v1097_v30  ;;  %v1130_v35 = vmul.f32 %v5776_v18, %v1121_v61  ;;  %v1143_v53 = vperm.slane %v1080_v6, 3  ;;  %v5778_v6 = vld [vmem:[#allocation73_spill] sm:$0xff]  ;;  %v5783_v61 = vld [vmem:[#allocation78_spill] sm:$0xff] }
 0x4f8   :  { %v1424_v25 = vpop.permute.xlu2 %1423  ;;  %v1142_v45 = vperm.slane %v4343_v1, 3  ;;  %v1117_v29 = vadd.f32 %v1113_v26, %v1098_v5  ;;  %v1149_v58 = vmul.f32 %v5777_v55, %v1140_v37  ;;  %v1150_v24 = vmul.f32 %v5777_v55, %v1141_v14  ;;  %v5779_v1 = vld [vmem:[#allocation61_spill] sm:$0xff] }
 0x4f9   :  { %v1118_v21 = vadd.f32 %v1114_v10, %v1099_v0  ;;  %v1132_v41 = vmul.f32 %v5776_v18, %v1123_v43  ;;  %v1134_v3 = vadd.f32 %v1130_v35, %v1115_v52  ;;  %v1133_v8 = vmul.f32 %v5776_v18, %v1124_v32  ;;  %v5784_v0 = vld [vmem:[#allocation79_spill] sm:$0xff]  ;;  %v5786_v52 = vld [vmem:[#allocation80_spill] sm:$0xff] }
 0x4fa   :  { %v1135_v31 = vadd.f32 %v1131_v39, %v1116_v60  ;;  %v1151_v11 = vmul.f32 %v5777_v55, %v1142_v45  ;;  %v1152_v54 = vmul.f32 %v5777_v55, %v1143_v53  ;;  %v1215_v15 = vsel %vm1214_vm1, %v5779_v1, %v5778_v6  ;;  %v5785_v43 = vld [vmem:[#allocation75_spill] sm:$0xff] }
 0x4fb   :  { %v1216_v19 = vsel %vm1214_vm1, %v5778_v6, %v5780_v46  ;;  %v1153_v40 = vadd.f32 %v1149_v58, %v1134_v3  ;;  %v1136_v49 = vadd.f32 %v1132_v41, %v1117_v29  ;;  %v1137_v42 = vadd.f32 %v1133_v8, %v1118_v21  ;;  %v5789_v29 = vld [vmem:[#allocation82_spill] sm:$0xff] }
 0x4fc   :  { %v1154_v28 = vadd.f32 %v1150_v24, %v1135_v31  ;;  %v1217_v30 = vsel %vm1214_vm1, %v5782_v13, %v5781_v63  ;;  %v1218_v33 = vsel %vm1214_vm1, %v5781_v63, %v5783_v61  ;;  %v1277_v32 = vsel %vm1214_vm1, %v5784_v0, %v4124_v22 }
 0x4fd   :  { %v1223_v5 = vadd.f32 %v1215_v15, %v1153_v40  ;;  %v1155_v38 = vadd.f32 %v1151_v11, %v1136_v49  ;;  %v1156_v2 = vadd.f32 %v1152_v54, %v1137_v42  ;;  %v1276_v26 = vsel %vm1214_vm1, %v5785_v43, %v5784_v0 }
 0x4fe   :  { %v1224_v14 = vadd.f32 %v1216_v19, %v1154_v28  ;;  %v1279_v37 = vsel %vm1214_vm1, %v5786_v52, %v4174_v48  ;;  %v1338_v35 = vsel %vm1214_vm1, %v4194_v7, %v4251_v47  ;;  %v5788_v48 = vld [vmem:[#allocation81_spill] sm:$0xff]  ;;  %v1340_v45 = vsel %vm1214_vm1, %v4211_v34, %v4310_v59 }
 0x4ff   :  { %v4351_v17 = vpop.permute.xlu1 %1390  ;;  %v4353_v44 = vpop.permute.xlu0 %1388  ;;  %v1225_v39 = vadd.f32 %v1217_v30, %v1155_v38  ;;  %v1226_v10 = vadd.f32 %v1218_v33, %v1156_v2  ;;  %v1337_v53 = vsel %vm1214_vm1, %v5788_v48, %v4194_v7  ;;  %v1339_v55 = vsel %vm1214_vm1, %v5789_v29, %v4211_v34 }
 0x500   :  { %v1430_v62 = vpop.permute.xlu2 %1429  ;;  %v1285_v58 = vadd.f32 %v1277_v32, %v1224_v14  ;;  %v1284_v24 = vadd.f32 %v1276_v26, %v1223_v5  ;;  %v1398_v59 = vsel %vm1214_vm1, %v4284_v36, %v4353_v44  ;;  %v1399_v34 = vsel %vm1214_vm1, %v4353_v44, %v4351_v17 }
 0x501   :  { %v1287_v21 = vadd.f32 %v1279_v37, %v1226_v10 }
 0x502   :  { %v1346_v8 = vadd.f32 %v1338_v35, %v1285_v58  ;;  %v1345_v31 = vadd.f32 %v1337_v53, %v1284_v24 }
 0x503   :  { %v1348_v11 = vadd.f32 %v1340_v45, %v1287_v21 }
 0x504   :  { %v1406_v42 = vadd.f32 %v1398_v59, %v1345_v31 }
 0x507   :  { %v4369_v20 = vpop.permute.xlu1 %1396  ;;  %v4371_v23 = vpop.permute.xlu0 %1394 }
 0x508   :  { %v1400_v46 = vsel %vm1214_vm1, %v4326_v27, %v4371_v23  ;;  %v1401_v19 = vsel %vm1214_vm1, %v4371_v23, %v4369_v20  ;;  %v1457_v40 = vpop.permute.xlu2 %1456 }
 0x509   :  { %v1409_v63 = vadd.f32 %v1401_v19, %v1348_v11 }
 0x50f   :  { %v1428_v56 = vpop.permute.xlu1 %1427  ;;  %v1426_v57 = vpop.permute.xlu0 %1425 }
 0x510   :  { %v1436_v51 = vsel %vm5588_vm2, %v1424_v25, %v1426_v57  ;;  %v1437_v16 = vsel %vm5588_vm2, %v1426_v57, %v1428_v56  ;;  %v5787_v25 = vld [vmem:[#allocation76_spill] sm:$0xff]  ;;  %v1407_v56 = vadd.f32 %v1399_v34, %v1346_v8  ;;  %v1514_v45 = vpop.permute.xlu2 %1513 }
 0x511   :  { %v1278_v18 = vsel %vm1214_vm1, %v5787_v25, %v5786_v52  ;;  %v4414_v60 = vsel %vm4040_vm10, %v1436_v51, 0.0  ;;  %v4418_v22 = vsel %vm4061_vm11, %v1437_v16, 0.0 }
 0x512   :  { %v1286_v41 = vadd.f32 %v1278_v18, %v1225_v39  ;;  %v1450_v3 = vperm.slane %v4414_v60, 0  ;;  %v1451_v47 = vperm.slane %v4418_v22, 0  ;;  %v1469_v30 = vperm.slane %v4414_v60, 1 }
 0x513   :  { %v1470_v20 = vperm.slane %v4418_v22, 1  ;;  %v1488_v23 = vperm.slane %v4414_v60, 2  ;;  %v1489_v61 = vperm.slane %v4418_v22, 2  ;;  %v1507_v33 = vperm.slane %v4414_v60, 3 }
 0x514   :  { %v1347_v7 = vadd.f32 %v1339_v55, %v1286_v41  ;;  %v1459_v17 = vmul.f32 %v1457_v40, %v1450_v3  ;;  %v1460_v44 = vmul.f32 %v1457_v40, %v1451_v47  ;;  %v1508_v51 = vperm.slane %v4418_v22, 3 }
 0x515   :  { %v1516_v21 = vmul.f32 %v1514_v45, %v1507_v33  ;;  %v3154_v33 = vld [vmem:[%s5542_s4 + $0x1c] sm:$0xf] }
 0x516   :  { %v1408_v57 = vadd.f32 %v1400_v46, %v1347_v7  ;;  %v1463_v16 = vadd.f32 %v1459_v17, %v1406_v42  ;;  %v1464_v5 = vadd.f32 %v1460_v44, %v1407_v56  ;;  %v1517_v41 = vmul.f32 %v1514_v45, %v1508_v51  ;;  %v3150_v51 = vld [vmem:[%s5542_s4 + $0xc] sm:$0xf] }
 0x517   :  { %v1434_v54 = vpop.permute.xlu1 %1433  ;;  %v1432_v6 = vpop.permute.xlu0 %1431 }
 0x518   :  { %v1438_v1 = vsel %vm5588_vm2, %v1430_v62, %v1432_v6  ;;  %v1439_v15 = vsel %vm5588_vm2, %v1432_v6, %v1434_v54 }
 0x519   :  { %v1446_v36 = vsel %vm4040_vm10, %v1438_v1, 0.0  ;;  %v1447_v28 = vsel %vm4061_vm11, %v1439_v15, 0.0 }
 0x51a   :  { %v1452_v62 = vperm.slane %v1446_v36, 0  ;;  %v1453_v49 = vperm.slane %v1447_v28, 0  ;;  %v1471_v14 = vperm.slane %v1446_v36, 1  ;;  %v1472_v38 = vperm.slane %v1447_v28, 1 }
 0x51b   :  { %v1490_v2 = vperm.slane %v1446_v36, 2  ;;  %v1491_v0 = vperm.slane %v1447_v28, 2  ;;  %v1509_v26 = vperm.slane %v1446_v36, 3  ;;  %v1510_v52 = vperm.slane %v1447_v28, 3 }
 0x51c   :  { %v1461_v27 = vmul.f32 %v1457_v40, %v1452_v62  ;;  %v1462_v13 = vmul.f32 %v1457_v40, %v1453_v49 }
 0x51d   :  { %v1518_v3 = vmul.f32 %v1514_v45, %v1509_v26  ;;  %v1519_v47 = vmul.f32 %v1514_v45, %v1510_v52  ;;  %v3161_v26 = vld [vmem:[%s5542_s4 + $0x38] sm:$0xf]  ;;  %v3162_v52 = vld [vmem:[%s5542_s4 + $0x3c] sm:$0xf] }
 0x51e   :  { %v1465_v37 = vadd.f32 %v1461_v27, %v1408_v57  ;;  %v1466_v25 = vadd.f32 %v1462_v13, %v1409_v63  ;;  %v3148_v13 = vld [vmem:[%s5542_s4 + $0x4] sm:$0xf] }
 0x51f   :  { %v1495_v32 = vpop.permute.xlu1 %1494  ;;  %v1476_v43 = vpop.permute.xlu0 %1475 }
 0x520   :  { %v1478_v18 = vmul.f32 %v1476_v43, %v1469_v30  ;;  %v1479_v39 = vmul.f32 %v1476_v43, %v1470_v20  ;;  %v1480_v10 = vmul.f32 %v1476_v43, %v1471_v14  ;;  %v1481_v35 = vmul.f32 %v1476_v43, %v1472_v38  ;;  %v1585_v30 = vld [vmem:[%s5541_s3] sm:$0xf]  ;;  %v3151_v20 = vld [vmem:[%s5542_s4 + $0x10] sm:$0xf]  ;;  %v3153_v14 = vld [vmem:[%s5542_s4 + $0x18] sm:$0xf] }
 0x521   :  { %v1497_v48 = vmul.f32 %v1495_v32, %v1488_v23  ;;  %v1498_v60 = vmul.f32 %v1495_v32, %v1489_v61  ;;  %v1499_v53 = vmul.f32 %v1495_v32, %v1490_v2  ;;  %v1500_v22 = vmul.f32 %v1495_v32, %v1491_v0  ;;  %v1642_v23 = vld [vmem:[%s5542_s4] sm:$0xf]  ;;  %v3149_v61 = vld [vmem:[%s5542_s4 + $0x8] sm:$0xf]  ;;  %v3160_v2 = vld [vmem:[%s5542_s4 + $0x34] sm:$0xf] }
 0x522   :  { %v1482_v29 = vadd.f32 %v1478_v18, %v1463_v16  ;;  %v1483_v55 = vadd.f32 %v1479_v39, %v1464_v5  ;;  %v1484_v58 = vadd.f32 %v1480_v10, %v1465_v37  ;;  %v1485_v24 = vadd.f32 %v1481_v35, %v1466_v25  ;;  %v3152_v16 = vld [vmem:[%s5542_s4 + $0x14] sm:$0xf]  ;;  %v3157_v5 = vld [vmem:[%s5542_s4 + $0x28] sm:$0xf]  ;;  %v3155_v38 = vld [vmem:[%s5542_s4 + $0x20] sm:$0xf] }
 0x523   :  { %v3156_v0 = vld [vmem:[%s5542_s4 + $0x24] sm:$0xf]  ;;  %v3158_v32 = vld [vmem:[%s5542_s4 + $0x2c] sm:$0xf]  ;;  %v3159_v43 = vld [vmem:[%s5542_s4 + $0x30] sm:$0xf] }
 0x524   :  { %v1503_v8 = vadd.f32 %v1499_v53, %v1484_v58  ;;  %v1504_v31 = vadd.f32 %v1500_v22, %v1485_v24  ;;  %v1501_v11 = vadd.f32 %v1497_v48, %v1482_v29  ;;  %v1502_v7 = vadd.f32 %v1498_v60, %v1483_v55  ;;  %v3164_v37 = vld [vmem:[%s5542_s4 + $0x44] sm:$0xf]  ;;  %v3165_v25 = vld [vmem:[%s5542_s4 + $0x48] sm:$0xf]  ;;  %v3167_v18 = vld [vmem:[%s5542_s4 + $0x50] sm:$0xf] }
 0x525   :  { %v3168_v39 = vld [vmem:[%s5542_s4 + $0x54] sm:$0xf]  ;;  %v3170_v10 = vld [vmem:[%s5542_s4 + $0x5c] sm:$0xf]  ;;  %v3171_v35 = vld [vmem:[%s5542_s4 + $0x60] sm:$0xf] }
 0x526   :  { %v4458_v54 = vadd.f32 %v1518_v3, %v1503_v8  ;;  %v4460_v6 = vadd.f32 %v1519_v47, %v1504_v31  ;;  %v4462_v59 = vadd.f32 %v1516_v21, %v1501_v11  ;;  %v4464_v34 = vadd.f32 %v1517_v41, %v1502_v7  ;;  %v3173_v48 = vld [vmem:[%s5542_s4 + $0x68] sm:$0xf]  ;;  %v3174_v60 = vld [vmem:[%s5542_s4 + $0x6c] sm:$0xf]  ;;  %v3176_v53 = vld [vmem:[%s5542_s4 + $0x74] sm:$0xf] }
 0x527   :  { %v3178_v22 = vld [vmem:[%s5542_s4 + $0x7c] sm:$0xf] }
 0x528   :  { %v1530_v1 = vsel %vm1524_vm3, %v4458_v54, 0.0  ;;  %v1531_v15 = vsel %vm1524_vm3, %v4460_v6, 0.0  ;;  %v1525_v46 = vsel %vm1524_vm3, %v4462_v59, 0.0  ;;  %v1526_v19 = vsel %vm1524_vm3, %v4464_v34, 0.0 }
 0x529   :  { %v1532_v40 = vadd.f32 %v1531_v15, %v1530_v1  ;;  %v1527_v36 = vadd.f32 %v1526_v19, %v1525_v46  ;;  %v1538_v28 = vmul.f32 %v4462_v59, %v4462_v59  ;;  %v1539_v17 = vmul.f32 %v4464_v34, %v4464_v34 }
 0x52a   :  { %v1540_v42 = vmul.f32 %v4458_v54, %v4458_v54  ;;  %v1541_v56 = vmul.f32 %v4460_v6, %v4460_v6 }
 0x52b   :  { %1533 = vadd.xlane.f32.xlu1 %v1532_v40  ;;  %1528 = vadd.xlane.f32.xlu0 %v1527_v36  ;;  %v1542_v44 = vsel %vm1524_vm3, %v1538_v28, 0.0  ;;  %v1543_v62 = vsel %vm1524_vm3, %v1539_v17, 0.0  ;;  %v1559_v17 = vld [vmem:[%s5540_s2] sm:$0xf] }
 0x52c   :  { %v1544_v49 = vadd.f32 %v1543_v62, %v1542_v44  ;;  %v1547_v57 = vsel %vm1524_vm3, %v1540_v42, 0.0  ;;  %v1548_v63 = vsel %vm1524_vm3, %v1541_v56, 0.0  ;;  %v3163_v42 = vld [vmem:[%s5542_s4 + $0x40] sm:$0xf]  ;;  %v3166_v56 = vld [vmem:[%s5542_s4 + $0x4c] sm:$0xf] }
 0x52d   :  { %v1549_v27 = vadd.f32 %v1548_v63, %v1547_v57  ;;  %v3169_v57 = vld [vmem:[%s5542_s4 + $0x58] sm:$0xf]  ;;  %v3172_v63 = vld [vmem:[%s5542_s4 + $0x64] sm:$0xf] }
 0x52e   :  { %1545 = vadd.xlane.f32.xlu2 %v1544_v49 }
 0x536   :  { %1550 = vadd.xlane.f32.xlu2 %v1549_v27  ;;  %v3175_v27 = vld [vmem:[%s5542_s4 + $0x70] sm:$0xf] }
 0x53f   :  { %1668 = vperm.xlu0 %3199, %v3148_v13   ;;  %v3177_v13 = vld [vmem:[%s5542_s4 + $0x78] sm:$0xf] }
 0x544   :  { %1588 = vperm.xlu1 %3197, %v1585_v30  }
 0x547   :  { %1747 = vperm.xlu0 %3199, %v3151_v20  }
 0x54c   :  { %1649 = vperm.xlu1 %3197, %v1642_v23  }
 0x54e   :  { %1687 = vperm.xlu2 %3198, %v3149_v61  }
 0x54f   :  { %1930 = vperm.xlu0 %3199, %v3154_v33  }
 0x554   :  { %1706 = vperm.xlu1 %3197, %v3150_v51  }
 0x556   :  { %1808 = vperm.xlu2 %3198, %v3152_v16  }
 0x557   :  { %2052 = vperm.xlu0 %3199, %v3157_v5  }
 0x55c   :  { %1869 = vperm.xlu1 %3197, %v3153_v14  }
 0x55e   :  { %2014 = vperm.xlu2 %3198, %v3155_v38  }
 0x55f   :  { %2154 = vperm.xlu0 %3199, %v3160_v2  }
 0x564   :  { %2033 = vperm.xlu1 %3197, %v3156_v0  }
 0x566   :  { %2071 = vperm.xlu2 %3198, %v3158_v32  }
 0x56c   :  { %2135 = vperm.xlu1 %3197, %v3159_v43  }
 0x56e   :  { %2173 = vperm.xlu2 %3198, %v3161_v26  }
 0x574   :  { %2192 = vperm.xlu1 %3197, %v3162_v52  }
 0x576   :  { %2294 = vperm.xlu2 %3198, %v3164_v37  }
 0x57c   :  { %2355 = vperm.xlu1 %3197, %v3165_v25  }
 0x57e   :  { %2500 = vperm.xlu2 %3198, %v3167_v18  }
 0x584   :  { %2519 = vperm.xlu1 %3197, %v3168_v39  }
 0x586   :  { %2557 = vperm.xlu2 %3198, %v3170_v10  }
 0x58c   :  { %2621 = vperm.xlu1 %3197, %v3171_v35  }
 0x58e   :  { %2659 = vperm.xlu2 %3198, %v3173_v48  }
 0x594   :  { %2678 = vperm.xlu1 %3197, %v3174_v60  }
 0x596   :  { %2780 = vperm.xlu2 %3198, %v3176_v53  }
 0x59e   :  { %2902 = vperm.xlu2 %3198, %v3178_v22   ;;  %v1534_v45 = vpop.xlane.xlu1 %1533  ;;  %v1529_v29 = vpop.xlane.xlu0 %1528 }
 0x59f   :  { %v1536_v58 = vsel %vm1524_vm3, %v1534_v45, 0.0  ;;  %v1535_v24 = vsel %vm1524_vm3, %v1529_v29, 0.0 }
 0x5a0   :  { %v1537_v21 = vadd.f32 %v1536_v58, %v1535_v24 }
 0x5a1   :  { %v1546_v55 = vpop.xlane.xlu2 %1545 }
 0x5a2   :  { %v1555_v41 = vmul.f32 0.001953125, %v1537_v21  ;;  %v1552_v47 = vsel %vm1524_vm3, %v1546_v55, 0.0 }
 0x5a4   :  { %v1557_v7 = vmul.f32 %v1555_v41, %v1555_v41  ;;  %v1572_v16 = vsub.f32 %v4462_v59, %v1555_v41  ;;  %v1573_v5 = vsub.f32 %v4464_v34, %v1555_v41  ;;  %v1574_v14 = vsub.f32 %v4458_v54, %v1555_v41 }
 0x5a5   :  { %v1575_v38 = vsub.f32 %v4460_v6, %v1555_v41 }
 0x5a9   :  { %v1551_v3 = vpop.xlane.xlu2 %1550 }
 0x5aa   :  { %v1553_v8 = vsel %vm1524_vm3, %v1551_v3, 0.0 }
 0x5ab   :  { %v1554_v31 = vadd.f32 %v1553_v8, %v1552_v47 }
 0x5ad   :  { %v1556_v11 = vmul.f32 0.001953125, %v1554_v31 }
 0x5af   :  { %v1558_v1 = vsub.f32 %v1556_v11, %v1557_v7 }
 0x5b1   :  { %v1560_v15 = vadd.f32 1e-05, %v1558_v1  ;;  %v4592_v30 = vpop.permute.xlu0 %1668  ;;  %v4600_v33 = vpop.permute.xlu2 %1687 }
 0x5b3   :  { %3200 = vrsqrt.f32 %v1560_v15  ;;  %vm1567_vm15 = vweird.f32 %v1560_v15 }
 0x5b6   :  { %v1589_v52 = vpop.permute.xlu1 %1588 }
 0x5b9   :  { %v3201_v46 = vpop.eup %3200  ;;  %v4594_v20 = vpop.permute.xlu0 %1747 }
 0x5ba   :  { %v1562_v19 = vmul.f32 %v3201_v46, %v1560_v15  ;;  %vm1568_vm2 = vweird.f32 %v3201_v46  ;;  %v4608_v37 = vpop.permute.xlu2 %1808 }
 0x5bb   :  { %vm1569_vm14 = vmor %vm1567_vm15, %vm1568_vm2 }
 0x5bc   :  { %v1563_v40 = vmul.f32 %v3201_v46, %v1562_v19 }
 0x5be   :  { %v1564_v36 = vmul.f32 0.5, %v1563_v40  ;;  %v4634_v8 = vpop.permute.xlu1 %1649 }
 0x5c0   :  { %v1565_v28 = vsub.f32 1.5, %v1564_v36 }
 0x5c1   :  { %v4596_v23 = vpop.permute.xlu0 %1930 }
 0x5c2   :  { %v1566_v44 = vmul.f32 %v3201_v46, %v1565_v28  ;;  %v4614_v22 = vpop.permute.xlu2 %2014 }
 0x5c3   :  { %5792 = vst [vmem:[#allocation16_spill] sm:$0xff] %v4614_v22 }
 0x5c4   :  { %v1570_v62 = vsel %vm1569_vm14, %v3201_v46, %v1566_v44 }
 0x5c5   :  { %v1571_v49 = vmul.f32 %v1570_v62, %v1559_v17 }
 0x5c6   :  { %v4640_v7 = vpop.permute.xlu1 %1706 }
 0x5c7   :  { %1578 = vperm.xlu0 %3199, %v1571_v49  }
 0x5c9   :  { %v4598_v61 = vpop.permute.xlu0 %2052 }
 0x5ca   :  { %5790 = vst [vmem:[#allocation30_spill] sm:$0xff] %v4598_v61  ;;  %v4616_v45 = vpop.permute.xlu2 %2071 }
 0x5cb   :  { %5793 = vst [vmem:[#allocation26_spill] sm:$0xff] %v4616_v45 }
 0x5ce   :  { %v4648_v36 = vpop.permute.xlu1 %1869 }
 0x5cf   :  { %2233 = vperm.xlu0 %3199, %v3163_v42  }
 0x5d1   :  { %v4602_v51 = vpop.permute.xlu0 %2154 }
 0x5d2   :  { %5791 = vst [vmem:[#allocation25_spill] sm:$0xff] %v4602_v51  ;;  %v4618_v29 = vpop.permute.xlu2 %2173 }
 0x5d3   :  { %5794 = vst [vmem:[#allocation17_spill] sm:$0xff] %v4618_v29 }
 0x5d7   :  { %2416 = vperm.xlu0 %3199, %v3166_v56  }
 0x5da   :  { %v4620_v55 = vpop.permute.xlu2 %2294 }
 0x5df   :  { %2538 = vperm.xlu0 %3199, %v3169_v57  }
 0x5e2   :  { %v4622_v58 = vpop.permute.xlu2 %2500 }
 0x5e3   :  { %5795 = vst [vmem:[#allocation13_spill] sm:$0xff] %v4622_v58 }
 0x5e7   :  { %2640 = vperm.xlu0 %3199, %v3172_v63  }
 0x5ea   :  { %v4624_v24 = vpop.permute.xlu2 %2557 }
 0x5eb   :  { %5796 = vst [vmem:[#allocation32_spill] sm:$0xff] %v4624_v24 }
 0x5ef   :  { %2719 = vperm.xlu0 %3199, %v3175_v27   ;;  %v4660_v27 = vpop.permute.xlu1 %2033 }
 0x5f0   :  { %5802 = vst [vmem:[#allocation35_spill] sm:$0xff] %v4660_v27 }
 0x5f2   :  { %v4628_v41 = vpop.permute.xlu2 %2659 }
 0x5f3   :  { %5797 = vst [vmem:[#allocation23_spill] sm:$0xff] %v4628_v41 }
 0x5f7   :  { %2841 = vperm.xlu0 %3199, %v3177_v13  }
 0x5fa   :  { %v4632_v47 = vpop.permute.xlu2 %2780 }
 0x602   :  { %v4638_v11 = vpop.permute.xlu2 %2902 }
 0x603   :  { %5799 = vst [vmem:[#allocation28_spill] sm:$0xff] %v4638_v11 }
 0x639   :  { %v1579_v2 = vpop.permute.xlu0 %1578 }
 0x63a   :  { %v1581_v0 = vmul.f32 %v1579_v2, %v1572_v16  ;;  %v1582_v32 = vmul.f32 %v1579_v2, %v1573_v5  ;;  %v1583_v43 = vmul.f32 %v1579_v2, %v1574_v14  ;;  %v1584_v26 = vmul.f32 %v1579_v2, %v1575_v38  ;;  %v4670_v2 = vpop.permute.xlu1 %2135 }
 0x63b   :  { %5803 = vst [vmem:[#allocation27_spill] sm:$0xff] %v4670_v2 }
 0x63c   :  { %v1591_v25 = vadd.f32 %v1589_v52, %v1581_v0  ;;  %v1592_v18 = vadd.f32 %v1589_v52, %v1582_v32  ;;  %v1593_v39 = vadd.f32 %v1589_v52, %v1583_v43  ;;  %v1594_v10 = vadd.f32 %v1589_v52, %v1584_v26 }
 0x63e   :  { %v1596_v35 = vmax.f32 %v1592_v18, 0.0  ;;  %v1598_v59 = vmax.f32 %v1594_v10, 0.0  ;;  %v1597_v48 = vmax.f32 %v1593_v39, 0.0  ;;  %v1595_v60 = vmax.f32 %v1591_v25, 0.0 }
 0x640   :  { %v1604_v34 = vrot.slane %v1598_v59, 4  ;;  %v1603_v54 = vrot.slane %v1596_v35, 4 }
 0x641   :  { %v4626_v21 = vpop.permute.xlu0 %2233 }
 0x642   :  { %v1606_v6 = vsel %vm1524_vm3, %v1597_v48, %v1604_v34  ;;  %v1605_v53 = vsel %vm1524_vm3, %v1595_v60, %v1603_v54  ;;  %v4683_v18 = vpop.permute.xlu1 %2192 }
 0x643   :  { %1609 = vrot.lane.b32.xlu0 %v1606_v6, %s3229_s27  ;;  %1607 = vrot.lane.b32.xlu2 %v1605_v53, %s3229_s27  ;;  %5804 = vst [vmem:[#allocation20_spill] sm:$0xff] %v4683_v18 }
 0x649   :  { %v4630_v3 = vpop.permute.xlu0 %2416 }
 0x651   :  { %v4636_v31 = vpop.permute.xlu0 %2538 }
 0x652   :  { %5798 = vst [vmem:[#allocation36_spill] sm:$0xff] %v4636_v31 }
 0x659   :  { %v4642_v1 = vpop.permute.xlu0 %2640 }
 0x65a   :  { %5800 = vst [vmem:[#allocation19_spill] sm:$0xff] %v4642_v1 }
 0x661   :  { %v4650_v28 = vpop.permute.xlu0 %2719 }
 0x669   :  { %v4665_v14 = vpop.permute.xlu0 %2841 }
 0x69d   :  { %v1608_v15 = vpop.permute.xlu2 %1607 }
 0x69e   :  { %v1611_v46 = vrot.slane %v1608_v15, 4 }
 0x6a0   :  { %v1613_v19 = vsel %vm71_vm4, %v1611_v46, %v1608_v15  ;;  %1620 = vst.msk [vmem:[#allocation2 + $0x8] sm:$0xf] %vm57_vm0, %v1611_v46 }
 0x6a1   :  { %1619 = vst.msk [vmem:[#allocation2] sm:$0xff] %vm3346_vm5, %v1613_v19 }
 0x6a7   :  { %v4652_v17 = vld [vmem:[#allocation2 + $0x8] sm:$0xf] }
 0x6a8   :  { %v4654_v44 = vld [vmem:[#allocation2] sm:$0xff]  ;;  %v1851_v62 = vperm.slane %v4652_v17, 2  ;;  %v1790_v49 = vperm.slane %v4652_v17, 1  ;;  %v1729_v42 = vperm.slane %v4652_v17, 0  ;;  %v4680_v25 = vld [vmem:[#allocation2 + $0x8] sm:$0xf] }
 0x6a9   :  { %1627 = vst [vmem:[#allocation1] ss:$2 sm:$0xff] %v4654_v44  ;;  %v2337_v54 = vperm.slane %v4680_v25, 2  ;;  %v2276_v6 = vperm.slane %v4680_v25, 1  ;;  %v1849_v19 = vperm.slane %v4654_v44, 2  ;;  %v1912_v40 = vperm.slane %v4652_v17, 3 }
 0x6aa   :  { %v1863_v56 = vperm.slane %v1851_v62, 2  ;;  %v1802_v57 = vperm.slane %v1790_v49, 1  ;;  %v1741_v63 = vperm.slane %v1729_v42, 0 }
 0x6ab   :  { %v2349_v62 = vperm.slane %v2337_v54, 2  ;;  %v2288_v49 = vperm.slane %v2276_v6, 1  ;;  %v4699_v42 = vperm.slane %v1849_v19, 2 }
 0x6ac   :  { %v1874_v13 = vmul.f32 %v4648_v36, %v1863_v56  ;;  %v1813_v16 = vmul.f32 %v4608_v37, %v1802_v57  ;;  %v1752_v5 = vmul.f32 %v4594_v20, %v1741_v63  ;;  %v1924_v56 = vperm.slane %v1912_v40, 3 }
 0x6ad   :  { %v1728_v40 = vperm.slane %v4654_v44, 4 }
 0x6ae   :  { %1888 = vrot.lane.b32.xlu1 %v1874_v13, %s3231_s12  ;;  %1827 = vrot.lane.b32.xlu2 %v1813_v16, %s3231_s12  ;;  %v4705_v13 = vpop.permute.xlu1 %2355 }
 0x6af   :  { %1766 = vrot.lane.b32.xlu0 %v1752_v5, %s3231_s12  ;;  %v2360_v5 = vmul.f32 %v4705_v13, %v2349_v62 }
 0x6b0   :  { %v4676_v43 = vld.sshfl [vmem:[#allocation1] sm:$0xff pattern:$0x75316420]  ;;  %v4678_v26 = vld.sshfl [vmem:[#allocation1 + $0x8] sm:$0xff pattern:$0x75316420] }
 0x6b1   :  { %1969 = vst [vmem:[#allocation1] ss:$2 sm:$0xff] %v4654_v44 }
 0x6b5   :  { %v1610_v38 = vpop.permute.xlu0 %1609 }
 0x6b6   :  { %v1612_v0 = vrot.slane %v1610_v38, 4 }
 0x6b8   :  { %v1614_v32 = vsel %vm71_vm4, %v1612_v0, %v1610_v38  ;;  %1622 = vst.msk [vmem:[#allocation2 + $0x14] sm:$0xf] %vm57_vm0, %v1612_v0  ;;  %v4703_v63 = vld.sshfl [vmem:[#allocation1] sm:$0xff pattern:$0x75316420]  ;;  %v2299_v38 = vmul.f32 %v4620_v55, %v2288_v49  ;;  %vm5878_vm0 = vcmask 900096  }
 0x6b9   :  { %1621 = vst.msk [vmem:[#allocation2 + $0xc] sm:$0xff] %vm3346_vm5, %v1614_v32  ;;  %v4707_v16 = vld.sshfl [vmem:[#allocation1 + $0x8] sm:$0xff pattern:$0x75316420]  ;;  %vm5879_vm4 = vmmov %vm5878_vm0 }
 0x6ba   :  { %2090 = vst [vmem:[#allocation1] ss:$2 sm:$0xff] %v4654_v44  ;;  %vm5885_vm5 = vmmov %vm5878_vm0 }
 0x6bf   :  { %v1720_v52 = vld [vmem:[#allocation2 + $0x14] sm:$0xf] }
 0x6c0   :  { %v4685_v39 = vld [vmem:[#allocation2 + $0xc] sm:$0xff]  ;;  %v1854_v10 = vperm.slane %v1720_v52, 2  ;;  %1978 = vst [vmem:[#allocation1 + $0x30] ss:$2 sm:$0xff] %v1720_v52  ;;  %v1793_v35 = vperm.slane %v1720_v52, 1  ;;  %v1732_v59 = vperm.slane %v1720_v52, 0 }
 0x6c1   :  { %1631 = vst [vmem:[#allocation1 + $0x10] ss:$2 sm:$0xff] %v4685_v39  ;;  %v4701_v57 = vld [vmem:[#allocation2 + $0x14] sm:$0xf]  ;;  %v1730_v61 = vperm.slane %v4685_v39, 0 }
 0x6c2   :  { %v1866_v48 = vperm.slane %v1854_v10, 2  ;;  %v1805_v34 = vperm.slane %v1793_v35, 1  ;;  %v1744_v60 = vperm.slane %v1732_v59, 0  ;;  %1976 = vst [vmem:[#allocation1 + $0x20] ss:$2 sm:$0xff] %v4685_v39  ;;  %v2340_v0 = vperm.slane %v4701_v57, 2 }
 0x6c3   :  { %v2279_v32 = vperm.slane %v4701_v57, 1  ;;  %v4716_v10 = vmul.f32 %v4665_v14, %v4699_v42  ;;  %v1935_v35 = vmul.f32 %v4596_v23, %v1924_v56  ;;  %v1915_v59 = vperm.slane %v1720_v52, 3  ;;  %v4724_v6 = vld.sshfl [vmem:[#allocation1] sm:$0xff pattern:$0x75316420] }
 0x6c4   :  { %v1877_v53 = vmul.f32 %v4648_v36, %v1866_v48  ;;  %v1816_v15 = vmul.f32 %v4608_v37, %v1805_v34  ;;  %v1755_v46 = vmul.f32 %v4594_v20, %v1744_v60  ;;  %v2352_v48 = vperm.slane %v2340_v0, 2  ;;  %v4722_v60 = vld [vmem:[#allocation2 + $0x8] sm:$0xf]  ;;  %v2085_v49 = vld [vmem:[#allocation2 + $0x14] sm:$0xf] }
 0x6c5   :  { %v2291_v34 = vperm.slane %v2279_v32, 1  ;;  %5805 = vst [vmem:[#allocation11_spill] sm:$0xff] %v4722_v60  ;;  %v1927_v54 = vperm.slane %v1915_v59, 3  ;;  %v1852_v0 = vperm.slane %v4685_v39, 2  ;;  %v2218_v31 = vperm.slane %v4701_v57, 0 }
 0x6c6   :  { %1894 = vrot.lane.b32.xlu1 %v1877_v53, %s3231_s12  ;;  %1833 = vrot.lane.b32.xlu2 %v1816_v15, %s3231_s12  ;;  %v4726_v53 = vld.sshfl [vmem:[#allocation1 + $0x8] sm:$0xff pattern:$0x75316420]  ;;  %v2762_v15 = vperm.slane %v4722_v60, 1  ;;  %v2363_v52 = vmul.f32 %v4705_v13, %v2352_v48  ;;  %v4750_v48 = vperm.slane %v1728_v40, 0 }
 0x6c7   :  { %1772 = vrot.lane.b32.xlu0 %v1755_v46, %s3231_s12  ;;  %5806 = vst [vmem:[#allocation14_spill] sm:$0xff] %v4726_v53  ;;  %v2215_v46 = vperm.slane %v4680_v25, 0  ;;  %v2302_v19 = vmul.f32 %v4620_v55, %v2291_v34  ;;  %v4734_v62 = vld.sshfl [vmem:[#allocation1 + $0x30] sm:$0xff pattern:$0x75316420]  ;;  %v1938_v56 = vmul.f32 %v4596_v23, %v1927_v54  ;;  %v4759_v41 = vperm.slane %v1852_v0, 2 }
 0x6c8   :  { %2455 = vst [vmem:[#allocation1] ss:$2 sm:$0xff] %v4654_v44  ;;  %v4743_v32 = vld.sshfl [vmem:[#allocation1 + $0x18] sm:$0xff pattern:$0x75316420]  ;;  %v2774_v34 = vperm.slane %v2762_v15, 1  ;;  %v1751_v15 = vmul.f32 %v4594_v20, %v4750_v48 }
 0x6c9   :  { %2099 = vst [vmem:[#allocation1 + $0x30] ss:$2 sm:$0xff] %v2085_v49  ;;  %v4748_v59 = vld.sshfl [vmem:[#allocation1 + $0x20] sm:$0xff pattern:$0x75316420]  ;;  %v2230_v2 = vperm.slane %v2218_v31, 0 }
 0x6ca   :  { %v4752_v54 = vld.sshfl [vmem:[#allocation1 + $0x28] sm:$0xff pattern:$0x75316420] }
 0x6cb   :  { %2097 = vst [vmem:[#allocation1 + $0x20] ss:$2 sm:$0xff] %v4685_v39  ;;  %v2241_v22 = vmul.f32 %v4626_v21, %v2230_v2 }
 0x6ce   :  { %2374 = vrot.lane.b32.xlu1 %v2360_v5, %s3232_s0  ;;  %2313 = vrot.lane.b32.xlu2 %v2299_v38, %s3232_s0  ;;  %v1850_v5 = vperm.slane %v4654_v44, 6  ;;  %v4738_v38 = vld.sshfl [vmem:[#allocation1 + $0x10] sm:$0xff pattern:$0x75316420] }
 0x6cf   :  { %1949 = vrot.lane.b32.xlu0 %v1935_v35, %s3231_s12  ;;  %v1853_v35 = vperm.slane %v4685_v39, 6  ;;  %1971 = vst [vmem:[#allocation1 + $0x10] ss:$2 sm:$0xff] %v4652_v17  ;;  %v4763_v17 = vld [vmem:[#allocation2 + $0x14] sm:$0xf] }
 0x6d0   :  { %v4754_v49 = vperm.slane %v1850_v5, 2  ;;  %5807 = vst [vmem:[#allocation21_spill] sm:$0xff] %v4763_v17  ;;  %v4765_v40 = vld.sshfl [vmem:[#allocation1] sm:$0xff pattern:$0x75316420]  ;;  %v2826_v58 = vperm.slane %v4763_v17, 2 }
 0x6d1   :  { %v4761_v1 = vperm.slane %v1853_v35, 2  ;;  %5808 = vst [vmem:[#allocation12_spill] sm:$0xff] %v4765_v40  ;;  %v4770_v5 = vld.sshfl [vmem:[#allocation1 + $0x8] sm:$0xff pattern:$0x75316420] }
 0x6d2   :  { %5809 = vst [vmem:[#allocation15_spill] sm:$0xff] %v4770_v5  ;;  %v4776_v0 = vmul.f32 %v4665_v14, %v4754_v49  ;;  %v2083_v35 = vld [vmem:[#allocation2 + $0x8] sm:$0xf]  ;;  %v4800_v45 = vld.sshfl [vmem:[#allocation1 + $0x28] sm:$0xff pattern:$0x75316420] }
 0x6d3   :  { %2576 = vst [vmem:[#allocation1] ss:$2 sm:$0xff] %v4654_v44  ;;  %v4791_v29 = vld.sshfl [vmem:[#allocation1 + $0x30] sm:$0xff pattern:$0x75316420]  ;;  %v4795_v51 = vmul.f32 %v4665_v14, %v4761_v1 }
 0x6d4   :  { %2464 = vst [vmem:[#allocation1 + $0x30] ss:$2 sm:$0xff] %v4701_v57 }
 0x6d5   :  { %5811 = vst [vmem:[#allocation29_spill] sm:$0xff] %v4795_v51  ;;  %v2571_v51 = vld [vmem:[#allocation2 + $0x14] sm:$0xf] }
 0x6d6   :  { %2380 = vrot.lane.b32.xlu1 %v2363_v52, %s3232_s0  ;;  %2319 = vrot.lane.b32.xlu2 %v2302_v19, %s3232_s0  ;;  %v2227_v52 = vperm.slane %v2215_v46, 0  ;;  %v1727_v19 = vperm.slane %v4654_v44, 0  ;;  %v2785_v46 = vmul.f32 %v4632_v47, %v2774_v34  ;;  %v4783_v34 = vmul.f32 %v4665_v14, %v4759_v41 }
 0x6d7   :  { %1955 = vrot.lane.b32.xlu0 %v1938_v56, %s3231_s12  ;;  %v1731_v56 = vperm.slane %v4685_v39, 4 }
 0x6d8   :  { %v2238_v24 = vmul.f32 %v4626_v21, %v2227_v52  ;;  %5810 = vst [vmem:[#allocation22_spill] sm:$0xff] %v4783_v34  ;;  %v4787_v52 = vperm.slane %v1727_v19, 0  ;;  %v2569_v34 = vld [vmem:[#allocation2 + $0x8] sm:$0xf] }
 0x6d9   :  { %v4789_v18 = vperm.slane %v1731_v56, 0  ;;  %v1788_v56 = vperm.slane %v4654_v44, 1 }
 0x6da   :  { %v1750_v27 = vmul.f32 %v4594_v20, %v4787_v52  ;;  %v4814_v31 = vld.sshfl [vmem:[#allocation1 + $0x8] sm:$0xff pattern:$0x75316420] }
 0x6db   :  { %5813 = vst [vmem:[#allocation31_spill] sm:$0xff] %v4814_v31  ;;  %v4824_v4 = vperm.slane %v1788_v56, 1  ;;  %v4826_v9 = vld.sshfl [vmem:[#allocation1 + $0x30] sm:$0xff pattern:$0x75316420] }
 0x6dc   :  { %2585 = vst [vmem:[#allocation1 + $0x30] ss:$2 sm:$0xff] %v2571_v51  ;;  %v5818_v31 = vld [vmem:[#allocation6_spill] sm:$0xff] }
 0x6de   :  { %1764 = vrot.lane.b32.xlu1 %v1751_v15, %s3231_s12  ;;  %2799 = vrot.lane.b32.xlu2 %v2785_v46, %s3237_s22  ;;  %v4798_v15 = vld.sshfl [vmem:[#allocation1 + $0x10] sm:$0xff pattern:$0x75316420]  ;;  %v2838_v46 = vperm.slane %v2826_v58, 2  ;;  %v1754_v58 = vmul.f32 %v4594_v20, %v4789_v18 }
 0x6df   :  { %2252 = vrot.lane.b32.xlu0 %v2238_v24, %s3232_s0  ;;  %2092 = vst [vmem:[#allocation1 + $0x10] ss:$2 sm:$0xff] %v2083_v35  ;;  %v4802_v24 = vld.sshfl [vmem:[#allocation1 + $0x20] sm:$0xff pattern:$0x75316420] }
 0x6e0   :  { %v4805_v19 = vmul.f32 %v4665_v14, %v2838_v46  ;;  %2462 = vst [vmem:[#allocation1 + $0x20] ss:$2 sm:$0xff] %v4685_v39  ;;  %v4816_v35 = vld.sshfl [vmem:[#allocation1] sm:$0xff pattern:$0x75316420]  ;;  %v2398_v46 = vperm.slane %v4680_v25, 3 }
 0x6e1   :  { %5814 = vst [vmem:[#allocation24_spill] sm:$0xff] %v4816_v35 }
 0x6e2   :  { %5812 = vst [vmem:[#allocation18_spill] sm:$0xff] %v4805_v19  ;;  %v4828_v19 = vperm.slane %v1730_v61, 0  ;;  %v2410_v2 = vperm.slane %v2398_v46, 3  ;;  %v2401_v46 = vperm.slane %v4701_v57, 3 }
 0x6e3   :  { %2941 = vst [vmem:[#allocation1] ss:$2 sm:$0xff] %v4654_v44  ;;  %v4853_v5 = vld.sshfl [vmem:[#allocation1 + $0x30] sm:$0xff pattern:$0x75316420] }
 0x6e4   :  { %v1753_v61 = vmul.f32 %v4594_v20, %v4828_v19  ;;  %2950 = vst [vmem:[#allocation1 + $0x30] ss:$2 sm:$0xff] %v4763_v17 }
 0x6e6   :  { %1762 = vrot.lane.b32.xlu2 %v1750_v27, %s3231_s12  ;;  %1770 = vrot.lane.b32.xlu1 %v1754_v58, %s3231_s12  ;;  %v4830_v35 = vld.sshfl [vmem:[#allocation1 + $0x10] sm:$0xff pattern:$0x75316420]  ;;  %v1791_v58 = vperm.slane %v4685_v39, 1 }
 0x6e7   :  { %2258 = vrot.lane.b32.xlu0 %v2241_v22, %s3232_s0  ;;  %2457 = vst [vmem:[#allocation1 + $0x10] ss:$2 sm:$0xff] %v4680_v25  ;;  %v4833_v11 = vld.sshfl [vmem:[#allocation1 + $0x20] sm:$0xff pattern:$0x75316420]  ;;  %v1811_v22 = vmul.f32 %v4608_v37, %v4824_v4  ;;  %v2421_v25 = vmul.f32 %v4630_v3, %v2410_v2  ;;  %v2413_v2 = vperm.slane %v2401_v46, 3 }
 0x6e8   :  { %v4835_v27 = vld.sshfl [vmem:[#allocation1 + $0x28] sm:$0xff pattern:$0x75316420]  ;;  %v4855_v20 = vperm.slane %v1791_v58, 1  ;;  %v1911_v58 = vperm.slane %v4654_v44, 7 }
 0x6e9   :  { %5815 = vst [vmem:[#allocation37_spill] sm:$0xff] %v4835_v27  ;;  %v5826_v27 = vld [vmem:[#allocation7_spill] sm:$0xff] }
 0x6ea   :  { %2583 = vst [vmem:[#allocation1 + $0x20] ss:$2 sm:$0xff] %v4685_v39  ;;  %v4843_v56 = vld.sshfl [vmem:[#allocation1 + $0x8] sm:$0xff pattern:$0x75316420] }
 0x6eb   :  { %5816 = vst [vmem:[#allocation54_spill] sm:$0xff] %v4843_v56  ;;  %v4845_v51 = vld.sshfl [vmem:[#allocation1] sm:$0xff pattern:$0x75316420]  ;;  %v2701_v56 = vperm.slane %v4722_v60, 0 }
 0x6ec   :  { %5817 = vst [vmem:[#allocation33_spill] sm:$0xff] %v4845_v51 }
 0x6ed   :  { %3064 = vst [vmem:[#allocation1] ss:$2 sm:$0xff] %v5818_v31 }
 0x6ee   :  { %1823 = vrot.lane.b32.xlu1 %v1811_v22, %s3231_s12  ;;  %1768 = vrot.lane.b32.xlu2 %v1753_v61, %s3231_s12  ;;  %v4858_v51 = vld.sshfl [vmem:[#allocation1 + $0x10] sm:$0xff pattern:$0x75316420]  ;;  %v1814_v22 = vmul.f32 %v4608_v37, %v4855_v20  ;;  %v1873_v61 = vmul.f32 %v4648_v36, %v4754_v49 }
 0x6ef   :  { %2435 = vrot.lane.b32.xlu0 %v2421_v25, %s3232_s0  ;;  %5819 = vst [vmem:[#allocation43_spill] sm:$0xff] %v4858_v51  ;;  %v2424_v25 = vmul.f32 %v4630_v3, %v2413_v2  ;;  %v1876_v2 = vmul.f32 %v4648_v36, %v4761_v1  ;;  %v1914_v51 = vperm.slane %v4685_v39, 7 }
 0x6f0   :  { %2578 = vst [vmem:[#allocation1 + $0x10] ss:$2 sm:$0xff] %v2569_v34  ;;  %v4875_v34 = vperm.slane %v1911_v58, 3  ;;  %v2704_v58 = vperm.slane %v4763_v17, 0 }
 0x6f1   :  { %v4860_v57 = vld.sshfl [vmem:[#allocation1 + $0x28] sm:$0xff pattern:$0x75316420]  ;;  %v4862_v31 = vld.sshfl [vmem:[#allocation1 + $0x20] sm:$0xff pattern:$0x75316420] }
 0x6f2   :  { %5820 = vst [vmem:[#allocation47_spill] sm:$0xff] %v4860_v57  ;;  %v1934_v57 = vmul.f32 %v4596_v23, %v4875_v34 }
 0x6f3   :  { %5821 = vst [vmem:[#allocation38_spill] sm:$0xff] %v4862_v31  ;;  %v2713_v31 = vperm.slane %v2701_v56, 0  ;;  %v4891_v56 = vperm.slane %v1914_v51, 3  ;;  %v2765_v51 = vperm.slane %v4763_v17, 1 }
 0x6f4   :  { %2948 = vst [vmem:[#allocation1 + $0x20] ss:$2 sm:$0xff] %v4685_v39 }
 0x6f5   :  { %5822 = vst [vmem:[#allocation67_spill] sm:$0xff] %v4875_v34 }
 0x6f6   :  { %1829 = vrot.lane.b32.xlu1 %v1814_v22, %s3231_s12  ;;  %1886 = vrot.lane.b32.xlu2 %v1873_v61, %s3231_s12  ;;  %v1910_v22 = vperm.slane %v4654_v44, 3  ;;  %v2724_v61 = vmul.f32 %v4650_v28, %v2713_v31  ;;  %5824 = vst [vmem:[#allocation44_spill] sm:$0xff] %v4891_v56  ;;  %v1937_v31 = vmul.f32 %v4596_v23, %v4891_v56 }
 0x6f7   :  { %2441 = vrot.lane.b32.xlu0 %v2424_v25, %s3232_s0  ;;  %v4877_v46 = vld.sshfl [vmem:[#allocation1 + $0x10] sm:$0xff pattern:$0x75316420] }
 0x6f8   :  { %5823 = vst [vmem:[#allocation55_spill] sm:$0xff] %v4877_v46  ;;  %v4893_v25 = vperm.slane %v1910_v22, 3  ;;  %v2716_v46 = vperm.slane %v2704_v58, 0 }
 0x6f9   :  { %2943 = vst [vmem:[#allocation1 + $0x10] ss:$2 sm:$0xff] %v4722_v60 }
 0x6fa   :  { %v1933_v53 = vmul.f32 %v4596_v23, %v4893_v25 }
 0x6fe   :  { %1947 = vrot.lane.b32.xlu1 %v1934_v57, %s3231_s12  ;;  %1892 = vrot.lane.b32.xlu2 %v1876_v2, %s3231_s12  ;;  %v1913_v57 = vperm.slane %v4685_v39, 3  ;;  %v2727_v2 = vmul.f32 %v4650_v28, %v2716_v46  ;;  %v2823_v46 = vperm.slane %v4722_v60, 2 }
 0x6ff   :  { %2738 = vrot.lane.b32.xlu0 %v2724_v61, %s3237_s22  ;;  %v2237_v61 = vmul.f32 %v4626_v21, %v4750_v48 }
 0x700   :  { %v4895_v40 = vld.sshfl [vmem:[#allocation1 + $0x10] sm:$0xff pattern:$0x75316420]  ;;  %v4908_v22 = vperm.slane %v1913_v57, 3  ;;  %v2240_v57 = vmul.f32 %v4626_v21, %v4789_v18 }
 0x701   :  { %5825 = vst [vmem:[#allocation34_spill] sm:$0xff] %v4895_v40 }
 0x702   :  { %3068 = vst [vmem:[#allocation1 + $0x10] ss:$2 sm:$0xff] %v5826_v27  ;;  %v2777_v27 = vperm.slane %v2765_v51, 1  ;;  %v1936_v58 = vmul.f32 %v4596_v23, %v4908_v22  ;;  %v1789_v51 = vperm.slane %v4654_v44, 5  ;;  %v1792_v44 = vperm.slane %v4685_v39, 5 }
 0x703   :  { %5827 = vst [vmem:[#allocation49_spill] sm:$0xff] %v4908_v22 }
 0x704   :  { %v2788_v40 = vmul.f32 %v4632_v47, %v2777_v27  ;;  %v4932_v27 = vperm.slane %v1789_v51, 1 }
 0x706   :  { %1953 = vrot.lane.b32.xlu1 %v1937_v31, %s3231_s12  ;;  %1945 = vrot.lane.b32.xlu2 %v1933_v53, %s3231_s12  ;;  %v2835_v53 = vperm.slane %v2823_v46, 2  ;;  %v4919_v31 = vpop.permute.xlu1 %2519 }
 0x707   :  { %2744 = vrot.lane.b32.xlu0 %v2727_v2, %s3237_s22  ;;  %5828 = vst [vmem:[#allocation39_spill] sm:$0xff] %v4919_v31  ;;  %v2236_v2 = vmul.f32 %v4626_v21, %v4787_v52 }
 0x708   :  { %v2846_v23 = vmul.f32 %v4665_v14, %v2835_v53  ;;  %v1812_v14 = vmul.f32 %v4608_v37, %v4932_v27 }
 0x70e   :  { %2250 = vrot.lane.b32.xlu1 %v2237_v61, %s3232_s0  ;;  %1951 = vrot.lane.b32.xlu2 %v1936_v58, %s3231_s12  ;;  %v2297_v61 = vmul.f32 %v4620_v55, %v4824_v4  ;;  %v2239_v58 = vmul.f32 %v4626_v21, %v4828_v19  ;;  %v4941_v46 = vpop.permute.xlu1 %2621  ;;  %v2300_v21 = vmul.f32 %v4620_v55, %v4855_v20 }
 0x70f   :  { %2805 = vrot.lane.b32.xlu0 %v2788_v40, %s3237_s22  ;;  %v4930_v40 = vpop.permute.xlu2 %1827  ;;  %5829 = vst [vmem:[#allocation63_spill] sm:$0xff] %v4941_v46 }
 0x716   :  { %2256 = vrot.lane.b32.xlu1 %v2240_v57, %s3232_s0  ;;  %2248 = vrot.lane.b32.xlu2 %v2236_v2, %s3232_s0  ;;  %v4948_v57 = vperm.slane %v1792_v44, 1  ;;  %v2359_v2 = vmul.f32 %v4705_v13, %v4754_v49  ;;  %v1872_v49 = vmul.f32 %v4648_v36, %v4699_v42 }
 0x717   :  { %2860 = vrot.lane.b32.xlu0 %v2846_v23, %s3237_s22  ;;  %v4959_v23 = vpop.permute.xlu1 %2678 }
 0x718   :  { %v1815_v39 = vmul.f32 %v4608_v37, %v4948_v57  ;;  %5830 = vst [vmem:[#allocation64_spill] sm:$0xff] %v4959_v23  ;;  %v2422_v23 = vmul.f32 %v4630_v3, %v4908_v22 }
 0x71e   :  { %2309 = vrot.lane.b32.xlu1 %v2297_v61, %s3232_s0  ;;  %2254 = vrot.lane.b32.xlu2 %v2239_v58, %s3232_s0  ;;  %v2420_v61 = vmul.f32 %v4630_v3, %v4875_v34  ;;  %v2362_v58 = vmul.f32 %v4705_v13, %v4761_v1  ;;  %v2419_v1 = vmul.f32 %v4630_v3, %v4893_v25 }
 0x71f   :  { %1825 = vrot.lane.b32.xlu0 %v1812_v14, %s3231_s12 }
 0x720   :  { %v4946_v53 = vpop.permute.xlu2 %1833  ;;  %v4972_v37 = vpop.permute.xlu1 %1888 }
 0x721   :  { %v4976_v44 = vpop.permute.xlu0 %1766 }
 0x726   :  { %2315 = vrot.lane.b32.xlu1 %v2300_v21, %s3232_s0  ;;  %2372 = vrot.lane.b32.xlu2 %v2359_v2, %s3232_s0  ;;  %v2423_v21 = vmul.f32 %v4630_v3, %v4891_v56  ;;  %v1875_v2 = vmul.f32 %v4648_v36, %v4759_v41  ;;  %v1638_v36 = vsel %vm3982_vm7, %v4676_v43, 0.0 }
 0x727   :  { %1831 = vrot.lane.b32.xlu0 %v1815_v39, %s3231_s12  ;;  %v1662_v3 = vperm.slane %v1638_v36, 1  ;;  %v1681_v17 = vperm.slane %v1638_v36, 2 }
 0x728   :  { %v4961_v51 = vpop.permute.xlu2 %2313 }
 0x729   :  { %5831 = vst [vmem:[#allocation51_spill] sm:$0xff] %v4961_v51  ;;  %v1690_v12 = vmul.f32 %v4600_v33, %v1681_v17 }
 0x72e   :  { %2433 = vrot.lane.b32.xlu1 %v2420_v61, %s3232_s0  ;;  %2378 = vrot.lane.b32.xlu2 %v2362_v58, %s3232_s0 }
 0x72f   :  { %1884 = vrot.lane.b32.xlu0 %v1872_v49, %s3231_s12  ;;  %v2723_v49 = vmul.f32 %v4650_v28, %v4750_v48  ;;  %v1643_v48 = vperm.slane %v1638_v36, 0 }
 0x730   :  { %v4974_v14 = vpop.permute.xlu2 %2319 }
 0x731   :  { %5832 = vst [vmem:[#allocation40_spill] sm:$0xff] %v4974_v14  ;;  %v1671_v14 = vmul.f32 %v4592_v30, %v1662_v3 }
 0x736   :  { %2439 = vrot.lane.b32.xlu1 %v2423_v21, %s3232_s0  ;;  %2431 = vrot.lane.b32.xlu2 %v2419_v1, %s3232_s0  ;;  %v1639_v21 = vsel %vm3976_vm6, %v4678_v26, 0.0  ;;  %v2298_v1 = vmul.f32 %v4620_v55, %v4932_v27  ;;  %v1652_v26 = vmul.f32 %v4634_v8, %v1643_v48  ;;  %v1640_v48 = vsel %vm3982_vm7, %v4738_v38, 0.0 }
 0x737   :  { %1890 = vrot.lane.b32.xlu0 %v1875_v2, %s3231_s12  ;;  %v1644_v2 = vperm.slane %v1639_v21, 0  ;;  %v1682_v22 = vperm.slane %v1639_v21, 2  ;;  %v1645_v3 = vperm.slane %v1640_v48, 0  ;;  %v1664_v56 = vperm.slane %v1640_v48, 1 }
 0x738   :  { %v4987_v39 = vpop.permute.xlu1 %1894  ;;  %v4989_v61 = vpop.permute.xlu2 %2799  ;;  %v1701_v60 = vperm.slane %v1639_v21, 3 }
 0x739   :  { %5833 = vst [vmem:[#allocation65_spill] sm:$0xff] %v4989_v61  ;;  %v4991_v58 = vpop.permute.xlu0 %1772  ;;  %v1663_v61 = vperm.slane %v1639_v21, 1  ;;  %v1653_v51 = vmul.f32 %v4634_v8, %v1644_v2  ;;  %v1641_v2 = vsel %vm3976_vm6, %v4743_v32, 0.0  ;;  %v1691_v32 = vmul.f32 %v4600_v33, %v1682_v22 }
 0x73a   :  { %v1646_v34 = vperm.slane %v1641_v2, 0  ;;  %v1665_v50 = vperm.slane %v1641_v2, 1  ;;  %v2358_v22 = vmul.f32 %v4705_v13, %v4699_v42 }
 0x73c   :  { %v1674_v17 = vmul.f32 %v4592_v30, %v1665_v50 }
 0x73e   :  { %2736 = vrot.lane.b32.xlu1 %v2723_v49, %s3237_s22  ;;  %2437 = vrot.lane.b32.xlu2 %v2422_v23, %s3232_s0  ;;  %v1672_v49 = vmul.f32 %v4592_v30, %v1663_v61  ;;  %v2726_v23 = vmul.f32 %v4650_v28, %v4789_v18  ;;  %v1675_v18 = vadd.f32 %v1671_v14, %v1652_v26 }
 0x73f   :  { %2311 = vrot.lane.b32.xlu0 %v2298_v1, %s3232_s0  ;;  %v2722_v1 = vmul.f32 %v4650_v28, %v4787_v52 }
 0x740   :  { %v5008_v46 = vpop.permute.xlu1 %2374  ;;  %v1763_v43 = vpop.permute.xlu2 %1762  ;;  %v1676_v52 = vadd.f32 %v1672_v49, %v1653_v51  ;;  %v2725_v51 = vmul.f32 %v4650_v28, %v4828_v19  ;;  %v1694_v14 = vadd.f32 %v1690_v12, %v1675_v18  ;;  %v1654_v49 = vmul.f32 %v4634_v8, %v1645_v3 }
 0x741   :  { %5834 = vst [vmem:[#allocation52_spill] sm:$0xff] %v5008_v46  ;;  %v5010_v31 = vpop.permute.xlu0 %1949  ;;  %v2301_v46 = vmul.f32 %v4620_v55, %v4948_v57  ;;  %v1710_v12 = vmul.f32 %v4640_v7, %v1701_v60  ;;  %v1684_v28 = vperm.slane %v1641_v2, 2  ;;  %v1702_v3 = vperm.slane %v1640_v48, 3 }
 0x742   :  { %v1695_v26 = vadd.f32 %v1691_v32, %v1676_v52 }
 0x744   :  { %v1714_v19 = vadd.f32 %v1710_v12, %v1695_v26 }
 0x746   :  { %2742 = vrot.lane.b32.xlu1 %v2726_v23, %s3237_s22  ;;  %2734 = vrot.lane.b32.xlu2 %v2722_v1, %s3237_s22  ;;  %v1700_v23 = vperm.slane %v1638_v36, 3  ;;  %v1655_v1 = vmul.f32 %v4634_v8, %v1646_v34  ;;  %v1683_v36 = vperm.slane %v1640_v48, 2 }
 0x747   :  { %2317 = vrot.lane.b32.xlu0 %v2301_v46, %s3232_s0  ;;  %v2783_v46 = vmul.f32 %v4632_v47, %v4824_v4 }
 0x748   :  { %v5031_v61 = vpop.permute.xlu1 %2380  ;;  %v1769_v55 = vpop.permute.xlu2 %1768  ;;  %v1709_v4 = vmul.f32 %v4640_v7, %v1700_v23  ;;  %v1692_v52 = vmul.f32 %v4600_v33, %v1683_v36  ;;  %v1693_v23 = vmul.f32 %v4600_v33, %v1684_v28 }
 0x749   :  { %5835 = vst [vmem:[#allocation41_spill] sm:$0xff] %v5031_v61  ;;  %v5033_v38 = vpop.permute.xlu0 %1955  ;;  %v1673_v61 = vmul.f32 %v4592_v30, %v1664_v56  ;;  %v1678_v30 = vadd.f32 %v1674_v17, %v1655_v1  ;;  %v2784_v17 = vmul.f32 %v4632_v47, %v4932_v27 }
 0x74a   :  { %v1713_v8 = vadd.f32 %v1709_v4, %v1694_v14 }
 0x74b   :  { %v1677_v50 = vadd.f32 %v1673_v61, %v1654_v49  ;;  %v2786_v61 = vmul.f32 %v4632_v47, %v4855_v20  ;;  %v1697_v14 = vadd.f32 %v1693_v23, %v1678_v30 }
 0x74e   :  { %2795 = vrot.lane.b32.xlu1 %v2783_v46, %s3237_s22  ;;  %2740 = vrot.lane.b32.xlu2 %v2725_v51, %s3237_s22  ;;  %v1703_v46 = vperm.slane %v1641_v2, 3  ;;  %v1696_v51 = vadd.f32 %v1692_v52, %v1677_v50 }
 0x74f   :  { %2370 = vrot.lane.b32.xlu0 %v2358_v22, %s3232_s0 }
 0x750   :  { %v1765_v34 = vpop.permute.xlu1 %1764  ;;  %v5052_v56 = vpop.permute.xlu2 %1886  ;;  %v1712_v48 = vmul.f32 %v4640_v7, %v1703_v46 }
 0x751   :  { %v1774_v42 = vsel %vm236_vm8, %v1763_v43, %v1765_v34  ;;  %v1775_v21 = vsel %vm236_vm8, %v1765_v34, %v4976_v44  ;;  %v2253_v18 = vpop.permute.xlu0 %2252  ;;  %v2361_v43 = vmul.f32 %v4705_v13, %v4759_v41  ;;  %v1711_v44 = vmul.f32 %v4640_v7, %v1702_v3  ;;  %v5838_v34 = vld [vmem:[#allocation37_spill] sm:$0xff] }
 0x752   :  { %v5058_v60 = vadd.f32 %v1774_v42, %v1713_v8  ;;  %v5060_v32 = vadd.f32 %v1775_v21, %v1714_v19  ;;  %v1716_v26 = vadd.f32 %v1712_v48, %v1697_v14  ;;  %v2787_v7 = vmul.f32 %v4632_v47, %v4948_v57 }
 0x753   :  { %v1715_v2 = vadd.f32 %v1711_v44, %v1696_v51  ;;  %v1897_v23 = vsel %vm236_vm8, %v5052_v56, %v4972_v37  ;;  %v5842_v51 = vld [vmem:[#allocation55_spill] sm:$0xff] }
 0x756   :  { %2801 = vrot.lane.b32.xlu1 %v2786_v61, %s3237_s22  ;;  %2856 = vrot.lane.b32.xlu2 %v4716_v10, %s3237_s22  ;;  %v5841_v61 = vld [vmem:[#allocation15_spill] sm:$0xff] }
 0x757   :  { %2376 = vrot.lane.b32.xlu0 %v2361_v43, %s3232_s0  ;;  %v5843_v43 = vld [vmem:[#allocation47_spill] sm:$0xff] }
 0x758   :  { %v1771_v33 = vpop.permute.xlu1 %1770  ;;  %v5073_v20 = vpop.permute.xlu2 %1892 }
 0x759   :  { %v1776_v49 = vsel %vm236_vm8, %v1769_v55, %v1771_v33  ;;  %v1777_v41 = vsel %vm236_vm8, %v1771_v33, %v4991_v58  ;;  %v2259_v13 = vpop.permute.xlu0 %2258 }
 0x75a   :  { %v5078_v1 = vadd.f32 %v1776_v49, %v1715_v2  ;;  %v5080_v10 = vadd.f32 %v1777_v41, %v1716_v26  ;;  %v1899_v2 = vsel %vm236_vm8, %v5073_v20, %v4987_v39  ;;  %v5844_v49 = vld [vmem:[#allocation38_spill] sm:$0xff] }
 0x75b   :  { %v5845_v41 = vld [vmem:[#allocation22_spill] sm:$0xff] }
 0x75e   :  { %2803 = vrot.lane.b32.xlu1 %v2787_v7, %s3237_s22  ;;  %1988 = vrot.lane.b32.xlu2 %v4748_v59, %s3233_s13  ;;  %v5846_v7 = vld [vmem:[#allocation31_spill] sm:$0xff] }
 0x75f   :  { %2797 = vrot.lane.b32.xlu0 %v2784_v17, %s3237_s22 }
 0x760   :  { %v1824_v55 = vpop.permute.xlu1 %1823  ;;  %v1946_v58 = vpop.permute.xlu2 %1945 }
 0x761   :  { %v5090_v22 = vpop.permute.xlu0 %2435 }
 0x766   :  { %2858 = vrot.lane.b32.xlu1 %v4776_v0, %s3237_s22  ;;  %2113 = vrot.lane.b32.xlu2 %v4791_v29, %s3234_s14 }
 0x767   :  { %1992 = vrot.lane.b32.xlu0 %v4734_v62, %s3233_s13 }
 0x768   :  { %v1830_v47 = vpop.permute.xlu1 %1829  ;;  %v1952_v27 = vpop.permute.xlu2 %1951 }
 0x769   :  { %v5098_v57 = vpop.permute.xlu0 %2441 }
 0x76e   :  { %1990 = vrot.lane.b32.xlu1 %v4752_v54, %s3233_s13  ;;  %1982 = vrot.lane.b32.xlu2 %v4703_v63, %s3233_s13 }
 0x76f   :  { %1986 = vrot.lane.b32.xlu0 %v4798_v15, %s3233_s13 }
 0x770   :  { %v1948_v59 = vpop.permute.xlu1 %1947  ;;  %v2249_v0 = vpop.permute.xlu2 %2248 }
 0x771   :  { %v5107_v29 = vsel %vm236_vm8, %v1946_v58, %v1948_v59  ;;  %v1958_v62 = vsel %vm236_vm8, %v1948_v59, %v5010_v31  ;;  %v5111_v36 = vpop.permute.xlu0 %2738 }
 0x776   :  { %1984 = vrot.lane.b32.xlu1 %v4707_v16, %s3233_s13  ;;  %2107 = vrot.lane.b32.xlu2 %v4830_v35, %s3234_s14 }
 0x777   :  { %2111 = vrot.lane.b32.xlu0 %v4800_v45, %s3234_s14 }
 0x778   :  { %v1954_v63 = vpop.permute.xlu1 %1953  ;;  %v2255_v54 = vpop.permute.xlu2 %2254 }
 0x779   :  { %v5120_v15 = vsel %vm236_vm8, %v1952_v27, %v1954_v63  ;;  %v1960_v4 = vsel %vm236_vm8, %v1954_v63, %v5033_v38  ;;  %v5124_v31 = vpop.permute.xlu0 %2744 }
 0x77e   :  { %2109 = vrot.lane.b32.xlu1 %v4802_v24, %s3234_s14  ;;  %2474 = vrot.lane.b32.xlu2 %v4833_v11, %s3235_s21  ;;  %v5836_v11 = vld [vmem:[#allocation14_spill] sm:$0xff] }
 0x77f   :  { %2478 = vrot.lane.b32.xlu0 %v4826_v9, %s3235_s21 }
 0x780   :  { %v2251_v45 = vpop.permute.xlu1 %2250  ;;  %v5132_v16 = vpop.permute.xlu2 %2372 }
 0x781   :  { %v5135_v35 = vsel %vm725_vm13, %v2249_v0, %v2251_v45  ;;  %v5138_v12 = vsel %vm725_vm13, %v2251_v45, %v2253_v18  ;;  %v5140_v38 = vpop.permute.xlu0 %2805  ;;  %v5848_v0 = vld [vmem:[#allocation24_spill] sm:$0xff] }
 0x786   :  { %2103 = vrot.lane.b32.xlu1 %v4724_v6, %s3234_s14  ;;  %2599 = vrot.lane.b32.xlu2 %v4853_v5, %s3236_s7  ;;  %v5839_v6 = vld [vmem:[#allocation12_spill] sm:$0xff]  ;;  %v5840_v5 = vld [vmem:[#allocation43_spill] sm:$0xff] }
 0x787   :  { %2105 = vrot.lane.b32.xlu0 %v5836_v11, %s3234_s14  ;;  %v2952_v11 = vld.sshfl [vmem:[#allocation1 + $0x28] sm:$0xff pattern:$0x75316420] }
 0x788   :  { %v2257_v9 = vpop.permute.xlu1 %2256  ;;  %v5148_v24 = vpop.permute.xlu2 %2378 }
 0x789   :  { %v5151_v28 = vsel %vm725_vm13, %v2255_v54, %v2257_v9  ;;  %v5154_v8 = vsel %vm725_vm13, %v2257_v9, %v2259_v13  ;;  %v5156_v19 = vpop.permute.xlu0 %2860  ;;  %v5850_v9 = vld [vmem:[#allocation29_spill] sm:$0xff] }
 0x78a   :  { %5837 = vst [vmem:[#allocation66_spill] sm:$0xff] %v5156_v19 }
 0x78e   :  { %2476 = vrot.lane.b32.xlu1 %v5838_v34, %s3235_s21  ;;  %2468 = vrot.lane.b32.xlu2 %v5839_v6, %s3235_s21  ;;  %v5851_v34 = vld [vmem:[#allocation34_spill] sm:$0xff] }
 0x78f   :  { %2472 = vrot.lane.b32.xlu0 %v5840_v5, %s3235_s21 }
 0x790   :  { %v2310_v50 = vpop.permute.xlu1 %2309  ;;  %v2432_v30 = vpop.permute.xlu2 %2431 }
 0x791   :  { %v1826_v42 = vpop.permute.xlu0 %1825 }
 0x792   :  { %v1835_v21 = vsel %vm236_vm8, %v1824_v55, %v1826_v42  ;;  %v1836_v18 = vsel %vm236_vm8, %v1826_v42, %v4930_v40  ;;  %v2951_v42 = vld.sshfl [vmem:[#allocation1 + $0x20] sm:$0xff pattern:$0x75316420] }
 0x793   :  { %v1843_v52 = vadd.f32 %v1835_v21, %v5058_v60  ;;  %v1844_v3 = vadd.f32 %v1836_v18, %v5060_v32  ;;  %v5853_v21 = vld [vmem:[#allocation11_spill] sm:$0xff] }
 0x794   :  { %v2884_v18 = vperm.slane %v5853_v21, 3 }
 0x795   :  { %v1905_v46 = vadd.f32 %v1897_v23, %v1844_v3  ;;  %v5855_v3 = vld [vmem:[#allocation33_spill] sm:$0xff] }
 0x796   :  { %2470 = vrot.lane.b32.xlu1 %v5841_v61, %s3235_s21  ;;  %2593 = vrot.lane.b32.xlu2 %v5842_v51, %s3236_s7  ;;  %v2896_v61 = vperm.slane %v2884_v18, 3 }
 0x797   :  { %v5176_v14 = vadd.f32 %v1958_v62, %v1905_v46  ;;  %2597 = vrot.lane.b32.xlu0 %v5843_v43, %s3236_s7  ;;  %v5849_v62 = vld [vmem:[#allocation18_spill] sm:$0xff]  ;;  %v5856_v43 = vld [vmem:[#allocation44_spill] sm:$0xff] }
 0x798   :  { %v2316_v40 = vpop.permute.xlu1 %2315  ;;  %v2438_v60 = vpop.permute.xlu2 %2437 }
 0x799   :  { %v1832_v44 = vpop.permute.xlu0 %1831 }
 0x79a   :  { %v1837_v32 = vsel %vm236_vm8, %v1830_v47, %v1832_v44  ;;  %v1838_v37 = vsel %vm236_vm8, %v1832_v44, %v4946_v53  ;;  %v5847_v47 = vld [vmem:[#allocation28_spill] sm:$0xff] }
 0x79b   :  { %v1845_v48 = vadd.f32 %v1837_v32, %v5078_v1  ;;  %v1846_v33 = vadd.f32 %v1838_v37, %v5080_v10  ;;  %v2905_v27 = vmul.f32 %v5847_v47, %v4893_v25  ;;  %v2953_v32 = vld.sshfl [vmem:[#allocation1 + $0x30] sm:$0xff pattern:$0x75316420]  ;;  %v2907_v37 = vmul.f32 %v5847_v47, %v2896_v61 }
 0x79d   :  { %v1907_v26 = vadd.f32 %v1899_v2, %v1846_v33  ;;  %v5857_v33 = vld [vmem:[#allocation67_spill] sm:$0xff]  ;;  %v5858_v2 = vld [vmem:[#allocation49_spill] sm:$0xff] }
 0x79e   :  { %2595 = vrot.lane.b32.xlu1 %v5844_v49, %s3236_s7  ;;  %2862 = vrot.lane.b32.xlu2 %v5845_v41, %s3237_s22  ;;  %v3179_v49 = vld [vmem:[%s5542_s4 + $0x80] sm:$0xf]  ;;  %v5859_v41 = vld [vmem:[#allocation21_spill] sm:$0xff] }
 0x79f   :  { %v5192_v13 = vadd.f32 %v1960_v4, %v1907_v26  ;;  %2591 = vrot.lane.b32.xlu0 %v5846_v7, %s3236_s7  ;;  %v2908_v26 = vmul.f32 %v5847_v47, %v5858_v2  ;;  %v2887_v7 = vperm.slane %v5859_v41, 3  ;;  %v5867_v2 = vld [vmem:[#allocation35_spill] sm:$0xff] }
 0x7a0   :  { %v2434_v53 = vpop.permute.xlu1 %2433  ;;  %v2735_v1 = vpop.permute.xlu2 %2734 }
 0x7a1   :  { %v5197_v10 = vsel %vm725_vm13, %v2432_v30, %v2434_v53  ;;  %v5201_v39 = vsel %vm725_vm13, %v2434_v53, %v5090_v22  ;;  %v1885_v17 = vpop.permute.xlu0 %1884 }
 0x7a2   :  { %v1896_v55 = vsel %vm236_vm8, %v1885_v17, %v5052_v56  ;;  %v2899_v17 = vperm.slane %v2887_v7, 3 }
 0x7a3   :  { %v1904_v58 = vadd.f32 %v1896_v55, %v1843_v52  ;;  %v5854_v52 = vld [vmem:[#allocation54_spill] sm:$0xff] }
 0x7a5   :  { %v5208_v59 = vadd.f32 %v5107_v29, %v1904_v58  ;;  %v3182_v58 = vld [vmem:[%s5542_s4 + $0x8c] sm:$0xf] }
 0x7a6   :  { %2589 = vrot.lane.b32.xlu1 %v5848_v0, %s3236_s7  ;;  %2917 = vrot.lane.b32.xlu2 %v2905_v27, %s3237_s22  ;;  %v2910_v27 = vmul.f32 %v5847_v47, %v2899_v17  ;;  %v3181_v0 = vld [vmem:[%s5542_s4 + $0x88] sm:$0xf] }
 0x7a7   :  { %2866 = vrot.lane.b32.xlu0 %v5849_v62, %s3237_s22 }
 0x7a8   :  { %v2440_v22 = vpop.permute.xlu1 %2439  ;;  %v2741_v25 = vpop.permute.xlu2 %2740 }
 0x7a9   :  { %v5216_v63 = vsel %vm725_vm13, %v2438_v60, %v2440_v22  ;;  %v5220_v56 = vsel %vm725_vm13, %v2440_v22, %v5098_v57  ;;  %v1891_v54 = vpop.permute.xlu0 %1890  ;;  %v2909_v60 = vmul.f32 %v5847_v47, %v5856_v43 }
 0x7aa   :  { %v1898_v29 = vsel %vm236_vm8, %v1891_v54, %v5073_v20  ;;  %vm5886_vm8 = vmmov %vm5878_vm0 }
 0x7ab   :  { %v1906_v4 = vadd.f32 %v1898_v29, %v1845_v48  ;;  %v3180_v29 = vld [vmem:[%s5542_s4 + $0x84] sm:$0xf]  ;;  %s3239_s4 = smov [#allocation3]  }
 0x7ad   :  { %v5225_v45 = vadd.f32 %v5120_v15, %v1906_v4 }
 0x7ae   :  { %2864 = vrot.lane.b32.xlu1 %v5850_v9, %s3237_s22  ;;  %2962 = vrot.lane.b32.xlu2 %v2952_v11, %s3238_s30 }
 0x7af   :  { %2958 = vrot.lane.b32.xlu0 %v5851_v34, %s3238_s30 }
 0x7b0   :  { %v2737_v57 = vpop.permute.xlu1 %2736  ;;  %v2857_v30 = vpop.permute.xlu2 %2856 }
 0x7b1   :  { %v5233_v6 = vsel %vm1214_vm1, %v2735_v1, %v2737_v57  ;;  %v5237_v20 = vsel %vm1214_vm1, %v2737_v57, %v5111_v36  ;;  %v5239_v5 = vpop.permute.xlu0 %2311  ;;  %v3054_v57 = vld [vmem:[%s5543_s5] sm:$0xf]  ;;  %s3099_s5 = sshll.u32 %s3239_s4, 4  ;;  %s3100_s5 = int_to_ptr.vmem [resolvable:$true] %s3099_s5 }
 0x7b2   :  { %5852 = vst [vmem:[#allocation53_spill] sm:$0xff] %v5233_v6  ;;  %v5243_v15 = vsel %vm725_vm13, %v2310_v50, %v5239_v5  ;;  %v5875_v6 = vld [vmem:[#allocation25_spill] sm:$0xff] }
 0x7b6   :  { %2956 = vrot.lane.b32.xlu1 %v5854_v52, %s3238_s30  ;;  %2960 = vrot.lane.b32.xlu2 %v2951_v42, %s3238_s30 }
 0x7b7   :  { %2954 = vrot.lane.b32.xlu0 %v5855_v3, %s3238_s30 }
 0x7b8   :  { %v2743_v36 = vpop.permute.xlu1 %2742  ;;  %v1989_v44 = vpop.permute.xlu2 %1988 }
 0x7b9   :  { %v5252_v23 = vsel %vm1214_vm1, %v2741_v25, %v2743_v36  ;;  %v5256_v50 = vsel %vm1214_vm1, %v2743_v36, %v5124_v31  ;;  %v5258_v46 = vpop.permute.xlu0 %2317 }
 0x7ba   :  { %v5262_v51 = vsel %vm725_vm13, %v2316_v40, %v5258_v46  ;;  %v2906_v40 = vmul.f32 %v5847_v47, %v5857_v33 }
 0x7be   :  { %2964 = vrot.lane.b32.xlu1 %v2953_v32, %s3238_s30  ;;  %2925 = vrot.lane.b32.xlu2 %v2909_v60, %s3237_s22 }
 0x7bf   :  { %2921 = vrot.lane.b32.xlu0 %v2907_v37, %s3237_s22 }
 0x7c0   :  { %v2796_v31 = vpop.permute.xlu1 %2795  ;;  %v2114_v53 = vpop.permute.xlu2 %2113 }
 0x7c1   :  { %v5270_v48 = vpop.permute.xlu0 %2370 }
 0x7c6   :  { %2919 = vrot.lane.b32.xlu1 %v2906_v40, %s3237_s22  ;;  %2923 = vrot.lane.b32.xlu2 %v2908_v26, %s3237_s22 }
 0x7c7   :  { %2986 = vperm.xlu0 %3199, %v3179_v49  }
 0x7c8   :  { %v2802_v1 = vpop.permute.xlu1 %2801  ;;  %v1983_v22 = vpop.permute.xlu2 %1982 }
 0x7c9   :  { %v5282_v55 = vpop.permute.xlu0 %2376 }
 0x7ce   :  { %2927 = vrot.lane.b32.xlu1 %v2910_v27, %s3237_s22  ;;  %3043 = vperm.xlu2 %3198, %v3182_v58  }
 0x7cf   :  { %3024 = vperm.xlu0 %3199, %v3181_v0  }
 0x7d0   :  { %v5292_v62 = vpop.permute.xlu1 %2803  ;;  %v5313_v34 = vpop.permute.xlu2 %2107 }
 0x7d1   :  { %v5296_v25 = vsel %vm1214_vm1, %v2802_v1, %v5292_v62  ;;  %v5298_v54 = vpop.permute.xlu0 %2797 }
 0x7d2   :  { %5860 = vst [vmem:[#allocation42_spill] sm:$0xff] %v5298_v54  ;;  %v5302_v47 = vsel %vm1214_vm1, %v2796_v31, %v5298_v54  ;;  %v5866_v31 = vld [vmem:[#allocation16_spill] sm:$0xff] }
 0x7d3   :  { %5861 = vst [vmem:[#allocation56_spill] sm:$0xff] %v5302_v47 }
 0x7d6   :  { %3005 = vperm.xlu1 %3197, %v3180_v29  }
 0x7d8   :  { %v5307_v4 = vpop.permute.xlu1 %2858  ;;  %v5324_v37 = vpop.permute.xlu2 %2474 }
 0x7d9   :  { %5862 = vst [vmem:[#allocation68_spill] sm:$0xff] %v5307_v4  ;;  %v5311_v11 = vsel %vm1214_vm1, %v2857_v30, %v5307_v4  ;;  %v1993_v9 = vpop.permute.xlu0 %1992 }
 0x7da   :  { %5863 = vst [vmem:[#allocation46_spill] sm:$0xff] %v5311_v11 }
 0x7de   :  { %3057 = vperm.xlu1 %3197, %v3054_v57  }
 0x7e0   :  { %v1991_v42 = vpop.permute.xlu1 %1990 }
 0x7e1   :  { %v1996_v21 = vsel %vm457_vm9, %v1989_v44, %v1991_v42  ;;  %v1997_v18 = vsel %vm457_vm9, %v1991_v42, %v1993_v9  ;;  %v1987_v52 = vpop.permute.xlu0 %1986 }
 0x7e2   :  { %v2004_v36 = vsel %vm4040_vm10, %v1996_v21, 0.0  ;;  %v2005_v30 = vsel %vm4061_vm11, %v1997_v18, 0.0  ;;  %v5869_v18 = vld [vmem:[#allocation30_spill] sm:$0xff] }
 0x7e3   :  { %v2011_v43 = vperm.slane %v2005_v30, 0  ;;  %v2010_v60 = vperm.slane %v2004_v36, 0  ;;  %v2030_v32 = vperm.slane %v2005_v30, 1  ;;  %v2049_v49 = vperm.slane %v2005_v30, 2 }
 0x7e4   :  { %v2029_v58 = vperm.slane %v2004_v36, 1  ;;  %v2068_v57 = vperm.slane %v2005_v30, 3  ;;  %v2067_v47 = vperm.slane %v2004_v36, 3 }
 0x7e5   :  { %v2020_v33 = vmul.f32 %v5866_v31, %v2011_v43  ;;  %v2019_v44 = vmul.f32 %v5866_v31, %v2010_v60  ;;  %v2039_v26 = vmul.f32 %v5867_v2, %v2030_v32  ;;  %v2048_v32 = vperm.slane %v2004_v36, 2 }
 0x7e7   :  { %v2024_v40 = vadd.f32 %v2020_v33, %v5192_v13  ;;  %v5868_v13 = vld [vmem:[#allocation41_spill] sm:$0xff] }
 0x7e8   :  { %v1985_v41 = vpop.permute.xlu1 %1984  ;;  %v5339_v9 = vsel %vm725_vm13, %v5148_v24, %v5868_v13  ;;  %v5347_v13 = vpop.permute.xlu2 %2599 }
 0x7e9   :  { %v1994_v7 = vsel %vm457_vm9, %v1983_v22, %v1985_v41  ;;  %v1995_v1 = vsel %vm457_vm9, %v1985_v41, %v1987_v52  ;;  %v2112_v17 = vpop.permute.xlu0 %2111  ;;  %v2043_v27 = vadd.f32 %v2039_v26, %v2024_v40  ;;  %v2023_v22 = vadd.f32 %v2019_v44, %v5225_v45 }
 0x7ea   :  { %v2002_v0 = vsel %vm4040_vm10, %v1994_v7, 0.0  ;;  %v2003_v29 = vsel %vm4061_vm11, %v1995_v1, 0.0  ;;  %v2058_v52 = vmul.f32 %v5869_v18, %v2049_v49  ;;  %v2118_v26 = vsel %vm579_vm12, %v2112_v17, %v2114_v53 }
 0x7eb   :  { %v2008_v42 = vperm.slane %v2002_v0, 0  ;;  %v2009_v21 = vperm.slane %v2003_v29, 0  ;;  %v2027_v43 = vperm.slane %v2002_v0, 1  ;;  %v2028_v60 = vperm.slane %v2003_v29, 1 }
 0x7ec   :  { %v2038_v41 = vmul.f32 %v5867_v2, %v2029_v58  ;;  %v2062_v7 = vadd.f32 %v2058_v52, %v2043_v27  ;;  %v2046_v1 = vperm.slane %v2002_v0, 2  ;;  %v2047_v30 = vperm.slane %v2003_v29, 2  ;;  %v5872_v52 = vld [vmem:[#allocation40_spill] sm:$0xff] }
 0x7ed   :  { %v2017_v33 = vmul.f32 %v5866_v31, %v2008_v42  ;;  %v2018_v40 = vmul.f32 %v5866_v31, %v2009_v21  ;;  %v2036_v49 = vmul.f32 %v5867_v2, %v2027_v43  ;;  %v2037_v11 = vmul.f32 %v5867_v2, %v2028_v60  ;;  %v5870_v31 = vld [vmem:[#allocation26_spill] sm:$0xff] }
 0x7ee   :  { %v2042_v42 = vadd.f32 %v2038_v41, %v2023_v22  ;;  %v2077_v21 = vmul.f32 %v5870_v31, %v2068_v57  ;;  %v2126_v58 = vsel %vm3976_vm6, %v2118_v26, 0.0  ;;  %v5359_v4 = vsel %vm725_vm13, %v5258_v46, %v5872_v52  ;;  %v5873_v52 = vld [vmem:[#allocation27_spill] sm:$0xff] }
 0x7ef   :  { %v2021_v45 = vadd.f32 %v2017_v33, %v5208_v59  ;;  %v2022_v44 = vadd.f32 %v2018_v40, %v5176_v14  ;;  %v2057_v59 = vmul.f32 %v5869_v18, %v2048_v32  ;;  %v2055_v36 = vmul.f32 %v5869_v18, %v2046_v1 }
 0x7f0   :  { %v2110_v27 = vpop.permute.xlu1 %2109  ;;  %v2081_v2 = vadd.f32 %v2077_v21, %v2062_v7  ;;  %v2132_v22 = vperm.slane %v2126_v58, 0  ;;  %v2151_v57 = vperm.slane %v2126_v58, 1  ;;  %v2056_v60 = vmul.f32 %v5869_v18, %v2047_v30 }
 0x7f1   :  { %v2040_v14 = vadd.f32 %v2036_v49, %v2021_v45  ;;  %v2041_v33 = vadd.f32 %v2037_v11, %v2022_v44  ;;  %v5362_v43 = vpop.permute.xlu0 %2478  ;;  %v2065_v40 = vperm.slane %v2002_v0, 3  ;;  %v2066_v26 = vperm.slane %v2003_v29, 3 }
 0x7f2   :  { %v2117_v41 = vsel %vm579_vm12, %v2110_v27, %v2112_v17  ;;  %v2061_v19 = vadd.f32 %v2057_v59, %v2042_v42  ;;  %v2076_v46 = vmul.f32 %v5870_v31, %v2067_v47  ;;  %v2141_v32 = vmul.f32 %v5873_v52, %v2132_v22  ;;  %v5876_v59 = vld [vmem:[#allocation17_spill] sm:$0xff] }
 0x7f3   :  { %v2170_v45 = vperm.slane %v2126_v58, 2  ;;  %v2059_v11 = vadd.f32 %v2055_v36, %v2040_v14  ;;  %v2060_v44 = vadd.f32 %v2056_v60, %v2041_v33  ;;  %v2189_v49 = vperm.slane %v2126_v58, 3 }
 0x7f4   :  { %v2125_v1 = vsel %vm3982_vm7, %v2117_v41, 0.0  ;;  %v2145_v21 = vadd.f32 %v2141_v32, %v2081_v2  ;;  %v2160_v54 = vmul.f32 %v5875_v6, %v2151_v57  ;;  %v2074_v29 = vmul.f32 %v5870_v31, %v2065_v40  ;;  %v5376_v2 = vpop.permute.xlu2 %2468  ;;  %v5877_v57 = vld [vmem:[#allocation20_spill] sm:$0xff] }
 0x7f5   :  { %v2131_v18 = vperm.slane %v2125_v1, 0  ;;  %v2150_v0 = vperm.slane %v2125_v1, 1  ;;  %v2075_v17 = vmul.f32 %v5870_v31, %v2066_v26  ;;  %v2169_v30 = vperm.slane %v2125_v1, 2 }
 0x7f6   :  { %v2188_v47 = vperm.slane %v2125_v1, 3  ;;  %v2080_v42 = vadd.f32 %v2076_v46, %v2061_v19  ;;  %v2164_v27 = vadd.f32 %v2160_v54, %v2145_v21  ;;  %v2179_v14 = vmul.f32 %v5876_v59, %v2170_v45 }
 0x7f7   :  { %v2140_v58 = vmul.f32 %v5873_v52, %v2131_v18  ;;  %v2078_v36 = vadd.f32 %v2074_v29, %v2059_v11  ;;  %v2079_v22 = vadd.f32 %v2075_v17, %v2060_v44  ;;  %v2198_v60 = vmul.f32 %v5877_v57, %v2189_v49 }
 0x7f8   :  { %v2104_v33 = vpop.permute.xlu1 %2103  ;;  %v2159_v41 = vmul.f32 %v5875_v6, %v2150_v0  ;;  %v2183_v32 = vadd.f32 %v2179_v14, %v2164_v27  ;;  %v2178_v54 = vmul.f32 %v5876_v59, %v2169_v30  ;;  %v2197_v46 = vmul.f32 %v5877_v57, %v2188_v47 }
 0x7f9   :  { %v2106_v40 = vpop.permute.xlu0 %2105  ;;  %v2144_v31 = vadd.f32 %v2140_v58, %v2080_v42  ;;  %vm5888_vm9 = vcmask 785408  }
 0x7fa   :  { %v2115_v26 = vsel %vm579_vm12, %v2104_v33, %v2106_v40  ;;  %v2116_v19 = vsel %vm579_vm12, %v2106_v40, %v5313_v34  ;;  %v2202_v44 = vadd.f32 %v2198_v60, %v2183_v32  ;;  %vm5889_vm12 = vmmov %vm5888_vm9 }
 0x7fb   :  { %v2123_v45 = vsel %vm3982_vm7, %v2115_v26, 0.0  ;;  %v2124_v11 = vsel %vm3976_vm6, %v2116_v19, 0.0  ;;  %v2163_v49 = vadd.f32 %v2159_v41, %v2144_v31  ;;  %vm5895_vm14 = vmmov %vm5888_vm9 }
 0x7fc   :  { %v2129_v1 = vperm.slane %v2123_v45, 0  ;;  %v2130_v21 = vperm.slane %v2124_v11, 0  ;;  %v2148_v18 = vperm.slane %v2123_v45, 1  ;;  %v2149_v0 = vperm.slane %v2124_v11, 1 }
 0x7fd   :  { %v2167_v29 = vperm.slane %v2123_v45, 2  ;;  %v2168_v17 = vperm.slane %v2124_v11, 2  ;;  %v2271_v34 = vadd.f32 %v5154_v8, %v2202_v44  ;;  %v2182_v42 = vadd.f32 %v2178_v54, %v2163_v49 }
 0x7fe   :  { %v2138_v30 = vmul.f32 %v5873_v52, %v2129_v1  ;;  %v2139_v47 = vmul.f32 %v5873_v52, %v2130_v21  ;;  %v2157_v27 = vmul.f32 %v5875_v6, %v2148_v18  ;;  %v2158_v14 = vmul.f32 %v5875_v6, %v2149_v0 }
 0x7ff   :  { %v2176_v58 = vmul.f32 %v5876_v59, %v2167_v29  ;;  %v2177_v33 = vmul.f32 %v5876_v59, %v2168_v17  ;;  %v2332_v60 = vadd.f32 %v5359_v4, %v2271_v34  ;;  %v2201_v41 = vadd.f32 %v2197_v46, %v2182_v42  ;;  %v5403_v4 = vpop.permute.xlu2 %2593  ;;  %v5880_v34 = vld [vmem:[#allocation52_spill] sm:$0xff] }
 0x800   :  { %v2142_v40 = vadd.f32 %v2138_v30, %v2078_v36  ;;  %v2143_v32 = vadd.f32 %v2139_v47, %v2079_v22  ;;  %v2477_v31 = vpop.permute.xlu1 %2476  ;;  %v2186_v8 = vperm.slane %v2123_v45, 3  ;;  %v2187_v26 = vperm.slane %v2124_v11, 3 }
 0x801   :  { %v2482_v19 = vsel %vm5878_vm0, %v5324_v37, %v2477_v31  ;;  %v2483_v52 = vsel %vm5879_vm4, %v2477_v31, %v5362_v43  ;;  %v2473_v54 = vpop.permute.xlu0 %2472  ;;  %v2270_v6 = vadd.f32 %v5151_v28, %v2201_v41  ;;  %v2393_v59 = vadd.f32 %v5339_v9, %v2332_v60 }
 0x802   :  { %v2161_v44 = vadd.f32 %v2157_v27, %v2142_v40  ;;  %v2162_v49 = vadd.f32 %v2158_v14, %v2143_v32  ;;  %v2195_v36 = vmul.f32 %v5877_v57, %v2186_v8  ;;  %v2196_v22 = vmul.f32 %v5877_v57, %v2187_v26  ;;  %v5883_v40 = vld [vmem:[#allocation39_spill] sm:$0xff] }
 0x803   :  { %v2490_v46 = vsel %vm4040_vm10, %v2482_v19, 0.0  ;;  %v2491_v37 = vsel %vm4061_vm11, %v2483_v52, 0.0  ;;  %v2331_v43 = vadd.f32 %v5262_v51, %v2270_v6  ;;  %v2454_v11 = vadd.f32 %v5220_v56, %v2393_v59  ;;  %v5881_v51 = vld [vmem:[#allocation51_spill] sm:$0xff]  ;;  %v5882_v56 = vld [vmem:[#allocation13_spill] sm:$0xff]  ;;  %v5884_v52 = vld [vmem:[#allocation36_spill] sm:$0xff] }
 0x804   :  { %v2180_v45 = vadd.f32 %v2176_v58, %v2161_v44  ;;  %v2181_v28 = vadd.f32 %v2177_v33, %v2162_v49  ;;  %v2384_v9 = vsel %vm725_vm13, %v5282_v55, %v5148_v24  ;;  %v2496_v1 = vperm.slane %v2490_v46, 0 }
 0x805   :  { %v2497_v21 = vperm.slane %v2491_v37, 0  ;;  %v2516_v18 = vperm.slane %v2491_v37, 1  ;;  %v2392_v29 = vadd.f32 %v2384_v9, %v2331_v43  ;;  %v2515_v17 = vperm.slane %v2490_v46, 1 }
 0x806   :  { %v2199_v57 = vadd.f32 %v2195_v36, %v2180_v45  ;;  %v2200_v0 = vadd.f32 %v2196_v22, %v2181_v28  ;;  %v2383_v42 = vsel %vm725_vm13, %v5132_v16, %v5880_v34  ;;  %v2322_v30 = vsel %vm725_vm13, %v5239_v5, %v5881_v51 }
 0x807   :  { %v2505_v47 = vmul.f32 %v5882_v56, %v2496_v1  ;;  %v2506_v27 = vmul.f32 %v5882_v56, %v2497_v21  ;;  %v2453_v14 = vadd.f32 %v5216_v63, %v2392_v29  ;;  %v2535_v58 = vperm.slane %v2491_v37, 2  ;;  %v5437_v36 = vpop.permute.xlu2 %2862  ;;  %v5887_v21 = vld [vmem:[#allocation32_spill] sm:$0xff] }
 0x808   :  { %v2268_v24 = vadd.f32 %v5135_v35, %v2199_v57  ;;  %v2269_v55 = vadd.f32 %v5138_v12, %v2200_v0  ;;  %v2471_v33 = vpop.permute.xlu1 %2470  ;;  %v2382_v60 = vsel %vm725_vm13, %v5270_v48, %v5132_v16  ;;  %v2525_v32 = vmul.f32 %v5883_v40, %v2516_v18  ;;  %vm5894_vm13 = vmmov %vm5888_vm9 }
 0x809   :  { %v2510_v41 = vadd.f32 %v2506_v27, %v2454_v11  ;;  %v2534_v5 = vperm.slane %v2490_v46, 2  ;;  %v2598_v31 = vpop.permute.xlu0 %2597  ;;  %v2509_v19 = vadd.f32 %v2505_v47, %v2453_v14  ;;  %v2524_v35 = vmul.f32 %v5883_v40, %v2515_v17 }
 0x80a   :  { %v2329_v8 = vadd.f32 %v5243_v15, %v2268_v24  ;;  %v2330_v26 = vadd.f32 %v2322_v30, %v2269_v55  ;;  %v2544_v63 = vmul.f32 %v5884_v52, %v2535_v58  ;;  %v2554_v6 = vperm.slane %v2491_v37, 3 }
 0x80b   :  { %v2529_v12 = vadd.f32 %v2525_v32, %v2510_v41  ;;  %v2480_v44 = vsel %vm5885_vm5, %v5376_v2, %v2471_v33  ;;  %v2528_v49 = vadd.f32 %v2524_v35, %v2509_v19  ;;  %v2481_v59 = vsel %vm5886_vm8, %v2471_v33, %v2473_v54  ;;  %v5890_v32 = vld [vmem:[#allocation63_spill] sm:$0xff] }
 0x80c   :  { %v2390_v16 = vadd.f32 %v2382_v60, %v2329_v8  ;;  %v2391_v48 = vadd.f32 %v2383_v42, %v2330_v26  ;;  %v2543_v15 = vmul.f32 %v5884_v52, %v2534_v5  ;;  %v2553_v22 = vperm.slane %v2490_v46, 3 }
 0x80d   :  { %v5442_v43 = vsel %vm4040_vm10, %v2480_v44, 0.0  ;;  %v2489_v37 = vsel %vm4061_vm11, %v2481_v59, 0.0  ;;  %v2548_v45 = vadd.f32 %v2544_v63, %v2529_v12  ;;  %v2563_v18 = vmul.f32 %v5887_v21, %v2554_v6  ;;  %v5891_v44 = vld [vmem:[#allocation19_spill] sm:$0xff] }
 0x80e   :  { %v2451_v2 = vadd.f32 %v5197_v10, %v2390_v16  ;;  %v2452_v28 = vadd.f32 %v5201_v39, %v2391_v48  ;;  %v2494_v11 = vperm.slane %v5442_v43, 0  ;;  %v2495_v54 = vperm.slane %v2489_v37, 0 }
 0x80f   :  { %v2514_v9 = vperm.slane %v2489_v37, 1  ;;  %v2547_v1 = vadd.f32 %v2543_v15, %v2528_v49  ;;  %v2604_v46 = vsel %vm5888_vm9, %v2598_v31, %v5347_v13  ;;  %v2562_v10 = vmul.f32 %v5887_v21, %v2553_v22  ;;  %v5465_v19 = vpop.permute.xlu2 %2917 }
 0x810   :  { %v2596_v57 = vpop.permute.xlu1 %2595  ;;  %v2503_v0 = vmul.f32 %v5882_v56, %v2494_v11  ;;  %v2504_v29 = vmul.f32 %v5882_v56, %v2495_v54  ;;  %v2567_v34 = vadd.f32 %v2563_v18, %v2548_v45  ;;  %v2513_v39 = vperm.slane %v5442_v43, 1 }
 0x811   :  { %v2592_v17 = vpop.permute.xlu0 %2591  ;;  %v2533_v42 = vperm.slane %v2489_v37, 2  ;;  %v2523_v30 = vmul.f32 %v5883_v40, %v2514_v9  ;;  %v2612_v47 = vsel %vm3976_vm6, %v2604_v46, 0.0  ;;  %v2603_v13 = vsel %vm5889_vm12, %v2596_v57, %v2598_v31  ;;  %v5893_v9 = vld [vmem:[#allocation64_spill] sm:$0xff] }
 0x812   :  { %v2508_v51 = vadd.f32 %v2504_v29, %v2452_v28  ;;  %v2566_v27 = vadd.f32 %v2562_v10, %v2547_v1  ;;  %v2532_v24 = vperm.slane %v5442_v43, 2  ;;  %v2618_v55 = vperm.slane %v2612_v47, 0  ;;  %v5892_v28 = vld [vmem:[#allocation23_spill] sm:$0xff] }
 0x813   :  { %v2637_v56 = vperm.slane %v2612_v47, 1  ;;  %v2507_v14 = vadd.f32 %v2503_v0, %v2451_v2  ;;  %v2552_v33 = vperm.slane %v2489_v37, 3  ;;  %v2611_v60 = vsel %vm3982_vm7, %v2603_v13, 0.0 }
 0x814   :  { %v2527_v58 = vadd.f32 %v2523_v30, %v2508_v51  ;;  %v2522_v41 = vmul.f32 %v5883_v40, %v2513_v39  ;;  %v2627_v5 = vmul.f32 %v5890_v32, %v2618_v55  ;;  %v2656_v8 = vperm.slane %v2612_v47, 2 }
 0x815   :  { %v2617_v26 = vperm.slane %v2611_v60, 0  ;;  %v2542_v31 = vmul.f32 %v5884_v52, %v2533_v42  ;;  %v2551_v35 = vperm.slane %v5442_v43, 3  ;;  %v2675_v12 = vperm.slane %v2612_v47, 3 }
 0x816   :  { %v2636_v63 = vperm.slane %v2611_v60, 1  ;;  %v2631_v6 = vadd.f32 %v2627_v5, %v2567_v34  ;;  %v2646_v49 = vmul.f32 %v5891_v44, %v2637_v56  ;;  %v2655_v48 = vperm.slane %v2611_v60, 2 }
 0x817   :  { %v2626_v16 = vmul.f32 %v5890_v32, %v2617_v26  ;;  %v2526_v40 = vadd.f32 %v2522_v41, %v2507_v14  ;;  %v2541_v15 = vmul.f32 %v5884_v52, %v2532_v24  ;;  %v2546_v22 = vadd.f32 %v2542_v31, %v2527_v58  ;;  %v2963_v58 = vpop.permute.xlu2 %2962 }
 0x818   :  { %v2590_v59 = vpop.permute.xlu1 %2589  ;;  %v2561_v37 = vmul.f32 %v5887_v21, %v2552_v33  ;;  %v2650_v2 = vadd.f32 %v2646_v49, %v2631_v6  ;;  %v2665_v43 = vmul.f32 %v5892_v28, %v2656_v8  ;;  %v2645_v54 = vmul.f32 %v5891_v44, %v2636_v63 }
 0x819   :  { %v5473_v45 = vpop.permute.xlu0 %2866  ;;  %v2630_v11 = vadd.f32 %v2626_v16, %v2566_v27  ;;  %v2684_v1 = vmul.f32 %v5893_v9, %v2675_v12  ;;  %v2664_v18 = vmul.f32 %v5892_v28, %v2655_v48  ;;  %v2674_v46 = vperm.slane %v2611_v60, 3 }
 0x81a   :  { %v2602_v57 = vsel %vm5894_vm13, %v2592_v17, %v5403_v4  ;;  %v2601_v29 = vsel %vm5895_vm14, %v2590_v59, %v2592_v17  ;;  %v2669_v10 = vadd.f32 %v2665_v43, %v2650_v2  ;;  %v2565_v34 = vadd.f32 %v2561_v37, %v2546_v22 }
 0x81b   :  { %v2649_v52 = vadd.f32 %v2645_v54, %v2630_v11  ;;  %v2610_v0 = vsel %vm3976_vm6, %v2602_v57, 0.0  ;;  %v2545_v51 = vadd.f32 %v2541_v15, %v2526_v40  ;;  %v2609_v30 = vsel %vm3982_vm7, %v2601_v29, 0.0  ;;  %v5897_v54 = vld [vmem:[#allocation42_spill] sm:$0xff] }
 0x81c   :  { %v2616_v39 = vperm.slane %v2610_v0, 0  ;;  %v2635_v42 = vperm.slane %v2610_v0, 1  ;;  %v2688_v13 = vadd.f32 %v2684_v1, %v2669_v10  ;;  %v2683_v27 = vmul.f32 %v5893_v9, %v2674_v46  ;;  %v5899_v57 = vld [vmem:[#allocation66_spill] sm:$0xff] }
 0x81d   :  { %v2668_v47 = vadd.f32 %v2664_v18, %v2649_v52  ;;  %v2654_v24 = vperm.slane %v2610_v0, 2  ;;  %v2560_v53 = vmul.f32 %v5887_v21, %v2551_v35  ;;  %v2673_v55 = vperm.slane %v2610_v0, 3  ;;  %v5898_v18 = vld [vmem:[#allocation53_spill] sm:$0xff]  ;;  %v5900_v52 = vld [vmem:[#allocation68_spill] sm:$0xff] }
 0x81e   :  { %v2625_v4 = vmul.f32 %v5890_v32, %v2616_v39  ;;  %v2615_v56 = vperm.slane %v2609_v30, 0  ;;  %v2634_v17 = vperm.slane %v2609_v30, 1  ;;  %v2644_v60 = vmul.f32 %v5891_v44, %v2635_v42  ;;  %v5901_v0 = vld [vmem:[#allocation56_spill] sm:$0xff] }
 0x81f   :  { %v2687_v41 = vadd.f32 %v2683_v27, %v2668_v47  ;;  %v2757_v7 = vadd.f32 %v5256_v50, %v2688_v13  ;;  %v2810_v8 = vsel %vm1214_vm1, %v5292_v62, %v5140_v38  ;;  %v2564_v26 = vadd.f32 %v2560_v53, %v2545_v51  ;;  %v2961_v11 = vpop.permute.xlu2 %2960 }
 0x820   :  { %v2865_v14 = vpop.permute.xlu1 %2864  ;;  %v2629_v33 = vadd.f32 %v2625_v4, %v2565_v34  ;;  %v2624_v31 = vmul.f32 %v5890_v32, %v2615_v56  ;;  %v2653_v21 = vperm.slane %v2609_v30, 2  ;;  %v2663_v12 = vmul.f32 %v5892_v28, %v2654_v24  ;;  %v5902_v34 = vld [vmem:[#allocation46_spill] sm:$0xff] }
 0x821   :  { %v2959_v5 = vpop.permute.xlu0 %2958  ;;  %v2756_v63 = vadd.f32 %v5252_v23, %v2687_v41  ;;  %v2818_v6 = vadd.f32 %v2810_v8, %v2757_v7  ;;  %v2643_v16 = vmul.f32 %v5891_v44, %v2634_v17  ;;  %v2672_v48 = vperm.slane %v2609_v30, 3  ;;  %v5896_v44 = vld [vmem:[#allocation65_spill] sm:$0xff] }
 0x822   :  { %v2648_v35 = vadd.f32 %v2644_v60, %v2629_v33  ;;  %v2628_v49 = vadd.f32 %v2624_v31, %v2564_v26  ;;  %v2682_v59 = vmul.f32 %v5893_v9, %v2673_v55  ;;  %v2662_v62 = vmul.f32 %v5892_v28, %v2653_v21 }
 0x823   :  { %v2817_v40 = vadd.f32 %v5296_v25, %v2756_v63  ;;  %v2681_v22 = vmul.f32 %v5893_v9, %v2672_v48  ;;  %v2808_v1 = vsel %vm1214_vm1, %v5897_v54, %v5896_v44  ;;  %v2869_v28 = vsel %vm1214_vm1, %v5900_v52, %v5899_v57 }
 0x824   :  { %v2667_v50 = vadd.f32 %v2663_v12, %v2648_v35  ;;  %v2647_v38 = vadd.f32 %v2643_v16, %v2628_v49  ;;  %vm5903_vm6 = vcmask 769024   ;;  %v2870_v53 = vsel %vm1214_vm1, %v5437_v36, %v2865_v14 }
 0x825   :  { %v2968_v30 = vsel %vm5903_vm6, %v2961_v11, %v2963_v58  ;;  %vm5904_vm7 = vmmov %vm5903_vm6  ;;  %v2871_v55 = vsel %vm1214_vm1, %v2865_v14, %v5473_v45  ;;  %v2878_v8 = vadd.f32 %v2870_v53, %v2817_v40  ;;  %v3065_v53 = vld.sshfl [vmem:[#allocation1] sm:$0xff pattern:$0x75316420] }
 0x826   :  { %v2686_v32 = vadd.f32 %v2682_v59, %v2667_v50  ;;  %v2666_v15 = vadd.f32 %v2662_v62, %v2647_v38  ;;  %vm5905_vm15 = vmmov %vm5903_vm6  ;;  %v2976_v24 = vsel %vm4040_vm10, %v2968_v30, 0.0  ;;  %v2879_v14 = vadd.f32 %v2871_v55, %v2818_v6  ;;  %v3066_v55 = vld.sshfl [vmem:[#allocation1 + $0x8] sm:$0xff pattern:$0x75316420] }
 0x827   :  { %v2926_v42 = vpop.permute.xlu2 %2925  ;;  %vm5906_vm2 = vmmov %vm5903_vm6  ;;  %v2982_v36 = vperm.slane %v2976_v24, 0  ;;  %v3039_v31 = vperm.slane %v2976_v24, 3  ;;  %v3020_v38 = vperm.slane %v2976_v24, 2 }
 0x828   :  { %v2957_v37 = vpop.permute.xlu1 %2956  ;;  %v2755_v23 = vadd.f32 %v5237_v20, %v2686_v32  ;;  %v2685_v43 = vadd.f32 %v2681_v22, %v2666_v15 }
 0x829   :  { %v2955_v2 = vpop.permute.xlu0 %2954  ;;  %v2967_v47 = vsel %vm5904_vm7, %v2957_v37, %v2959_v5  ;;  %v3001_v5 = vperm.slane %v2976_v24, 1 }
 0x82a   :  { %v2754_v46 = vadd.f32 %v5898_v18, %v2685_v43  ;;  %v2816_v25 = vadd.f32 %v2808_v1, %v2755_v23  ;;  %v2966_v13 = vsel %vm5905_vm15, %v2955_v2, %v2957_v37  ;;  %v2975_v17 = vsel %vm4061_vm11, %v2967_v47, 0.0 }
 0x82b   :  { %v2974_v33 = vsel %vm4040_vm10, %v2966_v13, 0.0  ;;  %v2981_v26 = vperm.slane %v2975_v17, 0  ;;  %v3000_v50 = vperm.slane %v2975_v17, 1  ;;  %v3038_v59 = vperm.slane %v2975_v17, 3 }
 0x82c   :  { %v2815_v29 = vadd.f32 %v5901_v0, %v2754_v46  ;;  %v2877_v9 = vadd.f32 %v2869_v28, %v2816_v25  ;;  %v2980_v21 = vperm.slane %v2974_v33, 0  ;;  %v2999_v40 = vperm.slane %v2974_v33, 1 }
 0x82d   :  { %v3037_v62 = vperm.slane %v2974_v33, 3  ;;  %v3018_v6 = vperm.slane %v2974_v33, 2  ;;  %v3019_v37 = vperm.slane %v2975_v17, 2 }
 0x82e   :  { %v2876_v39 = vadd.f32 %v5902_v34, %v2815_v29 }
 0x82f   :  { %v2924_v56 = vpop.permute.xlu2 %2923 }
 0x830   :  { %v2965_v10 = vpop.permute.xlu1 %2964  ;;  %v2931_v3 = vsel %vm1214_vm1, %v2924_v56, %v2926_v42 }
 0x831   :  { %v2922_v20 = vpop.permute.xlu0 %2921  ;;  %v2969_v27 = vsel %vm5906_vm2, %v2963_v58, %v2965_v10  ;;  %v2939_v48 = vadd.f32 %v2931_v3, %v2878_v8 }
 0x832   :  { %v2977_v58 = vsel %vm4061_vm11, %v2969_v27, 0.0 }
 0x833   :  { %v2983_v35 = vperm.slane %v2977_v58, 0  ;;  %v3002_v15 = vperm.slane %v2977_v58, 1  ;;  %v3040_v22 = vperm.slane %v2977_v58, 3  ;;  %v3021_v2 = vperm.slane %v2977_v58, 2 }
 0x837   :  { %v3044_v18 = vpop.permute.xlu2 %3043 }
 0x838   :  { %v2920_v51 = vpop.permute.xlu1 %2919  ;;  %v3046_v30 = vmul.f32 %v3044_v18, %v3037_v62  ;;  %v3049_v47 = vmul.f32 %v3044_v18, %v3040_v22 }
 0x839   :  { %v2987_v4 = vpop.permute.xlu0 %2986  ;;  %v2929_v60 = vsel %vm1214_vm1, %v5465_v19, %v2920_v51  ;;  %v2930_v41 = vsel %vm1214_vm1, %v2920_v51, %v2922_v20  ;;  %v3048_v51 = vmul.f32 %v3044_v18, %v3039_v31 }
 0x83a   :  { %v2937_v61 = vadd.f32 %v2929_v60, %v2876_v39  ;;  %v2938_v12 = vadd.f32 %v2930_v41, %v2877_v9  ;;  %v2989_v63 = vmul.f32 %v2987_v4, %v2980_v21  ;;  %v2990_v49 = vmul.f32 %v2987_v4, %v2981_v26  ;;  %v3069_v41 = vld.sshfl [vmem:[#allocation1 + $0x10] sm:$0xff pattern:$0x75316420] }
 0x83b   :  { %v2991_v19 = vmul.f32 %v2987_v4, %v2982_v36  ;;  %v2992_v32 = vmul.f32 %v2987_v4, %v2983_v35 }
 0x83c   :  { %v2993_v43 = vadd.f32 %v2989_v63, %v2937_v61  ;;  %v2994_v11 = vadd.f32 %v2990_v49, %v2938_v12 }
 0x83d   :  { %v2995_v44 = vadd.f32 %v2991_v19, %v2939_v48 }
 0x840   :  { %v2928_v7 = vpop.permute.xlu1 %2927 }
 0x841   :  { %v2932_v45 = vsel %vm1214_vm1, %v2926_v42, %v2928_v7  ;;  %v3025_v23 = vpop.permute.xlu0 %3024  ;;  %v3047_v42 = vmul.f32 %v3044_v18, %v3038_v59  ;;  %v3070_v7 = vld.sshfl [vmem:[#allocation1 + $0x18] sm:$0xff pattern:$0x75316420] }
 0x842   :  { %v2940_v16 = vadd.f32 %v2932_v45, %v2879_v14  ;;  %v3027_v28 = vmul.f32 %v3025_v23, %v3018_v6  ;;  %v3028_v0 = vmul.f32 %v3025_v23, %v3019_v37  ;;  %v3029_v29 = vmul.f32 %v3025_v23, %v3020_v38 }
 0x843   :  { %v3030_v9 = vmul.f32 %v3025_v23, %v3021_v2 }
 0x844   :  { %v2996_v54 = vadd.f32 %v2992_v32, %v2940_v16 }
 0x848   :  { %v3006_v1 = vpop.permute.xlu1 %3005 }
 0x849   :  { %v3008_v46 = vmul.f32 %v3006_v1, %v2999_v40  ;;  %v3009_v25 = vmul.f32 %v3006_v1, %v3000_v50  ;;  %v3010_v57 = vmul.f32 %v3006_v1, %v3001_v5  ;;  %v3011_v52 = vmul.f32 %v3006_v1, %v3002_v15 }
 0x84b   :  { %v3012_v10 = vadd.f32 %v3008_v46, %v2993_v43  ;;  %v3013_v34 = vadd.f32 %v3009_v25, %v2994_v11  ;;  %v3014_v39 = vadd.f32 %v3010_v57, %v2995_v44  ;;  %v3015_v20 = vadd.f32 %v3011_v52, %v2996_v54 }
 0x84d   :  { %v3031_v13 = vadd.f32 %v3027_v28, %v3012_v10  ;;  %v3032_v27 = vadd.f32 %v3028_v0, %v3013_v34  ;;  %v3033_v4 = vadd.f32 %v3029_v29, %v3014_v39  ;;  %v3034_v24 = vadd.f32 %v3030_v9, %v3015_v20 }
 0x84f   :  { %v3050_v56 = vadd.f32 %v3046_v30, %v3031_v13  ;;  %v3051_v17 = vadd.f32 %v3047_v42, %v3032_v27  ;;  %v3052_v33 = vadd.f32 %v3048_v51, %v3033_v4  ;;  %v3053_v58 = vadd.f32 %v3049_v47, %v3034_v24 }
 0x850   :  { %v3058_v60 = vpop.permute.xlu1 %3057 }
 0x851   :  { %v3060_v36 = vadd.f32 %v3058_v60, %v3050_v56  ;;  %v3061_v5 = vadd.f32 %v3058_v60, %v3051_v17  ;;  %v3062_v8 = vadd.f32 %v3058_v60, %v3052_v33  ;;  %v3063_v45 = vadd.f32 %v3058_v60, %v3053_v58 }
 0x853   :  { %v3075_v14 = vadd.f32 %v3065_v53, %v3060_v36  ;;  %v3076_v26 = vadd.f32 %v3066_v55, %v3061_v5  ;;  %v3077_v31 = vadd.f32 %v3069_v41, %v3062_v8  ;;  %v3078_v21 = vadd.f32 %v3070_v7, %v3063_v45 }
 0x855   :  { %v3080_v3 = vmax.f32 %v3076_v26, 0.0  ;;  %v3082_v35 = vmax.f32 %v3078_v21, 0.0  ;;  %v3079_v61 = vmax.f32 %v3075_v14, 0.0  ;;  %v3081_v12 = vmax.f32 %v3077_v31, 0.0 }
 0x857   :  { %v3087_v63 = vrot.slane %v3080_v3, 4  ;;  %v3088_v49 = vrot.slane %v3082_v35, 4 }
 0x859   :  { %v3089_v19 = vsel %vm1524_vm3, %v3079_v61, %v3087_v63  ;;  %v3090_v16 = vsel %vm1524_vm3, %v3081_v12, %v3088_v49 }
 0x85a   :  { %3093 = vst [vmem:[#allocation3] sm:$0xff] %v3089_v19 }
 0x85b   :  { %3094 = vst [vmem:[#allocation3 + $0x8] sm:$0xff] %v3090_v16 }
 0x85c   :  { %3107 = dma.vmem_to_hbm [thread:$0]  %s3100_s5, 256, %s3102_s17, [#allocation4], %s3240_s18, %s3240_s18, %s3241_s1  }
 0x85d   :  { %3226 = dma.done.wait [#allocation4], 256  }
 0x85e   :  { %3227 = vsyncadd [#allocation4], 4294967040 }
 0x85f   :  { %3112 = vsyncpa [#allocation4], 1 }

</bundles_post_ra>
